<compile_context>
chip_gen: v7x
topology: tpu7x:2x2x1
jax: 0.10.0
libtpu: 0.0.40
codegen_flags: <defaults>
</compile_context>

<pallas_src>
import jax
import jax.numpy as jnp
from jax.experimental import pallas as pl
from jax.experimental.pallas import tpu as pltpu

LATENT_SIZE = 62
NUM_CATEGORIES = 10
NUM_CONTINUOUS = 2
IN_DIM = LATENT_SIZE + NUM_CATEGORIES + NUM_CONTINUOUS  # 74
IN_PAD = 128                                            # lane-padded input width
H1, H2, H3 = 256, 512, 1024
IMAGE_SIZE = 28 * 28                                    # 784
OUT_PAD = 896                                           # 7 * 128, lane-padded output


def _round_up(x, m):
    return (x + m - 1) // m * m


def generator_kernel(x_ref,
                     w1_ref, b1_ref,
                     w2_ref, b2_ref,
                     w3_ref, b3_ref,
                     w4_ref, b4_ref,
                     o_ref):
    # Linear 128(74) -> 256, ReLU   (bf16 matmul, f32 accumulate)
    h = jnp.dot(x_ref[...], w1_ref[...],
                preferred_element_type=jnp.float32) + b1_ref[...]
    h = jnp.maximum(h, 0.0).astype(jnp.bfloat16)
    # Linear 256 -> 512, ReLU
    h = jnp.dot(h, w2_ref[...],
                preferred_element_type=jnp.float32) + b2_ref[...]
    h = jnp.maximum(h, 0.0).astype(jnp.bfloat16)
    # Linear 512 -> 1024, ReLU
    h = jnp.dot(h, w3_ref[...],
                preferred_element_type=jnp.float32) + b3_ref[...]
    h = jnp.maximum(h, 0.0).astype(jnp.bfloat16)
    # Linear 1024 -> 896(784), Tanh
    h = jnp.dot(h, w4_ref[...],
                preferred_element_type=jnp.float32) + b4_ref[...]
    o_ref[...] = jnp.tanh(h).astype(o_ref.dtype)


def generator_forward(z, c_cat, c_cont, params, *, batch_tile=256):
    """z: (B, 62), c_cat: (B, 10), c_cont: (B, 2) -> (B, 784) float32."""
    # Glue: concat + lane pad to 128 columns, done once in plain JAX.
    x = jnp.concatenate([z, c_cat, c_cont], axis=1)          # (B, 74)
    B = x.shape[0]
    x = jnp.pad(x, ((0, 0), (0, IN_PAD - IN_DIM)))            # (B, 128)

    # Pick an effective batch tile (shrink for tiny batches) and pad the batch.
    tile = min(batch_tile, _round_up(B, 8))
    b_pad = _round_up(B, tile)
    if b_pad != B:
        x = jnp.pad(x, ((0, b_pad - B), (0, 0)))
    x = x.astype(jnp.bfloat16)

    (w1, b1), (w2, b2), (w3, b3), (w4, b4) = params

    def weight_spec(shape):
        # Full-array block, constant index: stays resident across the grid.
        return pl.BlockSpec(shape, lambda i: (0, 0))

    grid = (b_pad // tile,)
    out = pl.pallas_call(
        generator_kernel,
        out_shape=jax.ShapeDtypeStruct((b_pad, OUT_PAD), jnp.float32),
        grid_spec=pltpu.PrefetchScalarGridSpec(
            num_scalar_prefetch=0,
            grid=grid,
            in_specs=[
                pl.BlockSpec((tile, IN_PAD), lambda i: (i, 0)),
                weight_spec(w1.shape), weight_spec(b1.shape),
                weight_spec(w2.shape), weight_spec(b2.shape),
                weight_spec(w3.shape), weight_spec(b3.shape),
                weight_spec(w4.shape), weight_spec(b4.shape),
            ],
            out_specs=pl.BlockSpec((tile, OUT_PAD), lambda i: (i, 0)),
        ),
        compiler_params=pltpu.CompilerParams(
            dimension_semantics=("parallel",),
            vmem_limit_bytes=32 * 1024 * 1024,
        ),
    )(x, w1, b1, w2, b2, w3, b3, w4, b4)

    return out[:B, :IMAGE_SIZE]


def init_params(key):
    """Torch nn.Linear default init (U(-1/sqrt(in), 1/sqrt(in))), then
    lane-pad and cast weights to bf16 (biases stay f32)."""
    dims = [(IN_DIM, H1), (H1, H2), (H2, H3), (H3, IMAGE_SIZE)]
    pads = [(IN_PAD, H1), (H1, H2), (H2, H3), (H3, OUT_PAD)]
    params = []
    for (fan_in, fan_out), (pin, pout) in zip(dims, pads):
        key, kw, kb = jax.random.split(key, 3)
        bound = 1.0 / float(fan_in) ** 0.5
        w = jax.random.uniform(kw, (fan_in, fan_out), jnp.float32,
                               minval=-bound, maxval=bound)
        b = jax.random.uniform(kb, (1, fan_out), jnp.float32,
                               minval=-bound, maxval=bound)
        w = jnp.pad(w, ((0, pin - fan_in), (0, pout - fan_out)))
        b = jnp.pad(b, ((0, 0), (0, pout - fan_out)))
        params.append((w.astype(jnp.bfloat16), b))
    return params


def reference_forward(z, c_cat, c_cont, params):
    """Pure-JAX reference with matching bf16-matmul / f32-accumulate precision."""
    x = jnp.concatenate([z, c_cat, c_cont], axis=1)
    x = jnp.pad(x, ((0, 0), (0, IN_PAD - IN_DIM))).astype(jnp.bfloat16)
    (w1, b1), (w2, b2), (w3, b3), (w4, b4) = params
    h = jax.nn.relu(jnp.dot(x, w1, preferred_element_type=jnp.float32) + b1)
    h = jax.nn.relu(jnp.dot(h.astype(jnp.bfloat16), w2,
                            preferred_element_type=jnp.float32) + b2)
    h = jax.nn.relu(jnp.dot(h.astype(jnp.bfloat16), w3,
                            preferred_element_type=jnp.float32) + b3)
    out = jnp.tanh(jnp.dot(h.astype(jnp.bfloat16), w4,
                           preferred_element_type=jnp.float32) + b4)
    return out[:, :IMAGE_SIZE]


if __name__ == "__main__":
    key = jax.random.PRNGKey(0)
    kp, kz, kc, ku = jax.random.split(key, 4)

    params = init_params(kp)

    B = 16
    z = jax.random.normal(kz, (B, LATENT_SIZE), jnp.float32)
    cat_idx = jax.random.randint(kc, (B,), 0, NUM_CATEGORIES)
    c_cat = jax.nn.one_hot(cat_idx, NUM_CATEGORIES, dtype=jnp.float32)
    c_cont = jax.random.uniform(ku, (B, NUM_CONTINUOUS), jnp.float32,
                                minval=-1.0, maxval=1.0)

    out = generator_forward(z, c_cat, c_cont, params)
    out = jax.block_until_ready(out)

    ref = reference_forward(z, c_cat, c_cont, params)
    assert out.shape == (B, IMAGE_SIZE)
    assert jnp.allclose(out, ref, atol=2e-2, rtol=2e-2), float(
        jnp.max(jnp.abs(out - ref)))

    print("KERNEL_OK")
</pallas_src>

<mosaic_0001>
module attributes {stable_mosaic.version = 11 : i64} {
  func.func @generator_kernel(%arg0: i32, %arg1: memref<16x128xbf16, #tpu.memory_space<vmem>>, %arg2: memref<128x256xbf16, #tpu.memory_space<vmem>>, %arg3: memref<1x256xf32, #tpu.memory_space<vmem>>, %arg4: memref<256x512xbf16, #tpu.memory_space<vmem>>, %arg5: memref<1x512xf32, #tpu.memory_space<vmem>>, %arg6: memref<512x1024xbf16, #tpu.memory_space<vmem>>, %arg7: memref<1x1024xf32, #tpu.memory_space<vmem>>, %arg8: memref<1024x896xbf16, #tpu.memory_space<vmem>>, %arg9: memref<1x896xf32, #tpu.memory_space<vmem>>, %arg10: memref<16x896xf32, #tpu.memory_space<vmem>>) attributes {dimension_semantics = [#tpu.dimension_semantics<parallel>], iteration_bounds = array<i64: 1>, scalar_prefetch = 0 : i64, scratch_operands = 0 : i64, tpu.core_type = #tpu.core_type<tc>, window_params = [{transform_indices = @transform_0, window_bounds = array<i64: 16, 128>}, {pipeline_mode = #tpu.pipeline_mode<synchronous>, transform_indices = @transform_1, window_bounds = array<i64: 128, 256>}, {pipeline_mode = #tpu.pipeline_mode<synchronous>, transform_indices = @transform_2, window_bounds = array<i64: 1, 256>}, {pipeline_mode = #tpu.pipeline_mode<synchronous>, transform_indices = @transform_3, window_bounds = array<i64: 256, 512>}, {pipeline_mode = #tpu.pipeline_mode<synchronous>, transform_indices = @transform_4, window_bounds = array<i64: 1, 512>}, {pipeline_mode = #tpu.pipeline_mode<synchronous>, transform_indices = @transform_5, window_bounds = array<i64: 512, 1024>}, {pipeline_mode = #tpu.pipeline_mode<synchronous>, transform_indices = @transform_6, window_bounds = array<i64: 1, 1024>}, {pipeline_mode = #tpu.pipeline_mode<synchronous>, transform_indices = @transform_7, window_bounds = array<i64: 1024, 896>}, {pipeline_mode = #tpu.pipeline_mode<synchronous>, transform_indices = @transform_8, window_bounds = array<i64: 1, 896>}, {transform_indices = @transform_9, window_bounds = array<i64: 16, 896>}]} {
    %c0 = arith.constant 0 : index
    %c0_0 = arith.constant 0 : index
    %0 = vector.load %arg1[%c0, %c0_0] : memref<16x128xbf16, #tpu.memory_space<vmem>>, vector<16x128xbf16>
    %c0_1 = arith.constant 0 : index
    %c0_2 = arith.constant 0 : index
    %1 = vector.load %arg2[%c0_1, %c0_2] : memref<128x256xbf16, #tpu.memory_space<vmem>>, vector<128x256xbf16>
    %cst = arith.constant dense<0.000000e+00> : vector<16x256xf32>
    %2 = tpu.matmul %0, %1, %cst {dimension_numbers = #tpu.dot_dimension_numbers<[1], [0], [0], [1], [0, 0, 1, 1], [], []>} : vector<16x128xbf16>, vector<128x256xbf16>, vector<16x256xf32> -> vector<16x256xf32>
    %c0_3 = arith.constant 0 : index
    %c0_4 = arith.constant 0 : index
    %3 = vector.load %arg3[%c0_3, %c0_4] : memref<1x256xf32, #tpu.memory_space<vmem>>, vector<1x256xf32>
    %4 = vector.broadcast %3 : vector<1x256xf32> to vector<16x256xf32>
    %5 = arith.addf %2, %4 : vector<16x256xf32>
    %cst_5 = arith.constant 0.000000e+00 : f32
    %6 = vector.broadcast %cst_5 : f32 to vector<16x256xf32>
    %7 = arith.maximumf %5, %6 : vector<16x256xf32>
    %8 = arith.truncf %7 : vector<16x256xf32> to vector<16x256xbf16>
    %c0_6 = arith.constant 0 : index
    %c0_7 = arith.constant 0 : index
    %9 = vector.load %arg4[%c0_6, %c0_7] : memref<256x512xbf16, #tpu.memory_space<vmem>>, vector<256x512xbf16>
    %cst_8 = arith.constant dense<0.000000e+00> : vector<16x512xf32>
    %10 = tpu.matmul %8, %9, %cst_8 {dimension_numbers = #tpu.dot_dimension_numbers<[1], [0], [0], [1], [0, 0, 1, 1], [], []>} : vector<16x256xbf16>, vector<256x512xbf16>, vector<16x512xf32> -> vector<16x512xf32>
    %c0_9 = arith.constant 0 : index
    %c0_10 = arith.constant 0 : index
    %11 = vector.load %arg5[%c0_9, %c0_10] : memref<1x512xf32, #tpu.memory_space<vmem>>, vector<1x512xf32>
    %12 = vector.broadcast %11 : vector<1x512xf32> to vector<16x512xf32>
    %13 = arith.addf %10, %12 : vector<16x512xf32>
    %cst_11 = arith.constant 0.000000e+00 : f32
    %14 = vector.broadcast %cst_11 : f32 to vector<16x512xf32>
    %15 = arith.maximumf %13, %14 : vector<16x512xf32>
    %16 = arith.truncf %15 : vector<16x512xf32> to vector<16x512xbf16>
    %c0_12 = arith.constant 0 : index
    %c0_13 = arith.constant 0 : index
    %17 = vector.load %arg6[%c0_12, %c0_13] : memref<512x1024xbf16, #tpu.memory_space<vmem>>, vector<512x1024xbf16>
    %cst_14 = arith.constant dense<0.000000e+00> : vector<16x1024xf32>
    %18 = tpu.matmul %16, %17, %cst_14 {dimension_numbers = #tpu.dot_dimension_numbers<[1], [0], [0], [1], [0, 0, 1, 1], [], []>} : vector<16x512xbf16>, vector<512x1024xbf16>, vector<16x1024xf32> -> vector<16x1024xf32>
    %c0_15 = arith.constant 0 : index
    %c0_16 = arith.constant 0 : index
    %19 = vector.load %arg7[%c0_15, %c0_16] : memref<1x1024xf32, #tpu.memory_space<vmem>>, vector<1x1024xf32>
    %20 = vector.broadcast %19 : vector<1x1024xf32> to vector<16x1024xf32>
    %21 = arith.addf %18, %20 : vector<16x1024xf32>
    %cst_17 = arith.constant 0.000000e+00 : f32
    %22 = vector.broadcast %cst_17 : f32 to vector<16x1024xf32>
    %23 = arith.maximumf %21, %22 : vector<16x1024xf32>
    %24 = arith.truncf %23 : vector<16x1024xf32> to vector<16x1024xbf16>
    %c0_18 = arith.constant 0 : index
    %c0_19 = arith.constant 0 : index
    %25 = vector.load %arg8[%c0_18, %c0_19] : memref<1024x896xbf16, #tpu.memory_space<vmem>>, vector<1024x896xbf16>
    %cst_20 = arith.constant dense<0.000000e+00> : vector<16x896xf32>
    %26 = tpu.matmul %24, %25, %cst_20 {dimension_numbers = #tpu.dot_dimension_numbers<[1], [0], [0], [1], [0, 0, 1, 1], [], []>} : vector<16x1024xbf16>, vector<1024x896xbf16>, vector<16x896xf32> -> vector<16x896xf32>
    %c0_21 = arith.constant 0 : index
    %c0_22 = arith.constant 0 : index
    %27 = vector.load %arg9[%c0_21, %c0_22] : memref<1x896xf32, #tpu.memory_space<vmem>>, vector<1x896xf32>
    %28 = vector.broadcast %27 : vector<1x896xf32> to vector<16x896xf32>
    %29 = arith.addf %26, %28 : vector<16x896xf32>
    %30 = math.tanh %29 : vector<16x896xf32>
    %c0_23 = arith.constant 0 : index
    %c0_24 = arith.constant 0 : index
    %31 = vector.load %arg10[%c0_23, %c0_24] : memref<16x896xf32, #tpu.memory_space<vmem>>, vector<16x896xf32>
    tpu.vector_store %arg10[%c0_23, %c0_24], %30 {strides = array<i32>} : memref<16x896xf32, #tpu.memory_space<vmem>>, vector<16x896xf32>,
    return
  }
  func.func @transform_0(%arg0: i32) -> (i32, i32) {
    %c0_i32 = arith.constant 0 : i32
    %c0_i32_0 = arith.constant 0 : i32
    return %arg0, %c0_i32 : i32, i32
  }
  func.func @transform_1(%arg0: i32) -> (i32, i32) {
    %c0_i32 = arith.constant 0 : i32
    %c0_i32_0 = arith.constant 0 : i32
    %c0_i32_1 = arith.constant 0 : i32
    return %c0_i32, %c0_i32_0 : i32, i32
  }
  func.func @transform_2(%arg0: i32) -> (i32, i32) {
    %c0_i32 = arith.constant 0 : i32
    %c0_i32_0 = arith.constant 0 : i32
    %c0_i32_1 = arith.constant 0 : i32
    return %c0_i32, %c0_i32_0 : i32, i32
  }
  func.func @transform_3(%arg0: i32) -> (i32, i32) {
    %c0_i32 = arith.constant 0 : i32
    %c0_i32_0 = arith.constant 0 : i32
    %c0_i32_1 = arith.constant 0 : i32
    return %c0_i32, %c0_i32_0 : i32, i32
  }
  func.func @transform_4(%arg0: i32) -> (i32, i32) {
    %c0_i32 = arith.constant 0 : i32
    %c0_i32_0 = arith.constant 0 : i32
    %c0_i32_1 = arith.constant 0 : i32
    return %c0_i32, %c0_i32_0 : i32, i32
  }
  func.func @transform_5(%arg0: i32) -> (i32, i32) {
    %c0_i32 = arith.constant 0 : i32
    %c0_i32_0 = arith.constant 0 : i32
    %c0_i32_1 = arith.constant 0 : i32
    return %c0_i32, %c0_i32_0 : i32, i32
  }
  func.func @transform_6(%arg0: i32) -> (i32, i32) {
    %c0_i32 = arith.constant 0 : i32
    %c0_i32_0 = arith.constant 0 : i32
    %c0_i32_1 = arith.constant 0 : i32
    return %c0_i32, %c0_i32_0 : i32, i32
  }
  func.func @transform_7(%arg0: i32) -> (i32, i32) {
    %c0_i32 = arith.constant 0 : i32
    %c0_i32_0 = arith.constant 0 : i32
    %c0_i32_1 = arith.constant 0 : i32
    return %c0_i32, %c0_i32_0 : i32, i32
  }
  func.func @transform_8(%arg0: i32) -> (i32, i32) {
    %c0_i32 = arith.constant 0 : i32
    %c0_i32_0 = arith.constant 0 : i32
    %c0_i32_1 = arith.constant 0 : i32
    return %c0_i32, %c0_i32_0 : i32, i32
  }
  func.func @transform_9(%arg0: i32) -> (i32, i32) {
    %c0_i32 = arith.constant 0 : i32
    %c0_i32_0 = arith.constant 0 : i32
    return %arg0, %c0_i32 : i32, i32
  }
}

</mosaic_0001>

<bundles_post_ra>
// kernel: tpu_custom_call.1
= control target key start
LH: loop header
LB: loop body
LE: loop exit
PB: predicated region body
PF: predicated region fallthrough
CT: control target
= control target key end

     0   :  { %14 = vsyncpa [#allocation3], 0  ;;  %s8702_s0 = inlined_call_operand.hbm [shape: bf16[16,128], index: 0, kind: input, shape index: {}]   ;;  %s8703_s1 = inlined_call_operand.hbm [shape: bf16[128,256], index: 1, kind: input, shape index: {}]   ;;  %s8704_s2 = inlined_call_operand.hbm [shape: f32[1,256], index: 2, kind: input, shape index: {}]   ;;  %s8705_s3 = inlined_call_operand.hbm [shape: bf16[256,512], index: 3, kind: input, shape index: {}]   ;;  %s8706_s4 = inlined_call_operand.hbm [shape: f32[1,512], index: 4, kind: input, shape index: {}]   ;;  %s8707_s5 = inlined_call_operand.hbm [shape: bf16[512,1024], index: 5, kind: input, shape index: {}]   ;;  %s8708_s6 = inlined_call_operand.hbm [shape: f32[1,1024], index: 6, kind: input, shape index: {}]   ;;  %s8709_s7 = inlined_call_operand.hbm [shape: bf16[1024,896], index: 7, kind: input, shape index: {}]   ;;  %s8710_s8 = inlined_call_operand.hbm [shape: f32[1,896], index: 8, kind: input, shape index: {}]   ;;  %s8711_s9 = inlined_call_operand.hbm [shape: f32[16,896], index: 9, kind: output, shape index: {}]  }
   0x1   :  { %15 = vsyncpa [#allocation6], 0 }
   0x2   :  { %16 = vsyncpa [#allocation9], 0 }
   0x3   :  { %17 = vsyncpa [#allocation12], 0 }
   0x4   :  { %18 = vsyncpa [#allocation15], 0 }
   0x5   :  { %19 = vsyncpa [#allocation4], 0  ;;  %s8342_s30 = smov [#allocation5]   ;;  %s8110_s13 = scalar_lea.hbm %s8703_s1, 2048 }
   0x6   :  { %s37_s10 = sshll.u32 %s8342_s30, 4  ;;  %p8111_p0 = scmp.ne.s32.totalorder %s8703_s1, %s8110_s13  ;;  %s38_s10 = int_to_ptr.vmem [resolvable:$true] %s37_s10 }
   0x7   :  { %p8114_p1 = scmp.lt.u32.totalorder %s8110_s13, %s8703_s1 }
   0x9   :  { %p8116_p2 = pnand %p8114_p1, %p8111_p0 }
   0xb   :  { %8119 = shalt.err (!%p8116_p2)
}
   0xc   :  { %s8120_s18 = scalar_lea.vmem %s38_s10, 2048  ;;  %p8125_p4 = scmp.lt.s32.totalorder %s38_s10, %s38_s10 }
   0xd   :  { %p8121_p3 = scmp.ne.s32.totalorder %s38_s10, %s8120_s18  ;;  %p8126_p5 = scmp.lt.s32.totalorder %s8120_s18, %s8120_s18 }
   0xf   :  { %p8127_p6 = por %p8126_p5, %p8125_p4 }
  0x11   :  { %p8128_p7 = pnand %p8127_p6, %p8121_p3 }
  0x13   :  { %8131 = shalt.err (!%p8128_p7)
}
  0x14   :  { %s8343_s19 = smov 128   ;;  %s8344_s20 = smov 8  }
  0x15   :  { %43 = dma.hbm_to_vmem [thread:$0]  %s8703_s1, 2048, %s38_s10, [#allocation6], %s8343_s19, %s8343_s19, %s8344_s20  }
  0x16   :  { %s8345_s23 = smov [#allocation8]   ;;  %s8132_s27 = scalar_lea.hbm %s8705_s3, 8192 }
  0x17   :  { %s59_s24 = sshll.u32 %s8345_s23, 4  ;;  %p8133_p8 = scmp.ne.s32.totalorder %s8705_s3, %s8132_s27  ;;  %s60_s24 = int_to_ptr.vmem [resolvable:$true] %s59_s24 }
  0x18   :  { %p8136_p9 = scmp.lt.u32.totalorder %s8132_s27, %s8705_s3 }
  0x1a   :  { %p8138_p10 = pnand %p8136_p9, %p8133_p8 }
  0x1c   :  { %8141 = shalt.err (!%p8138_p10)
}
  0x1d   :  { %s8142_s12 = scalar_lea.vmem %s60_s24, 8192  ;;  %p8147_p12 = scmp.lt.s32.totalorder %s60_s24, %s60_s24 }
  0x1e   :  { %p8143_p11 = scmp.ne.s32.totalorder %s60_s24, %s8142_s12  ;;  %p8148_p13 = scmp.lt.s32.totalorder %s8142_s12, %s8142_s12 }
  0x20   :  { %p8149_p0 = por %p8148_p13, %p8147_p12 }
  0x22   :  { %p8150_p1 = pnand %p8149_p0, %p8143_p11 }
  0x24   :  { %8153 = shalt.err (!%p8150_p1)
}
  0x25   :  { %s8346_s1 = smov 256   ;;  %s8347_s10 = smov 16  }
  0x26   :  { %65 = dma.hbm_to_vmem [thread:$0]  %s8705_s3, 8192, %s60_s24, [#allocation9], %s8346_s1, %s8346_s1, %s8347_s10  }
  0x27   :  { %s8348_s15 = smov [#allocation11]   ;;  %s8154_s19 = scalar_lea.hbm %s8707_s5, 32768 }
  0x28   :  { %s81_s16 = sshll.u32 %s8348_s15, 4  ;;  %p8155_p2 = scmp.ne.s32.totalorder %s8707_s5, %s8154_s19  ;;  %s82_s16 = int_to_ptr.vmem [resolvable:$true] %s81_s16 }
  0x29   :  { %p8158_p3 = scmp.lt.u32.totalorder %s8154_s19, %s8707_s5 }
  0x2b   :  { %p8160_p4 = pnand %p8158_p3, %p8155_p2 }
  0x2d   :  { %8163 = shalt.err (!%p8160_p4)
}
  0x2e   :  { %s8164_s25 = scalar_lea.vmem %s82_s16, 32768  ;;  %p8169_p6 = scmp.lt.s32.totalorder %s82_s16, %s82_s16 }
  0x2f   :  { %p8165_p5 = scmp.ne.s32.totalorder %s82_s16, %s8164_s25  ;;  %p8170_p7 = scmp.lt.s32.totalorder %s8164_s25, %s8164_s25 }
  0x31   :  { %p8171_p8 = por %p8170_p7, %p8169_p6 }
  0x33   :  { %p8172_p9 = pnand %p8171_p8, %p8165_p5 }
  0x35   :  { %8175 = shalt.err (!%p8172_p9)
}
  0x36   :  { %s8349_s3 = smov 512   ;;  %s8350_s24 = smov 32  }
  0x37   :  { %87 = dma.hbm_to_vmem [thread:$0]  %s8707_s5, 32768, %s82_s16, [#allocation12], %s8349_s3, %s8349_s3, %s8350_s24  }
  0x38   :  { %s8351_s28 = smov [#allocation14]   ;;  %s8176_s12 = scalar_lea.hbm %s8709_s7, 57344 }
  0x39   :  { %s103_s29 = sshll.u32 %s8351_s28, 4  ;;  %p8177_p10 = scmp.ne.s32.totalorder %s8709_s7, %s8176_s12  ;;  %s104_s29 = int_to_ptr.vmem [resolvable:$true] %s103_s29 }
  0x3a   :  { %p8180_p11 = scmp.lt.u32.totalorder %s8176_s12, %s8709_s7 }
  0x3c   :  { %p8182_p12 = pnand %p8180_p11, %p8177_p10 }
  0x3e   :  { %8185 = shalt.err (!%p8182_p12)
}
  0x3f   :  { %s8186_s15 = scalar_lea.vmem %s104_s29, 57344  ;;  %p8191_p0 = scmp.lt.s32.totalorder %s104_s29, %s104_s29 }
  0x40   :  { %p8187_p13 = scmp.ne.s32.totalorder %s104_s29, %s8186_s15  ;;  %p8192_p1 = scmp.lt.s32.totalorder %s8186_s15, %s8186_s15 }
  0x42   :  { %p8193_p2 = por %p8192_p1, %p8191_p0 }
  0x44   :  { %p8194_p3 = pnand %p8193_p2, %p8187_p13 }
  0x46   :  { %8197 = shalt.err (!%p8194_p3)
}
  0x47   :  { %s8352_s5 = smov 448   ;;  %s8353_s16 = smov 28  }
  0x48   :  { %109 = dma.hbm_to_vmem [thread:$0]  %s8709_s7, 57344, %s104_s29, [#allocation15], %s8352_s5, %s8352_s5, %s8353_s16  }
  0x49   :  { %s8354_s19 = smov [#allocation2]   ;;  %s8198_s23 = scalar_lea.hbm %s8702_s0, 128 }
  0x4a   :  { %s25_s20 = sshll.u32 %s8354_s19, 4  ;;  %p8199_p4 = scmp.ne.s32.totalorder %s8702_s0, %s8198_s23  ;;  %s26_s20 = int_to_ptr.vmem [resolvable:$true] %s25_s20 }
  0x4b   :  { %p8202_p5 = scmp.lt.u32.totalorder %s8198_s23, %s8702_s0 }
  0x4d   :  { %p8204_p6 = pnand %p8202_p5, %p8199_p4 }
  0x4f   :  { %8207 = shalt.err (!%p8204_p6)
}
  0x50   :  { %s8208_s27 = scalar_lea.vmem %s26_s20, 128  ;;  %p8213_p8 = scmp.lt.s32.totalorder %s26_s20, %s26_s20 }
  0x51   :  { %p8209_p7 = scmp.ne.s32.totalorder %s26_s20, %s8208_s27  ;;  %p8214_p9 = scmp.lt.s32.totalorder %s8208_s27, %s8208_s27 }
  0x53   :  { %p8215_p10 = por %p8214_p9, %p8213_p8 }
  0x55   :  { %p8216_p11 = pnand %p8215_p10, %p8209_p7 }
  0x57   :  { %8219 = shalt.err (!%p8216_p11)
}
  0x58   :  { %s8355_s7 = smov 64   ;;  %s8356_s28 = smov 4  }
  0x59   :  { %31 = dma.hbm_to_vmem [thread:$0]  %s8702_s0, 128, %s26_s20, [#allocation3], %s8355_s7, %s8355_s7, %s8356_s28  }
  0x5a   :  { %s8357_s11 = smov [#allocation7]   ;;  %s8358_s1 = smov [#allocation10]  }
  0x5b   :  { %s50_s12 = sshll.u32 %s8357_s11, 4  ;;  %s72_s10 = sshll.u32 %s8358_s1, 4  ;;  %s51_s12 = int_to_ptr.vmem [resolvable:$true] %s50_s12  ;;  %s73_s10 = int_to_ptr.vmem [resolvable:$true] %s72_s10 }
  0x5c   :  { %s8220_s15 = scalar_lea.hbm %s8704_s2, 32 }
  0x5d   :  { %p8221_p12 = scmp.ne.s32.totalorder %s8704_s2, %s8220_s15  ;;  %p8224_p13 = scmp.lt.u32.totalorder %s8220_s15, %s8704_s2 }
  0x5f   :  { %p8226_p0 = pnand %p8224_p13, %p8221_p12 }
  0x61   :  { %8229 = shalt.err (!%p8226_p0)
}
  0x62   :  { %s8230_s0 = scalar_lea.vmem %s51_s12, 32  ;;  %p8235_p2 = scmp.lt.s32.totalorder %s51_s12, %s51_s12 }
  0x63   :  { %p8231_p1 = scmp.ne.s32.totalorder %s51_s12, %s8230_s0  ;;  %p8236_p3 = scmp.lt.s32.totalorder %s8230_s0, %s8230_s0 }
  0x65   :  { %p8237_p4 = por %p8236_p3, %p8235_p2 }
  0x67   :  { %p8238_p5 = pnand %p8237_p4, %p8231_p1 }
  0x69   :  { %8241 = shalt.err (!%p8238_p5)
}
  0x6a   :  { %53 = dma.hbm_to_vmem [thread:$0]  %s8704_s2, 32, %s51_s12, [#allocation6]  }
  0x6b   :  { %s8242_s23 = scalar_lea.hbm %s8706_s4, 64 }
  0x6c   :  { %p8243_p6 = scmp.ne.s32.totalorder %s8706_s4, %s8242_s23  ;;  %p8246_p7 = scmp.lt.u32.totalorder %s8242_s23, %s8706_s4 }
  0x6e   :  { %p8248_p8 = pnand %p8246_p7, %p8243_p6 }
  0x70   :  { %8251 = shalt.err (!%p8248_p8)
}
  0x71   :  { %s8252_s27 = scalar_lea.vmem %s73_s10, 64  ;;  %p8257_p10 = scmp.lt.s32.totalorder %s73_s10, %s73_s10 }
  0x72   :  { %p8253_p9 = scmp.ne.s32.totalorder %s73_s10, %s8252_s27  ;;  %p8258_p11 = scmp.lt.s32.totalorder %s8252_s27, %s8252_s27 }
  0x74   :  { %p8259_p12 = por %p8258_p11, %p8257_p10 }
  0x76   :  { %p8260_p13 = pnand %p8259_p12, %p8253_p9 }
  0x78   :  { %8263 = shalt.err (!%p8260_p13)
}
  0x79   :  { %75 = dma.hbm_to_vmem [thread:$0]  %s8706_s4, 64, %s73_s10, [#allocation9]  }
  0x7a   :  { %s8359_s28 = smov [#allocation13]   ;;  %s8360_s30 = smov [#allocation16]  }
  0x7b   :  { %s94_s29 = sshll.u32 %s8359_s28, 4  ;;  %s116_s11 = sshll.u32 %s8360_s30, 4  ;;  %s95_s29 = int_to_ptr.vmem [resolvable:$true] %s94_s29  ;;  %s117_s11 = int_to_ptr.vmem [resolvable:$true] %s116_s11 }
  0x7c   :  { %s8264_s13 = scalar_lea.hbm %s8708_s6, 128 }
  0x7d   :  { %p8265_p0 = scmp.ne.s32.totalorder %s8708_s6, %s8264_s13  ;;  %p8268_p1 = scmp.lt.u32.totalorder %s8264_s13, %s8708_s6 }
  0x7f   :  { %p8270_p2 = pnand %p8268_p1, %p8265_p0 }
  0x81   :  { %8273 = shalt.err (!%p8270_p2)
}
  0x82   :  { %s8274_s4 = scalar_lea.vmem %s95_s29, 128  ;;  %p8279_p4 = scmp.lt.s32.totalorder %s95_s29, %s95_s29 }
  0x83   :  { %p8275_p3 = scmp.ne.s32.totalorder %s95_s29, %s8274_s4  ;;  %p8280_p5 = scmp.lt.s32.totalorder %s8274_s4, %s8274_s4 }
  0x85   :  { %p8281_p6 = por %p8280_p5, %p8279_p4 }
  0x87   :  { %p8282_p7 = pnand %p8281_p6, %p8275_p3 }
  0x89   :  { %8285 = shalt.err (!%p8282_p7)
}
  0x8a   :  { %97 = dma.hbm_to_vmem [thread:$0]  %s8708_s6, 128, %s95_s29, [#allocation12]  }
  0x8b   :  { %s8286_s19 = scalar_lea.hbm %s8710_s8, 112 }
  0x8c   :  { %p8287_p8 = scmp.ne.s32.totalorder %s8710_s8, %s8286_s19  ;;  %p8290_p9 = scmp.lt.u32.totalorder %s8286_s19, %s8710_s8 }
  0x8e   :  { %p8292_p10 = pnand %p8290_p9, %p8287_p8 }
  0x90   :  { %8295 = shalt.err (!%p8292_p10)
}
  0x91   :  { %s8296_s25 = scalar_lea.vmem %s117_s11, 112  ;;  %s8300_s3 = scalar_lea.vmem %s117_s11, 128 }
  0x92   :  { %p8297_p11 = scmp.ne.s32.totalorder %s117_s11, %s8296_s25  ;;  %p8301_p12 = scmp.lt.s32.totalorder %s117_s11, %s117_s11 }
  0x93   :  { %p8302_p13 = scmp.lt.s32.totalorder %s8300_s3, %s8296_s25 }
  0x95   :  { %p8303_p0 = por %p8302_p13, %p8301_p12 }
  0x97   :  { %p8304_p1 = pnand %p8303_p0, %p8297_p11 }
  0x99   :  { %8307 = shalt.err (!%p8304_p1)
}
  0x9a   :  { %119 = dma.hbm_to_vmem [thread:$0]  %s8710_s8, 112, %s117_s11, [#allocation15]  }
  0x9b   :  { %8330 = dma.done.wait [#allocation3], 128  }
  0x9c   :  { %8331 = vsyncadd [#allocation3], 4294967168 }
  0x9d   :  { %8332 = dma.done.wait [#allocation6], 2080  }
  0x9e   :  { %8333 = vsyncadd [#allocation6], 4294965216 }
  0x9f   :  { %8334 = dma.done.wait [#allocation9], 8256  }
  0xa0   :  { %8335 = vsyncadd [#allocation9], 4294959040 }
  0xa1   :  { %8336 = dma.done.wait [#allocation12], 32896  }
  0xa2   :  { %8337 = vsyncadd [#allocation12], 4294934400 }
  0xa3   :  { %8338 = dma.done.wait [#allocation15], 57456  }
  0xa4   :  { %8339 = vsyncadd [#allocation15], 4294909840  ;;  %v8361_v0 = vmov 0   ;;  %v7321_v1 = vld [vmem:[#allocation5 + $0x4] ss:$8 sps:$4 sm:$0xff]   ;;  %v7345_v18 = vld [vmem:[#allocation2] sm:$0xff]  }
  0xa5   :  { %296 = vmatprep.mubr.bf16.mxu0 %v8361_v0  ;;  %v7323_v2 = vld [vmem:[#allocation5] ss:$8 sps:$4 sm:$0xff]   ;;  %264 = vmatprep.subr.bf16.mxu0 %v7321_v1  ;;  %v7324_v3 = vld [vmem:[#allocation5 + $0x14] ss:$8 sps:$4 sm:$0xff]   ;;  %v7326_v4 = vld [vmem:[#allocation5 + $0x10] ss:$8 sps:$4 sm:$0xff]  }
  0xa6   :  { %265 = vmatpush1.bf16.msra.mxu0 %v7323_v2  ;;  %v7327_v5 = vld [vmem:[#allocation5 + $0x24] ss:$8 sps:$4 sm:$0xff]   ;;  %v7329_v6 = vld [vmem:[#allocation5 + $0x20] ss:$8 sps:$4 sm:$0xff]   ;;  %v7330_v7 = vld [vmem:[#allocation5 + $0x34] ss:$8 sps:$4 sm:$0xff]  }
  0xa7   :  { %266 = vmatprep.subr.bf16.mxu0 %v7324_v3  ;;  %v7332_v8 = vld [vmem:[#allocation5 + $0x30] ss:$8 sps:$4 sm:$0xff]   ;;  %v7333_v9 = vld [vmem:[#allocation5 + $0x44] ss:$8 sps:$4 sm:$0xff]   ;;  %v7335_v10 = vld [vmem:[#allocation5 + $0x40] ss:$8 sps:$4 sm:$0xff]  }
  0xa8   :  { %v7336_v11 = vld [vmem:[#allocation5 + $0x54] ss:$8 sps:$4 sm:$0xff]   ;;  %v7338_v12 = vld [vmem:[#allocation5 + $0x50] ss:$8 sps:$4 sm:$0xff]   ;;  %v7339_v13 = vld [vmem:[#allocation5 + $0x64] ss:$8 sps:$4 sm:$0xff]  }
  0xa9   :  { %v7341_v14 = vld [vmem:[#allocation5 + $0x60] ss:$8 sps:$4 sm:$0xff]   ;;  %v7342_v15 = vld [vmem:[#allocation5 + $0x74] ss:$8 sps:$4 sm:$0xff]   ;;  %v7344_v16 = vld [vmem:[#allocation5 + $0x70] ss:$8 sps:$4 sm:$0xff]  }
  0xaa   :  { %267 = vmatpush1.bf16.msra.mxu0 %v7326_v4  ;;  %v7348_v17 = vld [vmem:[#allocation8 + $0x4] ss:$16 sps:$4 sm:$0xff]   ;;  %v7346_v19 = vld [vmem:[#allocation8] ss:$16 sps:$4 sm:$0xff]   ;;  %v7396_v50 = vld [vmem:[#allocation8 + $0xc] ss:$16 sps:$4 sm:$0xff]  }
  0xab   :  { %268 = vmatprep.subr.bf16.mxu0 %v7327_v5  ;;  %v7351_v20 = vld [vmem:[#allocation8 + $0x24] ss:$16 sps:$4 sm:$0xff]   ;;  %v7349_v21 = vld [vmem:[#allocation8 + $0x20] ss:$16 sps:$4 sm:$0xff]   ;;  %s8362_s8 = smov [#allocation17]  }
  0xac   :  { %v7354_v22 = vld [vmem:[#allocation8 + $0x44] ss:$16 sps:$4 sm:$0xff]   ;;  %v7352_v23 = vld [vmem:[#allocation8 + $0x40] ss:$16 sps:$4 sm:$0xff]   ;;  %s6329_s26 = sshll.u32 %s8362_s8, 4  ;;  %s6330_s26 = int_to_ptr.vmem [resolvable:$true] %s6329_s26 }
  0xad   :  { %v7357_v24 = vld [vmem:[#allocation8 + $0x64] ss:$16 sps:$4 sm:$0xff]   ;;  %v7355_v25 = vld [vmem:[#allocation8 + $0x60] ss:$16 sps:$4 sm:$0xff]   ;;  %s8308_s27 = scalar_lea.vmem %s6330_s26, 1792  ;;  %p8313_p3 = scmp.lt.s32.totalorder %s6330_s26, %s6330_s26 }
  0xae   :  { %269 = vmatpush1.bf16.msra.mxu0 %v7329_v6  ;;  %v7360_v26 = vld [vmem:[#allocation8 + $0x84] ss:$16 sps:$4 sm:$0xff]   ;;  %v7358_v27 = vld [vmem:[#allocation8 + $0x80] ss:$16 sps:$4 sm:$0xff]   ;;  %p8309_p2 = scmp.ne.s32.totalorder %s6330_s26, %s8308_s27  ;;  %p8314_p4 = scmp.lt.s32.totalorder %s8308_s27, %s8308_s27 }
  0xaf   :  { %270 = vmatprep.subr.bf16.mxu0 %v7330_v7  ;;  %v7363_v28 = vld [vmem:[#allocation8 + $0xa4] ss:$16 sps:$4 sm:$0xff]   ;;  %v7361_v29 = vld [vmem:[#allocation8 + $0xa0] ss:$16 sps:$4 sm:$0xff]  }
  0xb0   :  { %v7366_v30 = vld [vmem:[#allocation8 + $0xc4] ss:$16 sps:$4 sm:$0xff]   ;;  %v7364_v31 = vld [vmem:[#allocation8 + $0xc0] ss:$16 sps:$4 sm:$0xff]   ;;  %p8315_p5 = por %p8314_p4, %p8313_p3 }
  0xb1   :  { %v7369_v32 = vld [vmem:[#allocation8 + $0xe4] ss:$16 sps:$4 sm:$0xff]   ;;  %v7367_v33 = vld [vmem:[#allocation8 + $0xe0] ss:$16 sps:$4 sm:$0xff]  }
  0xb2   :  { %271 = vmatpush1.bf16.msra.mxu0 %v7332_v8  ;;  %v7372_v34 = vld [vmem:[#allocation8 + $0x104] ss:$16 sps:$4 sm:$0xff]   ;;  %v7370_v35 = vld [vmem:[#allocation8 + $0x100] ss:$16 sps:$4 sm:$0xff]   ;;  %p8316_p6 = pnand %p8315_p5, %p8309_p2 }
  0xb3   :  { %272 = vmatprep.subr.bf16.mxu0 %v7333_v9  ;;  %v7375_v36 = vld [vmem:[#allocation8 + $0x124] ss:$16 sps:$4 sm:$0xff]   ;;  %v7373_v37 = vld [vmem:[#allocation8 + $0x120] ss:$16 sps:$4 sm:$0xff]  }
  0xb4   :  { %v7378_v38 = vld [vmem:[#allocation8 + $0x144] ss:$16 sps:$4 sm:$0xff]   ;;  %v7376_v39 = vld [vmem:[#allocation8 + $0x140] ss:$16 sps:$4 sm:$0xff]  }
  0xb5   :  { %v7381_v40 = vld [vmem:[#allocation8 + $0x164] ss:$16 sps:$4 sm:$0xff]   ;;  %v7379_v41 = vld [vmem:[#allocation8 + $0x160] ss:$16 sps:$4 sm:$0xff]  }
  0xb6   :  { %273 = vmatpush1.bf16.msra.mxu0 %v7335_v10  ;;  %v7384_v42 = vld [vmem:[#allocation8 + $0x184] ss:$16 sps:$4 sm:$0xff]   ;;  %v7382_v43 = vld [vmem:[#allocation8 + $0x180] ss:$16 sps:$4 sm:$0xff]  }
  0xb7   :  { %274 = vmatprep.subr.bf16.mxu0 %v7336_v11  ;;  %v7387_v44 = vld [vmem:[#allocation8 + $0x1a4] ss:$16 sps:$4 sm:$0xff]   ;;  %v7385_v45 = vld [vmem:[#allocation8 + $0x1a0] ss:$16 sps:$4 sm:$0xff]  }
  0xb8   :  { %v7390_v46 = vld [vmem:[#allocation8 + $0x1c4] ss:$16 sps:$4 sm:$0xff]   ;;  %v7388_v47 = vld [vmem:[#allocation8 + $0x1c0] ss:$16 sps:$4 sm:$0xff]  }
  0xb9   :  { %v7393_v48 = vld [vmem:[#allocation8 + $0x1e4] ss:$16 sps:$4 sm:$0xff]   ;;  %v7391_v49 = vld [vmem:[#allocation8 + $0x1e0] ss:$16 sps:$4 sm:$0xff]  }
  0xba   :  { %275 = vmatpush1.bf16.msra.mxu0 %v7338_v12  ;;  %v817_v51 = vld [vmem:[#allocation11] sm:$0xff] }
  0xbb   :  { %276 = vmatprep.subr.bf16.mxu0 %v7339_v13  ;;  %v821_v52 = vld [vmem:[#allocation11 + $0x20] sm:$0xff] }
  0xbc   :  { %v6427_v53 = vcombine.high %v817_v51, %v821_v52  ;;  %v6426_v54 = vcombine.low %v817_v51, %v821_v52  ;;  %v825_v55 = vld [vmem:[#allocation11 + $0x40] sm:$0xff] }
  0xbd   :  { %v829_v56 = vld [vmem:[#allocation11 + $0x60] sm:$0xff] }
  0xbe   :  { %277 = vmatpush1.bf16.msra.mxu0 %v7341_v14  ;;  %v6435_v57 = vcombine.high %v825_v55, %v829_v56  ;;  %2395 = vmatprep.subr.bf16.mxu1 %v6427_v53  ;;  %v6434_v58 = vcombine.low %v825_v55, %v829_v56  ;;  %v833_v59 = vld [vmem:[#allocation11 + $0x80] sm:$0xff] }
  0xbf   :  { %278 = vmatprep.subr.bf16.mxu0 %v7342_v15  ;;  %2396 = vmatpush1.bf16.msra.mxu1 %v6426_v54  ;;  %v837_v60 = vld [vmem:[#allocation11 + $0xa0] sm:$0xff] }
  0xc0   :  { %2397 = vmatprep.subr.bf16.mxu1 %v6435_v57  ;;  %v6443_v61 = vcombine.high %v833_v59, %v837_v60  ;;  %v6442_v62 = vcombine.low %v833_v59, %v837_v60  ;;  %v841_v63 = vld [vmem:[#allocation11 + $0xc0] sm:$0xff] }
  0xc1   :  { %v845_v0 = vld [vmem:[#allocation11 + $0xe0] sm:$0xff] }
  0xc2   :  { %279 = vmatpush1.bf16.msra.mxu0 %v7344_v16  ;;  %v6451_v1 = vcombine.high %v841_v63, %v845_v0  ;;  %v6450_v2 = vcombine.low %v841_v63, %v845_v0  ;;  %v849_v3 = vld [vmem:[#allocation11 + $0x100] sm:$0xff] }
  0xc3   :  { %719 = vmatprep.subr.bf16.mxu0 %v7348_v17  ;;  %2398 = vmatpush1.bf16.msra.mxu1 %v6434_v58  ;;  %v853_v4 = vld [vmem:[#allocation11 + $0x120] sm:$0xff] }
  0xc4   :  { %2399 = vmatprep.subr.bf16.mxu1 %v6443_v61  ;;  %v6459_v5 = vcombine.high %v849_v3, %v853_v4  ;;  %v6458_v6 = vcombine.low %v849_v3, %v853_v4  ;;  %v857_v7 = vld [vmem:[#allocation11 + $0x140] sm:$0xff]  ;;  %v7402_v3 = vld [vmem:[#allocation8 + $0x4c] ss:$16 sps:$4 sm:$0xff]  }
  0xc5   :  { %297 = vmatmul.mubr.bf16.vlgmr.msra.gmra.mrb[0].mxu0 %v7345_v18  ;;  %v861_v8 = vld [vmem:[#allocation11 + $0x160] sm:$0xff] }
  0xc6   :  { %720 = vmatpush1.bf16.msra.mxu0 %v7346_v19  ;;  %v6467_v9 = vcombine.high %v857_v7, %v861_v8  ;;  %v6466_v10 = vcombine.low %v857_v7, %v861_v8  ;;  %v865_v11 = vld [vmem:[#allocation11 + $0x180] sm:$0xff]  ;;  %v7408_v7 = vld [vmem:[#allocation8 + $0x8c] ss:$16 sps:$4 sm:$0xff]  }
  0xc7   :  { %721 = vmatprep.subr.bf16.mxu0 %v7351_v20  ;;  %2400 = vmatpush1.bf16.msra.mxu1 %v6442_v62  ;;  %v869_v12 = vld [vmem:[#allocation11 + $0x1a0] sm:$0xff] }
  0xc8   :  { %2401 = vmatprep.subr.bf16.mxu1 %v6451_v1  ;;  %v6475_v13 = vcombine.high %v865_v11, %v869_v12  ;;  %v6474_v14 = vcombine.low %v865_v11, %v869_v12  ;;  %v873_v15 = vld [vmem:[#allocation11 + $0x1c0] sm:$0xff]  ;;  %v7399_v1 = vld [vmem:[#allocation8 + $0x2c] ss:$16 sps:$4 sm:$0xff]  }
  0xc9   :  { %v877_v16 = vld [vmem:[#allocation11 + $0x1e0] sm:$0xff]  ;;  %v7414_v11 = vld [vmem:[#allocation8 + $0xcc] ss:$16 sps:$4 sm:$0xff]  }
  0xca   :  { %722 = vmatpush1.bf16.msra.mxu0 %v7349_v21  ;;  %v6483_v17 = vcombine.high %v873_v15, %v877_v16  ;;  %v6482_v18 = vcombine.low %v873_v15, %v877_v16  ;;  %v881_v19 = vld [vmem:[#allocation11 + $0x200] sm:$0xff]  ;;  %v7420_v15 = vld [vmem:[#allocation8 + $0x10c] ss:$16 sps:$4 sm:$0xff]  }
  0xcb   :  { %723 = vmatprep.subr.bf16.mxu0 %v7354_v22  ;;  %2402 = vmatpush1.bf16.msra.mxu1 %v6450_v2  ;;  %v885_v20 = vld [vmem:[#allocation11 + $0x220] sm:$0xff] }
  0xcc   :  { %2403 = vmatprep.subr.bf16.mxu1 %v6459_v5  ;;  %v6491_v21 = vcombine.high %v881_v19, %v885_v20  ;;  %v6490_v22 = vcombine.low %v881_v19, %v885_v20  ;;  %v7394_v0 = vld [vmem:[#allocation8 + $0x8] ss:$16 sps:$4 sm:$0xff]   ;;  %v7405_v5 = vld [vmem:[#allocation8 + $0x6c] ss:$16 sps:$4 sm:$0xff]  }
  0xcd   :  { %v7397_v2 = vld [vmem:[#allocation8 + $0x28] ss:$16 sps:$4 sm:$0xff]   ;;  %v7426_v19 = vld [vmem:[#allocation8 + $0x14c] ss:$16 sps:$4 sm:$0xff]  }
  0xce   :  { %724 = vmatpush1.bf16.msra.mxu0 %v7352_v23  ;;  %v889_v23 = vld [vmem:[#allocation11 + $0x240] sm:$0xff] }
  0xcf   :  { %725 = vmatprep.subr.bf16.mxu0 %v7357_v24  ;;  %2404 = vmatpush1.bf16.msra.mxu1 %v6458_v6  ;;  %v893_v24 = vld [vmem:[#allocation11 + $0x260] sm:$0xff] }
  0xd0   :  { %2405 = vmatprep.subr.bf16.mxu1 %v6467_v9  ;;  %v7400_v4 = vld [vmem:[#allocation8 + $0x48] ss:$16 sps:$4 sm:$0xff]   ;;  %v7411_v9 = vld [vmem:[#allocation8 + $0xac] ss:$16 sps:$4 sm:$0xff]  }
  0xd1   :  { %v7403_v6 = vld [vmem:[#allocation8 + $0x68] ss:$16 sps:$4 sm:$0xff]  }
  0xd2   :  { %726 = vmatpush1.bf16.msra.mxu0 %v7355_v25  ;;  %v6499_v25 = vcombine.high %v889_v23, %v893_v24  ;;  %v7406_v8 = vld [vmem:[#allocation8 + $0x88] ss:$16 sps:$4 sm:$0xff]  }
  0xd3   :  { %727 = vmatprep.subr.bf16.mxu0 %v7360_v26  ;;  %2406 = vmatpush1.bf16.msra.mxu1 %v6466_v10  ;;  %v6498_v26 = vcombine.low %v889_v23, %v893_v24  ;;  %v7409_v10 = vld [vmem:[#allocation8 + $0xa8] ss:$16 sps:$4 sm:$0xff]   ;;  %v7432_v23 = vld [vmem:[#allocation8 + $0x18c] ss:$16 sps:$4 sm:$0xff]  }
  0xd4   :  { %2407 = vmatprep.subr.bf16.mxu1 %v6475_v13  ;;  %v7412_v12 = vld [vmem:[#allocation8 + $0xc8] ss:$16 sps:$4 sm:$0xff]   ;;  %v7417_v13 = vld [vmem:[#allocation8 + $0xec] ss:$16 sps:$4 sm:$0xff]  }
  0xd5   :  { %v7418_v16 = vld [vmem:[#allocation8 + $0x108] ss:$16 sps:$4 sm:$0xff]  }
  0xd6   :  { %728 = vmatpush1.bf16.msra.mxu0 %v7358_v27  ;;  %v897_v27 = vld [vmem:[#allocation11 + $0x280] sm:$0xff] }
  0xd7   :  { %729 = vmatprep.subr.bf16.mxu0 %v7363_v28  ;;  %2408 = vmatpush1.bf16.msra.mxu1 %v6474_v14  ;;  %v901_v28 = vld [vmem:[#allocation11 + $0x2a0] sm:$0xff] }
  0xd8   :  { %2409 = vmatprep.subr.bf16.mxu1 %v6483_v17  ;;  %v7415_v14 = vld [vmem:[#allocation8 + $0xe8] ss:$16 sps:$4 sm:$0xff]   ;;  %v7423_v17 = vld [vmem:[#allocation8 + $0x12c] ss:$16 sps:$4 sm:$0xff]  }
  0xd9   :  { %v7424_v20 = vld [vmem:[#allocation8 + $0x148] ss:$16 sps:$4 sm:$0xff]  }
  0xda   :  { %730 = vmatpush1.bf16.msra.mxu0 %v7361_v29  ;;  %v168_v29 = vlaneseq  ;;  %v7430_v24 = vld [vmem:[#allocation8 + $0x188] ss:$16 sps:$4 sm:$0xff]  }
  0xdb   :  { %731 = vmatprep.subr.bf16.mxu0 %v7366_v30  ;;  %2410 = vmatpush1.bf16.msra.mxu1 %v6482_v18  ;;  %v6507_v30 = vcombine.high %v897_v27, %v901_v28  ;;  %v7421_v18 = vld [vmem:[#allocation8 + $0x128] ss:$16 sps:$4 sm:$0xff]  }
  0xdc   :  { %2411 = vmatprep.subr.bf16.mxu1 %v6491_v21  ;;  %v7429_v21 = vld [vmem:[#allocation8 + $0x16c] ss:$16 sps:$4 sm:$0xff]  }
  0xde   :  { %732 = vmatpush1.bf16.msra.mxu0 %v7364_v31  ;;  %v6506_v31 = vcombine.low %v897_v27, %v901_v28  ;;  %v7438_v27 = vld [vmem:[#allocation8 + $0x1cc] ss:$16 sps:$4 sm:$0xff]   ;;  %v7436_v28 = vld [vmem:[#allocation8 + $0x1c8] ss:$16 sps:$4 sm:$0xff]  }
  0xdf   :  { %733 = vmatprep.subr.bf16.mxu0 %v7369_v32  ;;  %2412 = vmatpush1.bf16.msra.mxu1 %v6490_v22  ;;  %v905_v32 = vld [vmem:[#allocation11 + $0x2c0] sm:$0xff] }
  0xe0   :  { %2413 = vmatprep.subr.bf16.mxu1 %v6499_v25  ;;  %v7427_v22 = vld [vmem:[#allocation8 + $0x168] ss:$16 sps:$4 sm:$0xff]   ;;  %v7435_v25 = vld [vmem:[#allocation8 + $0x1ac] ss:$16 sps:$4 sm:$0xff]  }
  0xe2   :  { %734 = vmatpush1.bf16.msra.mxu0 %v7367_v33  ;;  %v909_v33 = vld [vmem:[#allocation11 + $0x2e0] sm:$0xff] }
  0xe3   :  { %735 = vmatprep.subr.bf16.mxu0 %v7372_v34  ;;  %2414 = vmatpush1.bf16.msra.mxu1 %v6498_v26  ;;  %v8523_v34 = vshrl.u32 %v168_v29, 7  ;;  %v7433_v26 = vld [vmem:[#allocation8 + $0x1a8] ss:$16 sps:$4 sm:$0xff]   ;;  %v7441_v29 = vld [vmem:[#allocation8 + $0x1ec] ss:$16 sps:$4 sm:$0xff]  }
  0xe4   :  { %2415 = vmatprep.subr.bf16.mxu1 %v6507_v30  ;;  %v818_v30 = vld [vmem:[#allocation11 + $0x8] sm:$0xff] }
  0xe6   :  { %736 = vmatpush1.bf16.msra.mxu0 %v7370_v35  ;;  %v6515_v35 = vcombine.high %v905_v32, %v909_v33 }
  0xe7   :  { %737 = vmatprep.subr.bf16.mxu0 %v7375_v36  ;;  %2416 = vmatpush1.bf16.msra.mxu1 %v6506_v31  ;;  %v6514_v36 = vcombine.low %v905_v32, %v909_v33  ;;  %v822_v31 = vld [vmem:[#allocation11 + $0x28] sm:$0xff]  ;;  %v7439_v32 = vld [vmem:[#allocation8 + $0x1e8] ss:$16 sps:$4 sm:$0xff]  }
  0xe8   :  { %2417 = vmatprep.subr.bf16.mxu1 %v6515_v35  ;;  %v6429_v33 = vcombine.high %v818_v30, %v822_v31  ;;  %v826_v35 = vld [vmem:[#allocation11 + $0x48] sm:$0xff] }
  0xea   :  { %738 = vmatpush1.bf16.msra.mxu0 %v7373_v37  ;;  %v913_v37 = vld [vmem:[#allocation11 + $0x300] sm:$0xff] }
  0xeb   :  { %739 = vmatprep.subr.bf16.mxu0 %v7378_v38  ;;  %v917_v38 = vld [vmem:[#allocation11 + $0x320] sm:$0xff]  ;;  %2418 = vmatpush1.bf16.msra.mxu1 %v6514_v36  ;;  %v830_v36 = vld [vmem:[#allocation11 + $0x68] sm:$0xff] }
  0xee   :  { %740 = vmatpush1.bf16.msra.mxu0 %v7376_v39  ;;  %v166_v39 = vld [vmem:[#allocation7] sm:$0x3] }
  0xef   :  { %741 = vmatprep.subr.bf16.mxu0 %v7381_v40  ;;  %v8526_v40 = vsub.s32 0, %v8523_v34 }
  0xf2   :  { %742 = vmatpush1.bf16.msra.mxu0 %v7379_v41  ;;  %v6523_v41 = vcombine.high %v913_v37, %v917_v38 }
  0xf3   :  { %743 = vmatprep.subr.bf16.mxu0 %v7384_v42  ;;  %v8529_v42 = vsub.s32 1, %v8523_v34 }
  0xf4   :  { %2419 = vmatprep.subr.bf16.mxu1 %v6523_v41  ;;  %v838_v41 = vld [vmem:[#allocation11 + $0xa8] sm:$0xff] }
  0xf6   :  { %744 = vmatpush1.bf16.msra.mxu0 %v7382_v43  ;;  %v6522_v43 = vcombine.low %v913_v37, %v917_v38  ;;  %v6428_v37 = vcombine.low %v818_v30, %v822_v31  ;;  %v6437_v38 = vcombine.high %v826_v35, %v830_v36 }
  0xf7   :  { %745 = vmatprep.subr.bf16.mxu0 %v7387_v44  ;;  %v921_v44 = vld [vmem:[#allocation11 + $0x340] sm:$0xff] }
  0xf8   :  { %2420 = vmatpush1.bf16.msra.mxu1 %v6522_v43  ;;  %v6436_v43 = vcombine.low %v826_v35, %v830_v36 }
  0xfa   :  { %746 = vmatpush1.bf16.msra.mxu0 %v7385_v45  ;;  %v925_v45 = vld [vmem:[#allocation11 + $0x360] sm:$0xff] }
  0xfb   :  { %747 = vmatprep.subr.bf16.mxu0 %v7390_v46  ;;  %v171_v46 = vrot.slane %v166_v39, %v8526_v40 }
  0xfe   :  { %748 = vmatpush1.bf16.msra.mxu0 %v7388_v47  ;;  %v6531_v47 = vcombine.high %v921_v44, %v925_v45 }
  0xff   :  { %749 = vmatprep.subr.bf16.mxu0 %v7393_v48  ;;  %v175_v48 = vrot.slane %v166_v39, %v8529_v42  ;;  %v834_v39 = vld [vmem:[#allocation11 + $0x88] sm:$0xff] }
 0x100   :  { %2421 = vmatprep.subr.bf16.mxu1 %v6531_v47  ;;  %v6444_v47 = vcombine.low %v834_v39, %v838_v41 }
 0x102   :  { %750 = vmatpush1.bf16.msra.mxu0 %v7391_v49  ;;  %v6530_v49 = vcombine.low %v921_v44, %v925_v45  ;;  %v6445_v44 = vcombine.high %v834_v39, %v838_v41  ;;  %v842_v45 = vld [vmem:[#allocation11 + $0xc8] sm:$0xff] }
 0x103   :  { %762 = vmatprep.subr.bf16.mxu0 %v7396_v50 }
 0x104   :  { %2422 = vmatpush1.bf16.msra.mxu1 %v6530_v49  ;;  %v850_v49 = vld [vmem:[#allocation11 + $0x108] sm:$0xff] }
 0x198   :  { %v298_v50 = vpop.f32.mrb[0].mxu0 }
 0x199   :  { %v299_v51 = vadd.f32 %v298_v50, %v171_v46  ;;  %v300_v52 = vpop.f32.mrb[1].mxu0  ;;  %v854_v50 = vld [vmem:[#allocation11 + $0x128] sm:$0xff] }
 0x19a   :  { %v301_v53 = vadd.f32 %v300_v52, %v175_v48  ;;  %v302_v54 = vpop.f32.mrb[2].mxu0  ;;  %v6461_v52 = vcombine.high %v850_v49, %v854_v50 }
 0x19b   :  { %v303_v55 = vadd.f32 %v302_v54, %v171_v46  ;;  %v304_v56 = vpop.f32.mrb[3].mxu0  ;;  %v307_v58 = vmax.f32 %v299_v51, 0.0  ;;  %v846_v46 = vld [vmem:[#allocation11 + $0xe8] sm:$0xff] }
 0x19c   :  { %v305_v57 = vadd.f32 %v304_v56, %v175_v48  ;;  %v308_v60 = vmax.f32 %v301_v53, 0.0  ;;  %v6453_v48 = vcombine.high %v842_v45, %v846_v46  ;;  %v6452_v51 = vcombine.low %v842_v45, %v846_v46  ;;  %v858_v53 = vld [vmem:[#allocation11 + $0x148] sm:$0xff] }
 0x19d   :  { %v309_v59 = vmax.f32 %v303_v55, 0.0  ;;  %v862_v54 = vld [vmem:[#allocation11 + $0x168] sm:$0xff]  ;;  %v6460_v55 = vcombine.low %v850_v49, %v854_v50 }
 0x19e   :  { %v310_v61 = vmax.f32 %v305_v57, 0.0  ;;  %v6469_v56 = vcombine.high %v858_v53, %v862_v54  ;;  %v866_v57 = vld [vmem:[#allocation11 + $0x188] sm:$0xff] }
 0x19f   :  { %v8533_v62 = vpack.c.bf16 %v309_v59, %v307_v58  ;;  %v870_v58 = vld [vmem:[#allocation11 + $0x1a8] sm:$0xff]  ;;  %v6468_v59 = vcombine.low %v858_v53, %v862_v54  ;;  %v8553_v53 = vld [vmem:[#allocation10] sm:$0xf] }
 0x1a0   :  { %v312_v63 = vpack.c.bf16 %v310_v61, %v308_v60  ;;  %v6477_v60 = vcombine.high %v866_v57, %v870_v58  ;;  %v874_v61 = vld [vmem:[#allocation11 + $0x1c8] sm:$0xff]  ;;  %v382_v54 = vrot.slane %v8553_v53, %v8526_v40 }
 0x1a2   :  { %751 = vmatprep.mubr.bf16.mxu0 %v312_v63 }
 0x1a3   :  { %752 = vmatmul.mubr.bf16.vlgmr.msra.gmra.mrb[4].mxu0 %v8533_v62 }
 0x1a4   :  { %763 = vmatpush1.bf16.msra.mxu0 %v7394_v0  ;;  %794 = vmatprep.mubr.bf16.mxu0 %v312_v63  ;;  %v929_v63 = vld [vmem:[#allocation11 + $0x380] sm:$0xff] }
 0x1a5   :  { %764 = vmatprep.subr.bf16.mxu0 %v7399_v1  ;;  %v933_v0 = vld [vmem:[#allocation11 + $0x3a0] sm:$0xff] }
 0x1a6   :  { %v6539_v1 = vcombine.high %v929_v63, %v933_v0 }
 0x1a8   :  { %765 = vmatpush1.bf16.msra.mxu0 %v7397_v2  ;;  %v6476_v2 = vcombine.low %v866_v57, %v870_v58  ;;  %2423 = vmatprep.subr.bf16.mxu1 %v6539_v1 }
 0x1a9   :  { %766 = vmatprep.subr.bf16.mxu0 %v7402_v3  ;;  %v6538_v3 = vcombine.low %v929_v63, %v933_v0 }
 0x1ab   :  { %2424 = vmatpush1.bf16.msra.mxu1 %v6538_v3 }
 0x1ac   :  { %767 = vmatpush1.bf16.msra.mxu0 %v7400_v4 }
 0x1ad   :  { %768 = vmatprep.subr.bf16.mxu0 %v7405_v5  ;;  %v882_v5 = vld [vmem:[#allocation11 + $0x208] sm:$0xff] }
 0x1b0   :  { %769 = vmatpush1.bf16.msra.mxu0 %v7403_v6  ;;  %v886_v6 = vld [vmem:[#allocation11 + $0x228] sm:$0xff] }
 0x1b1   :  { %770 = vmatprep.subr.bf16.mxu0 %v7408_v7  ;;  %v937_v7 = vld [vmem:[#allocation11 + $0x3c0] sm:$0xff] }
 0x1b4   :  { %771 = vmatpush1.bf16.msra.mxu0 %v7406_v8  ;;  %v941_v8 = vld [vmem:[#allocation11 + $0x3e0] sm:$0xff] }
 0x1b5   :  { %772 = vmatprep.subr.bf16.mxu0 %v7411_v9  ;;  %v6547_v9 = vcombine.high %v937_v7, %v941_v8 }
 0x1b7   :  { %2425 = vmatprep.subr.bf16.mxu1 %v6547_v9 }
 0x1b8   :  { %773 = vmatpush1.bf16.msra.mxu0 %v7409_v10 }
 0x1b9   :  { %774 = vmatprep.subr.bf16.mxu0 %v7414_v11  ;;  %v6546_v11 = vcombine.low %v937_v7, %v941_v8  ;;  %v958_v7 = vld [vmem:[#allocation11 + $0x468] sm:$0xff] }
 0x1bb   :  { %2426 = vmatpush1.bf16.msra.mxu1 %v6546_v11 }
 0x1bc   :  { %775 = vmatpush1.bf16.msra.mxu0 %v7412_v12  ;;  %v6493_v12 = vcombine.high %v882_v5, %v886_v6 }
 0x1bd   :  { %776 = vmatprep.subr.bf16.mxu0 %v7417_v13  ;;  %v890_v13 = vld [vmem:[#allocation11 + $0x248] sm:$0xff] }
 0x1c0   :  { %777 = vmatpush1.bf16.msra.mxu0 %v7415_v14  ;;  %v894_v14 = vld [vmem:[#allocation11 + $0x268] sm:$0xff] }
 0x1c1   :  { %778 = vmatprep.subr.bf16.mxu0 %v7420_v15  ;;  %v8537_v15 = vld [vmem:[#allocation11 + $0x400] sm:$0xff] }
 0x1c4   :  { %779 = vmatpush1.bf16.msra.mxu0 %v7418_v16  ;;  %v8539_v16 = vld [vmem:[#allocation11 + $0x420] sm:$0xff] }
 0x1c5   :  { %780 = vmatprep.subr.bf16.mxu0 %v7423_v17  ;;  %v8541_v17 = vld [vmem:[#allocation11 + $0x408] sm:$0xff] }
 0x1c8   :  { %781 = vmatpush1.bf16.msra.mxu0 %v7421_v18  ;;  %v6555_v18 = vcombine.high %v8537_v15, %v8539_v16 }
 0x1c9   :  { %782 = vmatprep.subr.bf16.mxu0 %v7426_v19  ;;  %v8545_v19 = vld [vmem:[#allocation11 + $0x428] sm:$0xff] }
 0x1ca   :  { %2438 = vmatprep.subr.bf16.mxu1 %v6555_v18  ;;  %v966_v18 = vld [vmem:[#allocation11 + $0x4a8] sm:$0xff] }
 0x1cc   :  { %783 = vmatpush1.bf16.msra.mxu0 %v7424_v20  ;;  %v6492_v20 = vcombine.low %v882_v5, %v886_v6  ;;  %v957_v5 = vld [vmem:[#allocation11 + $0x460] sm:$0xff]  ;;  %v954_v6 = vld [vmem:[#allocation11 + $0x448] sm:$0xff] }
 0x1cd   :  { %784 = vmatprep.subr.bf16.mxu0 %v7429_v21  ;;  %v6554_v21 = vcombine.low %v8537_v15, %v8539_v16  ;;  %v6565_v11 = vcombine.high %v954_v6, %v958_v7 }
 0x1d0   :  { %785 = vmatpush1.bf16.msra.mxu0 %v7427_v22  ;;  %v6556_v22 = vcombine.low %v8541_v17, %v8545_v19 }
 0x1d1   :  { %786 = vmatprep.subr.bf16.mxu0 %v7432_v23  ;;  %v6501_v23 = vcombine.high %v890_v13, %v894_v14 }
 0x1d4   :  { %787 = vmatpush1.bf16.msra.mxu0 %v7430_v24  ;;  %v898_v24 = vld [vmem:[#allocation11 + $0x288] sm:$0xff] }
 0x1d5   :  { %788 = vmatprep.subr.bf16.mxu0 %v7435_v25  ;;  %v902_v25 = vld [vmem:[#allocation11 + $0x2a8] sm:$0xff] }
 0x1d6   :  { %v6508_v30 = vcombine.low %v898_v24, %v902_v25 }
 0x1d8   :  { %789 = vmatpush1.bf16.msra.mxu0 %v7433_v26  ;;  %v6500_v26 = vcombine.low %v890_v13, %v894_v14  ;;  %v965_v13 = vld [vmem:[#allocation11 + $0x4a0] sm:$0xff]  ;;  %v962_v14 = vld [vmem:[#allocation11 + $0x488] sm:$0xff] }
 0x1d9   :  { %790 = vmatprep.subr.bf16.mxu0 %v7438_v27  ;;  %v6509_v27 = vcombine.high %v898_v24, %v902_v25  ;;  %v6573_v25 = vcombine.high %v962_v14, %v966_v18 }
 0x1dc   :  { %791 = vmatpush1.bf16.msra.mxu0 %v7436_v28  ;;  %v906_v28 = vld [vmem:[#allocation11 + $0x2c8] sm:$0xff] }
 0x1dd   :  { %792 = vmatprep.subr.bf16.mxu0 %v7441_v29  ;;  %v910_v29 = vld [vmem:[#allocation11 + $0x2e8] sm:$0xff] }
 0x1de   :  { %v6517_v31 = vcombine.high %v906_v28, %v910_v29  ;;  %v6516_v35 = vcombine.low %v906_v28, %v910_v29  ;;  %v970_v28 = vld [vmem:[#allocation11 + $0x4c8] sm:$0xff] }
 0x1df   :  { %v974_v29 = vld [vmem:[#allocation11 + $0x4e8] sm:$0xff] }
 0x1e0   :  { %793 = vmatpush1.bf16.msra.mxu0 %v7439_v32  ;;  %v914_v32 = vld [vmem:[#allocation11 + $0x308] sm:$0xff]  ;;  %v6581_v16 = vcombine.high %v970_v28, %v974_v29 }
 0x1e1   :  { %2481 = vmatprep.subr.bf16.mxu0 %v6429_v33  ;;  %v918_v33 = vld [vmem:[#allocation11 + $0x328] sm:$0xff] }
 0x1e2   :  { %v6525_v36 = vcombine.high %v914_v32, %v918_v33  ;;  %v6524_v39 = vcombine.low %v914_v32, %v918_v33  ;;  %v6580_v33 = vcombine.low %v970_v28, %v974_v29 }
 0x1e3   :  { %795 = vmatmul.mubr.bf16.vlgmr.msra.gmra.mrb[8].mxu0 %v8533_v62  ;;  %v878_v62 = vld [vmem:[#allocation11 + $0x1e8] sm:$0xff] }
 0x1e4   :  { %2482 = vmatpush1.bf16.msra.mxu0 %v6428_v37  ;;  %v6485_v4 = vcombine.high %v874_v61, %v878_v62  ;;  %v6484_v10 = vcombine.low %v874_v61, %v878_v62  ;;  %v922_v37 = vld [vmem:[#allocation11 + $0x348] sm:$0xff] }
 0x1e5   :  { %2483 = vmatprep.subr.bf16.mxu0 %v6437_v38  ;;  %v926_v38 = vld [vmem:[#allocation11 + $0x368] sm:$0xff] }
 0x1e6   :  { %v6533_v41 = vcombine.high %v922_v37, %v926_v38  ;;  %v6532_v45 = vcombine.low %v922_v37, %v926_v38  ;;  %v985_v37 = vld [vmem:[#allocation11 + $0x540] sm:$0xff] }
 0x1e7   :  { %v989_v38 = vld [vmem:[#allocation11 + $0x560] sm:$0xff] }
 0x1e8   :  { %2484 = vmatpush1.bf16.msra.mxu0 %v6436_v43  ;;  %v930_v43 = vld [vmem:[#allocation11 + $0x388] sm:$0xff] }
 0x1e9   :  { %2485 = vmatprep.subr.bf16.mxu0 %v6445_v44  ;;  %v934_v44 = vld [vmem:[#allocation11 + $0x3a8] sm:$0xff] }
 0x1ea   :  { %v6541_v46 = vcombine.high %v930_v43, %v934_v44  ;;  %v6540_v49 = vcombine.low %v930_v43, %v934_v44 }
 0x1ec   :  { %2486 = vmatpush1.bf16.msra.mxu0 %v6444_v47  ;;  %v938_v47 = vld [vmem:[#allocation11 + $0x3c8] sm:$0xff] }
 0x1ed   :  { %2487 = vmatprep.subr.bf16.mxu0 %v6453_v48  ;;  %v942_v48 = vld [vmem:[#allocation11 + $0x3e8] sm:$0xff] }
 0x1ee   :  { %v6549_v50 = vcombine.high %v938_v47, %v942_v48 }
 0x1f0   :  { %2488 = vmatpush1.bf16.msra.mxu0 %v6452_v51  ;;  %v6548_v51 = vcombine.low %v938_v47, %v942_v48  ;;  %v993_v47 = vld [vmem:[#allocation11 + $0x580] sm:$0xff] }
 0x1f1   :  { %2489 = vmatprep.subr.bf16.mxu0 %v6461_v52  ;;  %v6557_v52 = vcombine.high %v8541_v17, %v8545_v19  ;;  %v977_v17 = vld [vmem:[#allocation11 + $0x500] sm:$0xff] }
 0x1f2   :  { %v981_v19 = vld [vmem:[#allocation11 + $0x520] sm:$0xff] }
 0x1f3   :  { %v6586_v43 = vcombine.low %v977_v17, %v981_v19  ;;  %v997_v48 = vld [vmem:[#allocation11 + $0x5a0] sm:$0xff] }
 0x1f4   :  { %2490 = vmatpush1.bf16.msra.mxu0 %v6460_v55  ;;  %v386_v55 = vrot.slane %v8553_v53, %v8529_v42 }
 0x1f5   :  { %2491 = vmatprep.subr.bf16.mxu0 %v6469_v56 }
 0x1f8   :  { %2492 = vmatpush1.bf16.msra.mxu0 %v6468_v59 }
 0x1f9   :  { %2493 = vmatprep.subr.bf16.mxu0 %v6477_v60 }
 0x1fc   :  { %2494 = vmatpush1.bf16.msra.mxu0 %v6476_v2  ;;  %v953_v2 = vld [vmem:[#allocation11 + $0x440] sm:$0xff] }
 0x1fd   :  { %2495 = vmatprep.subr.bf16.mxu0 %v6485_v4 }
 0x200   :  { %2496 = vmatpush1.bf16.msra.mxu0 %v6484_v10  ;;  %v6563_v10 = vcombine.high %v953_v2, %v957_v5 }
 0x201   :  { %2497 = vmatprep.subr.bf16.mxu0 %v6493_v12  ;;  %v961_v12 = vld [vmem:[#allocation11 + $0x480] sm:$0xff] }
 0x202   :  { %v6571_v24 = vcombine.high %v961_v12, %v965_v13 }
 0x204   :  { %2498 = vmatpush1.bf16.msra.mxu0 %v6492_v20  ;;  %v6562_v20 = vcombine.low %v953_v2, %v957_v5  ;;  %v1010_v2 = vld [vmem:[#allocation11 + $0x608] sm:$0xff] }
 0x205   :  { %2499 = vmatprep.subr.bf16.mxu0 %v6501_v23  ;;  %v6564_v23 = vcombine.low %v954_v6, %v958_v7 }
 0x208   :  { %2500 = vmatpush1.bf16.msra.mxu0 %v6500_v26  ;;  %v969_v26 = vld [vmem:[#allocation11 + $0x4c0] sm:$0xff] }
 0x209   :  { %2501 = vmatprep.subr.bf16.mxu0 %v6509_v27  ;;  %v973_v27 = vld [vmem:[#allocation11 + $0x4e0] sm:$0xff] }
 0x20a   :  { %v6579_v15 = vcombine.high %v969_v26, %v973_v27  ;;  %v6578_v32 = vcombine.low %v969_v26, %v973_v27  ;;  %v1026_v26 = vld [vmem:[#allocation11 + $0x688] sm:$0xff] }
 0x20b   :  { %v1030_v27 = vld [vmem:[#allocation11 + $0x6a8] sm:$0xff] }
 0x20c   :  { %2502 = vmatpush1.bf16.msra.mxu0 %v6508_v30  ;;  %v6570_v30 = vcombine.low %v961_v12, %v965_v13  ;;  %v1018_v12 = vld [vmem:[#allocation11 + $0x648] sm:$0xff] }
 0x20d   :  { %2503 = vmatprep.subr.bf16.mxu0 %v6517_v31  ;;  %v6572_v31 = vcombine.low %v962_v14, %v966_v18  ;;  %v1022_v13 = vld [vmem:[#allocation11 + $0x668] sm:$0xff] }
 0x20e   :  { %v6628_v29 = vcombine.low %v1018_v12, %v1022_v13 }
 0x210   :  { %2504 = vmatpush1.bf16.msra.mxu0 %v6516_v35  ;;  %v6587_v35 = vcombine.high %v977_v17, %v981_v19  ;;  %v1034_v17 = vld [vmem:[#allocation11 + $0x6c8] sm:$0xff] }
 0x211   :  { %2505 = vmatprep.subr.bf16.mxu0 %v6525_v36  ;;  %v1038_v19 = vld [vmem:[#allocation11 + $0x6e8] sm:$0xff] }
 0x214   :  { %2506 = vmatpush1.bf16.msra.mxu0 %v6524_v39  ;;  %v986_v39 = vld [vmem:[#allocation11 + $0x548] sm:$0xff] }
 0x215   :  { %2507 = vmatprep.subr.bf16.mxu0 %v6533_v41  ;;  %v990_v41 = vld [vmem:[#allocation11 + $0x568] sm:$0xff] }
 0x218   :  { %2508 = vmatpush1.bf16.msra.mxu0 %v6532_v45  ;;  %v6595_v45 = vcombine.high %v985_v37, %v989_v38 }
 0x219   :  { %2509 = vmatprep.subr.bf16.mxu0 %v6541_v46  ;;  %v6597_v46 = vcombine.high %v986_v39, %v990_v41 }
 0x21c   :  { %2510 = vmatpush1.bf16.msra.mxu0 %v6540_v49  ;;  %v994_v49 = vld [vmem:[#allocation11 + $0x588] sm:$0xff] }
 0x21d   :  { %2511 = vmatprep.subr.bf16.mxu0 %v6549_v50  ;;  %v998_v50 = vld [vmem:[#allocation11 + $0x5a8] sm:$0xff] }
 0x220   :  { %2512 = vmatpush1.bf16.msra.mxu0 %v6548_v51  ;;  %v6594_v51 = vcombine.low %v985_v37, %v989_v38  ;;  %v1042_v37 = vld [vmem:[#allocation11 + $0x708] sm:$0xff] }
 0x221   :  { %2524 = vmatprep.subr.bf16.mxu0 %v6557_v52  ;;  %v6596_v52 = vcombine.low %v986_v39, %v990_v41  ;;  %v1046_v38 = vld [vmem:[#allocation11 + $0x728] sm:$0xff]  ;;  %v6644_v41 = vcombine.low %v1034_v17, %v1038_v19 }
 0x276   :  { %v753_v56 = vpop.f32.mrb[4].mxu0 }
 0x277   :  { %v754_v57 = vadd.f32 %v753_v56, %v382_v54  ;;  %v755_v58 = vpop.f32.mrb[5].mxu0  ;;  %v1001_v56 = vld [vmem:[#allocation11 + $0x5c0] sm:$0xff] }
 0x278   :  { %v756_v59 = vadd.f32 %v755_v58, %v386_v55  ;;  %v757_v60 = vpop.f32.mrb[6].mxu0  ;;  %v1002_v58 = vld [vmem:[#allocation11 + $0x5c8] sm:$0xff] }
 0x279   :  { %v758_v61 = vadd.f32 %v757_v60, %v382_v54  ;;  %v759_v62 = vpop.f32.mrb[7].mxu0  ;;  %v805_v0 = vmax.f32 %v754_v57, 0.0  ;;  %v6603_v54 = vcombine.high %v993_v47, %v997_v48  ;;  %v1005_v57 = vld [vmem:[#allocation11 + $0x5e0] sm:$0xff]  ;;  %v6602_v60 = vcombine.low %v993_v47, %v997_v48  ;;  %v1050_v47 = vld [vmem:[#allocation11 + $0x748] sm:$0xff] }
 0x27a   :  { %v760_v63 = vadd.f32 %v759_v62, %v386_v55  ;;  %v806_v3 = vmax.f32 %v756_v59, 0.0  ;;  %v6605_v55 = vcombine.high %v994_v49, %v998_v50  ;;  %v1006_v59 = vld [vmem:[#allocation11 + $0x5e8] sm:$0xff]  ;;  %v6611_v62 = vcombine.high %v1001_v56, %v1005_v57 }
 0x27b   :  { %v809_v1 = vmax.f32 %v758_v61, 0.0  ;;  %v6604_v61 = vcombine.low %v994_v49, %v998_v50  ;;  %v6612_v5 = vcombine.low %v1002_v58, %v1006_v59  ;;  %v1054_v48 = vld [vmem:[#allocation11 + $0x768] sm:$0xff]  ;;  %v6652_v50 = vcombine.low %v1042_v37, %v1046_v38 }
 0x27c   :  { %v810_v4 = vmax.f32 %v760_v63, 0.0  ;;  %v6613_v63 = vcombine.high %v1002_v58, %v1006_v59  ;;  %v1058_v58 = vld [vmem:[#allocation11 + $0x788] sm:$0xff] }
 0x27d   :  { %v8559_v8 = vpack.c.bf16 %v809_v1, %v805_v0  ;;  %v1009_v0 = vld [vmem:[#allocation11 + $0x600] sm:$0xff]  ;;  %v1062_v59 = vld [vmem:[#allocation11 + $0x7a8] sm:$0xff] }
 0x27e   :  { %v8561_v9 = vpack.c.bf16 %v810_v4, %v806_v3  ;;  %v1013_v1 = vld [vmem:[#allocation11 + $0x620] sm:$0xff]  ;;  %v1014_v3 = vld [vmem:[#allocation11 + $0x628] sm:$0xff]  ;;  %v6610_v4 = vcombine.low %v1001_v56, %v1005_v57  ;;  %v8577_v56 = vsub.s32 3, %v8523_v34 }
 0x27f   :  { %v6619_v6 = vcombine.high %v1009_v0, %v1013_v1  ;;  %v6621_v7 = vcombine.high %v1010_v2, %v1014_v3  ;;  %v6618_v14 = vcombine.low %v1009_v0, %v1013_v1  ;;  %v6620_v18 = vcombine.low %v1010_v2, %v1014_v3  ;;  %v1061_v57 = vld [vmem:[#allocation11 + $0x7a0] sm:$0xff] }
 0x280   :  { %2427 = vmatprep.mubr.bf16.mxu1 %v8561_v9  ;;  %2513 = vmatprep.mubr.bf16.mxu0 %v8561_v9  ;;  %v6669_v0 = vcombine.high %v1058_v58, %v1062_v59  ;;  %v1065_v1 = vld [vmem:[#allocation11 + $0x7c0] sm:$0xff]  ;;  %v394_v2 = vrot.slane %v8553_v53, %v8577_v56 }
 0x281   :  { %2428 = vmatmul.mubr.bf16.vlgmr.msra.gmra.mrb[0].mxu1 %v8559_v8  ;;  %2514 = vmatmul.mubr.bf16.vlgmr.msra.gmra.mrb[12].mxu0 %v8559_v8  ;;  %v1069_v3 = vld [vmem:[#allocation11 + $0x7e0] sm:$0xff] }
 0x282   :  { %2439 = vmatpush1.bf16.msra.mxu1 %v6554_v21  ;;  %2525 = vmatpush1.bf16.msra.mxu0 %v6556_v22  ;;  %v978_v21 = vld [vmem:[#allocation11 + $0x508] sm:$0xff] }
 0x283   :  { %2440 = vmatprep.subr.bf16.mxu1 %v6563_v10  ;;  %2526 = vmatprep.subr.bf16.mxu0 %v6565_v11  ;;  %v982_v22 = vld [vmem:[#allocation11 + $0x528] sm:$0xff]  ;;  %v1017_v10 = vld [vmem:[#allocation11 + $0x640] sm:$0xff] }
 0x284   :  { %v6589_v36 = vcombine.high %v978_v21, %v982_v22  ;;  %v6588_v44 = vcombine.low %v978_v21, %v982_v22  ;;  %v1021_v11 = vld [vmem:[#allocation11 + $0x660] sm:$0xff]  ;;  %v6636_v22 = vcombine.low %v1026_v26, %v1030_v27 }
 0x285   :  { %v6626_v28 = vcombine.low %v1017_v10, %v1021_v11 }
 0x286   :  { %2441 = vmatpush1.bf16.msra.mxu1 %v6562_v20  ;;  %2527 = vmatpush1.bf16.msra.mxu0 %v6564_v23  ;;  %v6627_v20 = vcombine.high %v1017_v10, %v1021_v11  ;;  %v6629_v23 = vcombine.high %v1018_v12, %v1022_v13  ;;  %v6668_v10 = vcombine.low %v1058_v58, %v1062_v59  ;;  %v848_v58 = vld [vmem:[#allocation11 + $0xf8] sm:$0xff] }
 0x287   :  { %2442 = vmatprep.subr.bf16.mxu1 %v6571_v24  ;;  %2528 = vmatprep.subr.bf16.mxu0 %v6573_v25  ;;  %v1025_v24 = vld [vmem:[#allocation11 + $0x680] sm:$0xff]  ;;  %v6675_v13 = vcombine.high %v1065_v1, %v1069_v3 }
 0x288   :  { %v1029_v25 = vld [vmem:[#allocation11 + $0x6a0] sm:$0xff] }
 0x289   :  { %v6634_v21 = vcombine.low %v1025_v24, %v1029_v25 }
 0x28a   :  { %2443 = vmatpush1.bf16.msra.mxu1 %v6570_v30  ;;  %2529 = vmatpush1.bf16.msra.mxu0 %v6572_v31  ;;  %v6635_v30 = vcombine.high %v1025_v24, %v1029_v25  ;;  %v6637_v31 = vcombine.high %v1026_v26, %v1030_v27  ;;  %v823_v24 = vld [vmem:[#allocation11 + $0x30] sm:$0xff]  ;;  %v820_v25 = vld [vmem:[#allocation11 + $0x18] sm:$0xff] }
 0x28b   :  { %2444 = vmatprep.subr.bf16.mxu1 %v6579_v15  ;;  %2530 = vmatprep.subr.bf16.mxu0 %v6581_v16  ;;  %v1033_v15 = vld [vmem:[#allocation11 + $0x6c0] sm:$0xff] }
 0x28c   :  { %v1037_v16 = vld [vmem:[#allocation11 + $0x6e0] sm:$0xff] }
 0x28d   :  { %v6642_v39 = vcombine.low %v1033_v15, %v1037_v16 }
 0x28e   :  { %2445 = vmatpush1.bf16.msra.mxu1 %v6578_v32  ;;  %2531 = vmatpush1.bf16.msra.mxu0 %v6580_v33  ;;  %v6643_v32 = vcombine.high %v1033_v15, %v1037_v16  ;;  %v6645_v33 = vcombine.high %v1034_v17, %v1038_v19 }
 0x28f   :  { %2446 = vmatprep.subr.bf16.mxu1 %v6587_v35  ;;  %2532 = vmatprep.subr.bf16.mxu0 %v6589_v36  ;;  %v1041_v35 = vld [vmem:[#allocation11 + $0x700] sm:$0xff] }
 0x290   :  { %v1045_v36 = vld [vmem:[#allocation11 + $0x720] sm:$0xff] }
 0x291   :  { %v6650_v49 = vcombine.low %v1041_v35, %v1045_v36 }
 0x292   :  { %2447 = vmatpush1.bf16.msra.mxu1 %v6586_v43  ;;  %2533 = vmatpush1.bf16.msra.mxu0 %v6588_v44  ;;  %v6651_v43 = vcombine.high %v1041_v35, %v1045_v36  ;;  %v6653_v44 = vcombine.high %v1042_v37, %v1046_v38  ;;  %v828_v35 = vld [vmem:[#allocation11 + $0x58] sm:$0xff] }
 0x293   :  { %2448 = vmatprep.subr.bf16.mxu1 %v6595_v45  ;;  %2534 = vmatprep.subr.bf16.mxu0 %v6597_v46  ;;  %v1049_v45 = vld [vmem:[#allocation11 + $0x740] sm:$0xff]  ;;  %v832_v36 = vld [vmem:[#allocation11 + $0x78] sm:$0xff] }
 0x294   :  { %v1053_v46 = vld [vmem:[#allocation11 + $0x760] sm:$0xff] }
 0x296   :  { %2449 = vmatpush1.bf16.msra.mxu1 %v6594_v51  ;;  %2535 = vmatpush1.bf16.msra.mxu0 %v6596_v52  ;;  %v6659_v51 = vcombine.high %v1049_v45, %v1053_v46  ;;  %v6661_v52 = vcombine.high %v1050_v47, %v1054_v48 }
 0x297   :  { %2450 = vmatprep.subr.bf16.mxu1 %v6603_v54  ;;  %2536 = vmatprep.subr.bf16.mxu0 %v6605_v55  ;;  %v8574_v54 = vsub.s32 2, %v8523_v34  ;;  %v1057_v55 = vld [vmem:[#allocation11 + $0x780] sm:$0xff] }
 0x29a   :  { %2451 = vmatpush1.bf16.msra.mxu1 %v6602_v60  ;;  %2537 = vmatpush1.bf16.msra.mxu0 %v6604_v61  ;;  %v6658_v60 = vcombine.low %v1049_v45, %v1053_v46  ;;  %v6660_v61 = vcombine.low %v1050_v47, %v1054_v48  ;;  %v839_v45 = vld [vmem:[#allocation11 + $0xb0] sm:$0xff]  ;;  %v836_v46 = vld [vmem:[#allocation11 + $0x98] sm:$0xff] }
 0x29b   :  { %2452 = vmatprep.subr.bf16.mxu1 %v6611_v62  ;;  %2538 = vmatprep.subr.bf16.mxu0 %v6613_v63  ;;  %v390_v62 = vrot.slane %v8553_v53, %v8574_v54  ;;  %v6667_v63 = vcombine.high %v1057_v55, %v1061_v57  ;;  %v824_v53 = vld [vmem:[#allocation11 + $0x38] sm:$0xff] }
 0x29c   :  { %v6433_v17 = vcombine.high %v820_v25, %v824_v53  ;;  %v840_v47 = vld [vmem:[#allocation11 + $0xb8] sm:$0xff] }
 0x29e   :  { %2453 = vmatpush1.bf16.msra.mxu1 %v6610_v4  ;;  %2539 = vmatpush1.bf16.msra.mxu0 %v6612_v5  ;;  %v1066_v4 = vld [vmem:[#allocation11 + $0x7c8] sm:$0xff] }
 0x29f   :  { %2454 = vmatprep.subr.bf16.mxu1 %v6619_v6  ;;  %2540 = vmatprep.subr.bf16.mxu0 %v6621_v7  ;;  %v1070_v5 = vld [vmem:[#allocation11 + $0x7e8] sm:$0xff]  ;;  %v6666_v7 = vcombine.low %v1057_v55, %v1061_v57  ;;  %v847_v55 = vld [vmem:[#allocation11 + $0xf0] sm:$0xff]  ;;  %v844_v57 = vld [vmem:[#allocation11 + $0xd8] sm:$0xff] }
 0x2a2   :  { %2455 = vmatpush1.bf16.msra.mxu1 %v6618_v14  ;;  %2541 = vmatpush1.bf16.msra.mxu0 %v6620_v18  ;;  %v6677_v14 = vcombine.high %v1066_v4, %v1070_v5  ;;  %v819_v18 = vld [vmem:[#allocation11 + $0x10] sm:$0xff] }
 0x2a3   :  { %2456 = vmatprep.subr.bf16.mxu1 %v6627_v20  ;;  %2542 = vmatprep.subr.bf16.mxu0 %v6629_v23  ;;  %v6431_v16 = vcombine.high %v819_v18, %v823_v24  ;;  %v6430_v38 = vcombine.low %v819_v18, %v823_v24  ;;  %v868_v24 = vld [vmem:[#allocation11 + $0x198] sm:$0xff] }
 0x2a6   :  { %2457 = vmatpush1.bf16.msra.mxu1 %v6626_v28  ;;  %2543 = vmatpush1.bf16.msra.mxu0 %v6628_v29  ;;  %v6674_v29 = vcombine.low %v1065_v1, %v1069_v3  ;;  %v856_v1 = vld [vmem:[#allocation11 + $0x138] sm:$0xff]  ;;  %v6456_v3 = vcombine.low %v844_v57, %v848_v58 }
 0x2a7   :  { %2458 = vmatprep.subr.bf16.mxu1 %v6635_v30  ;;  %2544 = vmatprep.subr.bf16.mxu0 %v6637_v31  ;;  %v6676_v30 = vcombine.low %v1066_v4, %v1070_v5 }
 0x2aa   :  { %2459 = vmatpush1.bf16.msra.mxu1 %v6634_v21  ;;  %2545 = vmatpush1.bf16.msra.mxu0 %v6636_v22  ;;  %v827_v22 = vld [vmem:[#allocation11 + $0x50] sm:$0xff] }
 0x2ab   :  { %2460 = vmatprep.subr.bf16.mxu1 %v6643_v32  ;;  %2546 = vmatprep.subr.bf16.mxu0 %v6645_v33  ;;  %v831_v33 = vld [vmem:[#allocation11 + $0x70] sm:$0xff] }
 0x2ac   :  { %v6438_v48 = vcombine.low %v827_v22, %v831_v33 }
 0x2ae   :  { %2461 = vmatpush1.bf16.msra.mxu1 %v6642_v39  ;;  %2547 = vmatpush1.bf16.msra.mxu0 %v6644_v41  ;;  %v6432_v39 = vcombine.low %v820_v25, %v824_v53  ;;  %v6439_v41 = vcombine.high %v827_v22, %v831_v33  ;;  %v872_v25 = vld [vmem:[#allocation11 + $0x1b8] sm:$0xff]  ;;  %v883_v22 = vld [vmem:[#allocation11 + $0x210] sm:$0xff] }
 0x2af   :  { %2462 = vmatprep.subr.bf16.mxu1 %v6651_v43  ;;  %2548 = vmatprep.subr.bf16.mxu0 %v6653_v44  ;;  %v6441_v43 = vcombine.high %v828_v35, %v832_v36  ;;  %v835_v44 = vld [vmem:[#allocation11 + $0x90] sm:$0xff] }
 0x2b0   :  { %v6446_v59 = vcombine.low %v835_v44, %v839_v45  ;;  %v887_v33 = vld [vmem:[#allocation11 + $0x230] sm:$0xff] }
 0x2b2   :  { %2463 = vmatpush1.bf16.msra.mxu1 %v6650_v49  ;;  %2549 = vmatpush1.bf16.msra.mxu0 %v6652_v50  ;;  %v6440_v49 = vcombine.low %v828_v35, %v832_v36  ;;  %v6447_v50 = vcombine.high %v835_v44, %v839_v45  ;;  %v884_v35 = vld [vmem:[#allocation11 + $0x218] sm:$0xff]  ;;  %v891_v44 = vld [vmem:[#allocation11 + $0x250] sm:$0xff] }
 0x2b3   :  { %2464 = vmatprep.subr.bf16.mxu1 %v6659_v51  ;;  %2550 = vmatprep.subr.bf16.mxu0 %v6661_v52  ;;  %v6449_v51 = vcombine.high %v836_v46, %v840_v47  ;;  %v843_v52 = vld [vmem:[#allocation11 + $0xd0] sm:$0xff]  ;;  %v888_v36 = vld [vmem:[#allocation11 + $0x238] sm:$0xff] }
 0x2b4   :  { %v895_v45 = vld [vmem:[#allocation11 + $0x270] sm:$0xff] }
 0x2b6   :  { %v796_v6 = vpop.f32.mrb[8].mxu0  ;;  %2465 = vmatpush1.bf16.msra.mxu1 %v6658_v60  ;;  %2551 = vmatpush1.bf16.msra.mxu0 %v6660_v61  ;;  %v6448_v60 = vcombine.low %v836_v46, %v840_v47  ;;  %v6455_v61 = vcombine.high %v843_v52, %v847_v55  ;;  %v892_v46 = vld [vmem:[#allocation11 + $0x258] sm:$0xff] }
 0x2b7   :  { %v797_v11 = vadd.f32 %v796_v6, %v390_v62  ;;  %v798_v12 = vpop.f32.mrb[9].mxu0  ;;  %2466 = vmatprep.subr.bf16.mxu1 %v6667_v63  ;;  %2552 = vmatprep.subr.bf16.mxu0 %v6669_v0  ;;  %v851_v63 = vld [vmem:[#allocation11 + $0x110] sm:$0xff]  ;;  %v896_v47 = vld [vmem:[#allocation11 + $0x278] sm:$0xff] }
 0x2b8   :  { %v799_v20 = vadd.f32 %v798_v12, %v394_v2  ;;  %v800_v23 = vpop.f32.mrb[10].mxu0  ;;  %v855_v0 = vld [vmem:[#allocation11 + $0x130] sm:$0xff] }
 0x2b9   :  { %v801_v26 = vadd.f32 %v800_v23, %v390_v62  ;;  %v802_v27 = vpop.f32.mrb[11].mxu0  ;;  %v807_v31 = vmax.f32 %v797_v11, 0.0  ;;  %v6457_v62 = vcombine.high %v844_v57, %v848_v58  ;;  %v6463_v4 = vcombine.high %v851_v63, %v855_v0  ;;  %v859_v6 = vld [vmem:[#allocation11 + $0x150] sm:$0xff]  ;;  %v864_v11 = vld [vmem:[#allocation11 + $0x178] sm:$0xff] }
 0x2ba   :  { %v803_v28 = vadd.f32 %v802_v27, %v394_v2  ;;  %2467 = vmatpush1.bf16.msra.mxu1 %v6666_v7  ;;  %2553 = vmatpush1.bf16.msra.mxu0 %v6668_v10  ;;  %v808_v19 = vmax.f32 %v799_v20, 0.0  ;;  %v6454_v2 = vcombine.low %v843_v52, %v847_v55  ;;  %v863_v7 = vld [vmem:[#allocation11 + $0x170] sm:$0xff]  ;;  %v860_v10 = vld [vmem:[#allocation11 + $0x158] sm:$0xff]  ;;  %v6462_v12 = vcombine.low %v851_v63, %v855_v0 }
 0x2bb   :  { %v811_v15 = vmax.f32 %v801_v26, 0.0  ;;  %2468 = vmatprep.subr.bf16.mxu1 %v6675_v13  ;;  %2554 = vmatprep.subr.bf16.mxu0 %v6677_v14  ;;  %v6471_v14 = vcombine.high %v859_v6, %v863_v7  ;;  %v6473_v18 = vcombine.high %v860_v10, %v864_v11  ;;  %v867_v20 = vld [vmem:[#allocation11 + $0x190] sm:$0xff]  ;;  %v6470_v53 = vcombine.low %v859_v6, %v863_v7  ;;  %v900_v57 = vld [vmem:[#allocation11 + $0x298] sm:$0xff] }
 0x2bc   :  { %v812_v21 = vmax.f32 %v803_v28, 0.0  ;;  %v871_v23 = vld [vmem:[#allocation11 + $0x1b0] sm:$0xff]  ;;  %v6472_v26 = vcombine.low %v860_v10, %v864_v11  ;;  %v6481_v28 = vcombine.high %v868_v24, %v872_v25  ;;  %v904_v58 = vld [vmem:[#allocation11 + $0x2b8] sm:$0xff] }
 0x2bd   :  { %v8583_v32 = vpack.c.bf16 %v811_v15, %v807_v31  ;;  %v6479_v27 = vcombine.high %v867_v20, %v871_v23  ;;  %v876_v31 = vld [vmem:[#allocation11 + $0x1d8] sm:$0xff]  ;;  %v899_v52 = vld [vmem:[#allocation11 + $0x290] sm:$0xff] }
 0x2be   :  { %v8585_v37 = vpack.c.bf16 %v812_v21, %v808_v19  ;;  %2469 = vmatpush1.bf16.msra.mxu1 %v6674_v29  ;;  %2555 = vmatpush1.bf16.msra.mxu0 %v6676_v30  ;;  %v875_v29 = vld [vmem:[#allocation11 + $0x1d0] sm:$0xff]  ;;  %v880_v15 = vld [vmem:[#allocation11 + $0x1f8] sm:$0xff] }
 0x2bf   :  { %2567 = vmatprep.subr.bf16.mxu1 %v6431_v16  ;;  %2653 = vmatprep.subr.bf16.mxu0 %v6433_v17  ;;  %v879_v30 = vld [vmem:[#allocation11 + $0x1f0] sm:$0xff]  ;;  %v6478_v16 = vcombine.low %v867_v20, %v871_v23  ;;  %v6480_v17 = vcombine.low %v868_v24, %v872_v25  ;;  %v6489_v21 = vcombine.high %v876_v31, %v880_v15  ;;  %v916_v10 = vld [vmem:[#allocation11 + $0x318] sm:$0xff] }
 0x2c0   :  { %2470 = vmatprep.mubr.bf16.mxu1 %v8585_v37  ;;  %2556 = vmatprep.mubr.bf16.mxu0 %v8585_v37  ;;  %v6487_v19 = vcombine.high %v875_v29, %v879_v30  ;;  %v903_v55 = vld [vmem:[#allocation11 + $0x2b0] sm:$0xff]  ;;  %v920_v11 = vld [vmem:[#allocation11 + $0x338] sm:$0xff] }
 0x2c1   :  { %2471 = vmatmul.mubr.bf16.vlgmr.msra.gmra.mrb[0].mxu1 %v8583_v32  ;;  %2557 = vmatmul.mubr.bf16.vlgmr.msra.gmra.mrb[12].mxu0 %v8583_v32  ;;  %v907_v63 = vld [vmem:[#allocation11 + $0x2d0] sm:$0xff]  ;;  %v924_v24 = vld [vmem:[#allocation11 + $0x358] sm:$0xff] }
 0x2c2   :  { %2568 = vmatpush1.bf16.msra.mxu1 %v6430_v38  ;;  %2599 = vmatprep.mubr.bf16.mxu1 %v8561_v9  ;;  %v6486_v38 = vcombine.low %v875_v29, %v879_v30  ;;  %v911_v0 = vld [vmem:[#allocation11 + $0x2f0] sm:$0xff]  ;;  %v928_v25 = vld [vmem:[#allocation11 + $0x378] sm:$0xff] }
 0x2c3   :  { %2654 = vmatpush1.bf16.msra.mxu0 %v6432_v39  ;;  %2685 = vmatprep.mubr.bf16.mxu0 %v8561_v9  ;;  %v852_v9 = vld [vmem:[#allocation11 + $0x118] sm:$0xff]  ;;  %v6488_v39 = vcombine.low %v876_v31, %v880_v15  ;;  %v915_v6 = vld [vmem:[#allocation11 + $0x310] sm:$0xff] }
 0x2c4   :  { %2569 = vmatprep.subr.bf16.mxu1 %v6439_v41  ;;  %2655 = vmatprep.subr.bf16.mxu0 %v6441_v43  ;;  %v6465_v5 = vcombine.high %v852_v9, %v856_v1  ;;  %v6464_v13 = vcombine.low %v852_v9, %v856_v1  ;;  %v6495_v41 = vcombine.high %v883_v22, %v887_v33  ;;  %v908_v9 = vld [vmem:[#allocation11 + $0x2d8] sm:$0xff]  ;;  %v919_v7 = vld [vmem:[#allocation11 + $0x330] sm:$0xff] }
 0x2c5   :  { %v6497_v43 = vcombine.high %v884_v35, %v888_v36  ;;  %v912_v1 = vld [vmem:[#allocation11 + $0x2f8] sm:$0xff]  ;;  %v923_v20 = vld [vmem:[#allocation11 + $0x350] sm:$0xff] }
 0x2c6   :  { %2570 = vmatpush1.bf16.msra.mxu1 %v6438_v48  ;;  %v6494_v48 = vcombine.low %v883_v22, %v887_v33  ;;  %v927_v23 = vld [vmem:[#allocation11 + $0x370] sm:$0xff]  ;;  %v932_v31 = vld [vmem:[#allocation11 + $0x398] sm:$0xff] }
 0x2c7   :  { %2656 = vmatpush1.bf16.msra.mxu0 %v6440_v49  ;;  %2571 = vmatprep.subr.bf16.mxu1 %v6447_v50  ;;  %v6496_v49 = vcombine.low %v884_v35, %v888_v36  ;;  %v6503_v50 = vcombine.high %v891_v44, %v895_v45  ;;  %v931_v29 = vld [vmem:[#allocation11 + $0x390] sm:$0xff]  ;;  %v936_v15 = vld [vmem:[#allocation11 + $0x3b8] sm:$0xff] }
 0x2c8   :  { %2657 = vmatprep.subr.bf16.mxu0 %v6449_v51  ;;  %v6505_v51 = vcombine.high %v892_v46, %v896_v47  ;;  %v935_v30 = vld [vmem:[#allocation11 + $0x3b0] sm:$0xff]  ;;  %v940_v35 = vld [vmem:[#allocation11 + $0x3d8] sm:$0xff] }
 0x2c9   :  { %v939_v22 = vld [vmem:[#allocation11 + $0x3d0] sm:$0xff]  ;;  %v944_v36 = vld [vmem:[#allocation11 + $0x3f8] sm:$0xff] }
 0x2ca   :  { %2572 = vmatpush1.bf16.msra.mxu1 %v6446_v59  ;;  %v6502_v59 = vcombine.low %v891_v44, %v895_v45  ;;  %v943_v33 = vld [vmem:[#allocation11 + $0x3f0] sm:$0xff] }
 0x2cb   :  { %2658 = vmatpush1.bf16.msra.mxu0 %v6448_v60  ;;  %2573 = vmatprep.subr.bf16.mxu1 %v6455_v61  ;;  %v6504_v60 = vcombine.low %v892_v46, %v896_v47  ;;  %v6511_v61 = vcombine.high %v899_v52, %v903_v55  ;;  %v947_v44 = vld [vmem:[#allocation11 + $0x410] sm:$0xff]  ;;  %v948_v46 = vld [vmem:[#allocation11 + $0x418] sm:$0xff] }
 0x2cc   :  { %2659 = vmatprep.subr.bf16.mxu0 %v6457_v62  ;;  %v6513_v62 = vcombine.high %v900_v57, %v904_v58  ;;  %v951_v45 = vld [vmem:[#allocation11 + $0x430] sm:$0xff]  ;;  %v952_v47 = vld [vmem:[#allocation11 + $0x438] sm:$0xff] }
 0x2ce   :  { %2574 = vmatpush1.bf16.msra.mxu1 %v6454_v2  ;;  %v6510_v2 = vcombine.low %v899_v52, %v903_v55  ;;  %v955_v52 = vld [vmem:[#allocation11 + $0x450] sm:$0xff] }
 0x2cf   :  { %2660 = vmatpush1.bf16.msra.mxu0 %v6456_v3  ;;  %2575 = vmatprep.subr.bf16.mxu1 %v6463_v4  ;;  %v6512_v3 = vcombine.low %v900_v57, %v904_v58  ;;  %v6519_v4 = vcombine.high %v907_v63, %v911_v0  ;;  %v959_v55 = vld [vmem:[#allocation11 + $0x470] sm:$0xff]  ;;  %v6558_v57 = vcombine.low %v947_v44, %v951_v45  ;;  %v956_v58 = vld [vmem:[#allocation11 + $0x458] sm:$0xff] }
 0x2d0   :  { %2661 = vmatprep.subr.bf16.mxu0 %v6465_v5  ;;  %v6521_v5 = vcombine.high %v908_v9, %v912_v1 }
 0x2d2   :  { %2576 = vmatpush1.bf16.msra.mxu1 %v6462_v12  ;;  %v6518_v12 = vcombine.low %v907_v63, %v911_v0  ;;  %v967_v63 = vld [vmem:[#allocation11 + $0x4b0] sm:$0xff] }
 0x2d3   :  { %2662 = vmatpush1.bf16.msra.mxu0 %v6464_v13  ;;  %2577 = vmatprep.subr.bf16.mxu1 %v6471_v14  ;;  %v6520_v13 = vcombine.low %v908_v9, %v912_v1  ;;  %v6527_v14 = vcombine.high %v915_v6, %v919_v7  ;;  %v964_v9 = vld [vmem:[#allocation11 + $0x498] sm:$0xff] }
 0x2d4   :  { %2663 = vmatprep.subr.bf16.mxu0 %v6473_v18  ;;  %v6529_v18 = vcombine.high %v916_v10, %v920_v11  ;;  %v968_v1 = vld [vmem:[#allocation11 + $0x4b8] sm:$0xff] }
 0x2d6   :  { %2578 = vmatpush1.bf16.msra.mxu1 %v6470_v53  ;;  %v6526_v53 = vcombine.low %v915_v6, %v919_v7  ;;  %v971_v6 = vld [vmem:[#allocation11 + $0x4d0] sm:$0xff] }
 0x2d7   :  { %2664 = vmatpush1.bf16.msra.mxu0 %v6472_v26  ;;  %2579 = vmatprep.subr.bf16.mxu1 %v6479_v27  ;;  %v6528_v26 = vcombine.low %v916_v10, %v920_v11  ;;  %v6535_v27 = vcombine.high %v923_v20, %v927_v23  ;;  %v975_v7 = vld [vmem:[#allocation11 + $0x4f0] sm:$0xff]  ;;  %v972_v10 = vld [vmem:[#allocation11 + $0x4d8] sm:$0xff] }
 0x2d8   :  { %2665 = vmatprep.subr.bf16.mxu0 %v6481_v28  ;;  %v6537_v28 = vcombine.high %v924_v24, %v928_v25  ;;  %v976_v11 = vld [vmem:[#allocation11 + $0x4f8] sm:$0xff] }
 0x2da   :  { %2580 = vmatpush1.bf16.msra.mxu1 %v6478_v16  ;;  %v6534_v16 = vcombine.low %v923_v20, %v927_v23  ;;  %v983_v20 = vld [vmem:[#allocation11 + $0x530] sm:$0xff]  ;;  %v980_v23 = vld [vmem:[#allocation11 + $0x518] sm:$0xff] }
 0x2db   :  { %2666 = vmatpush1.bf16.msra.mxu0 %v6480_v17  ;;  %2581 = vmatprep.subr.bf16.mxu1 %v6487_v19  ;;  %v6536_v17 = vcombine.low %v924_v24, %v928_v25  ;;  %v6543_v19 = vcombine.high %v931_v29, %v935_v30  ;;  %v984_v24 = vld [vmem:[#allocation11 + $0x538] sm:$0xff]  ;;  %v6584_v25 = vcombine.low %v972_v10, %v976_v11 }
 0x2dc   :  { %2667 = vmatprep.subr.bf16.mxu0 %v6489_v21  ;;  %v6545_v21 = vcombine.high %v932_v31, %v936_v15 }
 0x2de   :  { %2582 = vmatpush1.bf16.msra.mxu1 %v6486_v38  ;;  %v6542_v38 = vcombine.low %v931_v29, %v935_v30  ;;  %v988_v29 = vld [vmem:[#allocation11 + $0x558] sm:$0xff] }
 0x2df   :  { %2668 = vmatpush1.bf16.msra.mxu0 %v6488_v39  ;;  %2583 = vmatprep.subr.bf16.mxu1 %v6495_v41  ;;  %v6544_v39 = vcombine.low %v932_v31, %v936_v15  ;;  %v6551_v41 = vcombine.high %v939_v22, %v943_v33  ;;  %v992_v30 = vld [vmem:[#allocation11 + $0x578] sm:$0xff]  ;;  %v6592_v15 = vcombine.low %v980_v23, %v984_v24 }
 0x2e0   :  { %2669 = vmatprep.subr.bf16.mxu0 %v6497_v43  ;;  %v6553_v43 = vcombine.high %v940_v35, %v944_v36 }
 0x2e2   :  { %2584 = vmatpush1.bf16.msra.mxu1 %v6494_v48  ;;  %v6550_v48 = vcombine.low %v939_v22, %v943_v33  ;;  %v996_v22 = vld [vmem:[#allocation11 + $0x598] sm:$0xff] }
 0x2e3   :  { %2670 = vmatpush1.bf16.msra.mxu0 %v6496_v49  ;;  %2585 = vmatprep.subr.bf16.mxu1 %v6503_v50  ;;  %v6552_v49 = vcombine.low %v940_v35, %v944_v36  ;;  %v6559_v50 = vcombine.high %v947_v44, %v951_v45  ;;  %v1000_v33 = vld [vmem:[#allocation11 + $0x5b8] sm:$0xff]  ;;  %v6600_v36 = vcombine.low %v988_v29, %v992_v30 }
 0x2e4   :  { %2671 = vmatprep.subr.bf16.mxu0 %v6505_v51  ;;  %v6561_v51 = vcombine.high %v948_v46, %v952_v47  ;;  %v1004_v44 = vld [vmem:[#allocation11 + $0x5d8] sm:$0xff] }
 0x2e5   :  { %v1008_v45 = vld [vmem:[#allocation11 + $0x5f8] sm:$0xff] }
 0x2e6   :  { %2586 = vmatpush1.bf16.msra.mxu1 %v6502_v59  ;;  %v960_v59 = vld [vmem:[#allocation11 + $0x478] sm:$0xff] }
 0x2e7   :  { %2672 = vmatpush1.bf16.msra.mxu0 %v6504_v60  ;;  %2587 = vmatprep.subr.bf16.mxu1 %v6511_v61  ;;  %v6560_v60 = vcombine.low %v948_v46, %v952_v47  ;;  %v6567_v61 = vcombine.high %v955_v52, %v959_v55  ;;  %v6569_v0 = vcombine.high %v956_v58, %v960_v59 }
 0x2e8   :  { %2673 = vmatprep.subr.bf16.mxu0 %v6513_v62  ;;  %v963_v62 = vld [vmem:[#allocation11 + $0x490] sm:$0xff]  ;;  %v6608_v47 = vcombine.low %v996_v22, %v1000_v33 }
 0x2ea   :  { %2588 = vmatpush1.bf16.msra.mxu1 %v6510_v2  ;;  %v6566_v2 = vcombine.low %v955_v52, %v959_v55  ;;  %v1012_v52 = vld [vmem:[#allocation11 + $0x618] sm:$0xff] }
 0x2eb   :  { %2674 = vmatpush1.bf16.msra.mxu0 %v6512_v3  ;;  %2589 = vmatprep.subr.bf16.mxu1 %v6519_v4  ;;  %v6568_v3 = vcombine.low %v956_v58, %v960_v59  ;;  %v6575_v4 = vcombine.high %v963_v62, %v967_v63  ;;  %v1016_v55 = vld [vmem:[#allocation11 + $0x638] sm:$0xff]  ;;  %v6616_v58 = vcombine.low %v1004_v44, %v1008_v45 }
 0x2ec   :  { %2675 = vmatprep.subr.bf16.mxu0 %v6521_v5  ;;  %v6577_v5 = vcombine.high %v964_v9, %v968_v1 }
 0x2ee   :  { %2590 = vmatpush1.bf16.msra.mxu1 %v6518_v12  ;;  %v6574_v12 = vcombine.low %v963_v62, %v967_v63  ;;  %v1023_v62 = vld [vmem:[#allocation11 + $0x670] sm:$0xff]  ;;  %v1020_v63 = vld [vmem:[#allocation11 + $0x658] sm:$0xff] }
 0x2ef   :  { %2676 = vmatpush1.bf16.msra.mxu0 %v6520_v13  ;;  %2591 = vmatprep.subr.bf16.mxu1 %v6527_v14  ;;  %v6583_v13 = vcombine.high %v971_v6, %v975_v7  ;;  %v6585_v14 = vcombine.high %v972_v10, %v976_v11 }
 0x2f0   :  { %2677 = vmatprep.subr.bf16.mxu0 %v6529_v18  ;;  %v979_v18 = vld [vmem:[#allocation11 + $0x510] sm:$0xff] }
 0x2f1   :  { %v6590_v31 = vcombine.low %v979_v18, %v983_v20 }
 0x2f2   :  { %2592 = vmatpush1.bf16.msra.mxu1 %v6526_v53  ;;  %v6591_v53 = vcombine.high %v979_v18, %v983_v20  ;;  %v1036_v18 = vld [vmem:[#allocation11 + $0x6d8] sm:$0xff] }
 0x2f3   :  { %2678 = vmatpush1.bf16.msra.mxu0 %v6528_v26  ;;  %2593 = vmatprep.subr.bf16.mxu1 %v6535_v27  ;;  %v6593_v26 = vcombine.high %v980_v23, %v984_v24  ;;  %v987_v27 = vld [vmem:[#allocation11 + $0x550] sm:$0xff]  ;;  %v1040_v20 = vld [vmem:[#allocation11 + $0x6f8] sm:$0xff] }
 0x2f4   :  { %2679 = vmatprep.subr.bf16.mxu0 %v6537_v28  ;;  %v991_v28 = vld [vmem:[#allocation11 + $0x570] sm:$0xff] }
 0x2f5   :  { %v6598_v35 = vcombine.low %v987_v27, %v991_v28 }
 0x2f6   :  { %2594 = vmatpush1.bf16.msra.mxu1 %v6534_v16  ;;  %v6599_v16 = vcombine.high %v987_v27, %v991_v28  ;;  %v1044_v27 = vld [vmem:[#allocation11 + $0x718] sm:$0xff] }
 0x2f7   :  { %2680 = vmatpush1.bf16.msra.mxu0 %v6536_v17  ;;  %2595 = vmatprep.subr.bf16.mxu1 %v6543_v19  ;;  %v6601_v17 = vcombine.high %v988_v29, %v992_v30  ;;  %v995_v19 = vld [vmem:[#allocation11 + $0x590] sm:$0xff]  ;;  %v1048_v28 = vld [vmem:[#allocation11 + $0x738] sm:$0xff]  ;;  %v6648_v30 = vcombine.low %v1036_v18, %v1040_v20 }
 0x2f8   :  { %2681 = vmatprep.subr.bf16.mxu0 %v6545_v21  ;;  %v999_v21 = vld [vmem:[#allocation11 + $0x5b0] sm:$0xff] }
 0x2f9   :  { %v6606_v46 = vcombine.low %v995_v19, %v999_v21 }
 0x2fa   :  { %2596 = vmatpush1.bf16.msra.mxu1 %v6542_v38  ;;  %v6607_v38 = vcombine.high %v995_v19, %v999_v21  ;;  %v1052_v19 = vld [vmem:[#allocation11 + $0x758] sm:$0xff] }
 0x2fb   :  { %2682 = vmatpush1.bf16.msra.mxu0 %v6544_v39  ;;  %2597 = vmatprep.subr.bf16.mxu1 %v6551_v41  ;;  %v6609_v39 = vcombine.high %v996_v22, %v1000_v33  ;;  %v1003_v41 = vld [vmem:[#allocation11 + $0x5d0] sm:$0xff]  ;;  %v1056_v21 = vld [vmem:[#allocation11 + $0x778] sm:$0xff]  ;;  %v6656_v33 = vcombine.low %v1044_v27, %v1048_v28 }
 0x2fc   :  { %2683 = vmatprep.subr.bf16.mxu0 %v6553_v43  ;;  %v1007_v43 = vld [vmem:[#allocation11 + $0x5f0] sm:$0xff] }
 0x2fe   :  { %2598 = vmatpush1.bf16.msra.mxu1 %v6550_v48  ;;  %v6615_v48 = vcombine.high %v1003_v41, %v1007_v43 }
 0x2ff   :  { %2684 = vmatpush1.bf16.msra.mxu0 %v6552_v49  ;;  %2610 = vmatprep.subr.bf16.mxu1 %v6559_v50  ;;  %v6617_v49 = vcombine.high %v1004_v44, %v1008_v45  ;;  %v1011_v50 = vld [vmem:[#allocation11 + $0x610] sm:$0xff]  ;;  %v6664_v45 = vcombine.low %v1052_v19, %v1056_v21 }
 0x300   :  { %2696 = vmatprep.subr.bf16.mxu0 %v6561_v51  ;;  %v1015_v51 = vld [vmem:[#allocation11 + $0x630] sm:$0xff] }
 0x301   :  { %2600 = vmatmul.mubr.bf16.vlgmr.msra.gmra.mrb[4].mxu1 %v8559_v8  ;;  %v6623_v59 = vcombine.high %v1011_v50, %v1015_v51 }
 0x302   :  { %2686 = vmatmul.mubr.bf16.vlgmr.msra.gmra.mrb[16].mxu0 %v8559_v8  ;;  %2611 = vmatpush1.bf16.msra.mxu1 %v6558_v57  ;;  %v6576_v8 = vcombine.low %v964_v9, %v968_v1  ;;  %v6614_v57 = vcombine.low %v1003_v41, %v1007_v43  ;;  %v6622_v9 = vcombine.low %v1011_v50, %v1015_v51  ;;  %v1060_v41 = vld [vmem:[#allocation11 + $0x798] sm:$0xff] }
 0x303   :  { %2642 = vmatprep.mubr.bf16.mxu1 %v8585_v37  ;;  %2697 = vmatpush1.bf16.msra.mxu0 %v6560_v60  ;;  %v6625_v60 = vcombine.high %v1012_v52, %v1016_v55  ;;  %v6624_v1 = vcombine.low %v1012_v52, %v1016_v55  ;;  %v1064_v43 = vld [vmem:[#allocation11 + $0x7b8] sm:$0xff] }
 0x304   :  { %2728 = vmatprep.mubr.bf16.mxu0 %v8585_v37  ;;  %2612 = vmatprep.subr.bf16.mxu1 %v6567_v61  ;;  %v6582_v37 = vcombine.low %v971_v6, %v975_v7  ;;  %v1019_v61 = vld [vmem:[#allocation11 + $0x650] sm:$0xff]  ;;  %v1028_v6 = vld [vmem:[#allocation11 + $0x698] sm:$0xff]  ;;  %v6672_v55 = vcombine.low %v1060_v41, %v1064_v43 }
 0x305   :  { %2698 = vmatprep.subr.bf16.mxu0 %v6569_v0  ;;  %v1024_v0 = vld [vmem:[#allocation11 + $0x678] sm:$0xff]  ;;  %v6630_v10 = vcombine.low %v1019_v61, %v1023_v62 }
 0x306   :  { %2613 = vmatpush1.bf16.msra.mxu1 %v6566_v2  ;;  %v6631_v2 = vcombine.high %v1019_v61, %v1023_v62  ;;  %v1032_v7 = vld [vmem:[#allocation11 + $0x6b8] sm:$0xff]  ;;  %v6632_v11 = vcombine.low %v1020_v63, %v1024_v0  ;;  %v7444_v61 = vld [vmem:[#allocation14 + $0x4] ss:$28 sps:$4 sm:$0xff]   ;;  %v7447_v62 = vld [vmem:[#allocation14 + $0xc] ss:$28 sps:$4 sm:$0xff]  }
 0x307   :  { %2699 = vmatpush1.bf16.msra.mxu0 %v6568_v3  ;;  %2614 = vmatprep.subr.bf16.mxu1 %v6575_v4  ;;  %v6633_v3 = vcombine.high %v1020_v63, %v1024_v0  ;;  %v1027_v4 = vld [vmem:[#allocation11 + $0x690] sm:$0xff]  ;;  %v6640_v24 = vcombine.low %v1028_v6, %v1032_v7  ;;  %v1068_v50 = vld [vmem:[#allocation11 + $0x7d8] sm:$0xff]  ;;  %v7442_v63 = vld [vmem:[#allocation14] ss:$28 sps:$4 sm:$0xff]  }
 0x308   :  { %2700 = vmatprep.subr.bf16.mxu0 %v6577_v5  ;;  %v1031_v5 = vld [vmem:[#allocation11 + $0x6b0] sm:$0xff]  ;;  %v1072_v51 = vld [vmem:[#allocation11 + $0x7f8] sm:$0xff] }
 0x309   :  { %v6638_v23 = vcombine.low %v1027_v4, %v1031_v5  ;;  %v7445_v0 = vld [vmem:[#allocation14 + $0x8] ss:$28 sps:$4 sm:$0xff]  }
 0x30a   :  { %2615 = vmatpush1.bf16.msra.mxu1 %v6574_v12  ;;  %v6639_v12 = vcombine.high %v1027_v4, %v1031_v5  ;;  %v7456_v4 = vld [vmem:[#allocation14 + $0x74] ss:$28 sps:$4 sm:$0xff]   ;;  %v7459_v5 = vld [vmem:[#allocation14 + $0x7c] ss:$28 sps:$4 sm:$0xff]  }
 0x30b   :  { %2701 = vmatpush1.bf16.msra.mxu0 %v6576_v8  ;;  %2616 = vmatprep.subr.bf16.mxu1 %v6583_v13  ;;  %v6641_v8 = vcombine.high %v1028_v6, %v1032_v7  ;;  %v1035_v13 = vld [vmem:[#allocation11 + $0x6d0] sm:$0xff]  ;;  %v7457_v7 = vld [vmem:[#allocation14 + $0x78] ss:$28 sps:$4 sm:$0xff]  }
 0x30c   :  { %2702 = vmatprep.subr.bf16.mxu0 %v6585_v14  ;;  %v1039_v14 = vld [vmem:[#allocation11 + $0x6f0] sm:$0xff] }
 0x30d   :  { %v6646_v29 = vcombine.low %v1035_v13, %v1039_v14  ;;  %v7454_v6 = vld [vmem:[#allocation14 + $0x70] ss:$28 sps:$4 sm:$0xff]  }
 0x30e   :  { %2617 = vmatpush1.bf16.msra.mxu1 %v6582_v37  ;;  %v6647_v37 = vcombine.high %v1035_v13, %v1039_v14  ;;  %v7471_v13 = vld [vmem:[#allocation14 + $0xec] ss:$28 sps:$4 sm:$0xff]   ;;  %v7466_v14 = vld [vmem:[#allocation14 + $0xe0] ss:$28 sps:$4 sm:$0xff]  }
 0x30f   :  { %2703 = vmatpush1.bf16.msra.mxu0 %v6584_v25  ;;  %2618 = vmatprep.subr.bf16.mxu1 %v6591_v53  ;;  %v6649_v25 = vcombine.high %v1036_v18, %v1040_v20  ;;  %v1043_v53 = vld [vmem:[#allocation11 + $0x710] sm:$0xff]  ;;  %v7474_v20 = vld [vmem:[#allocation14 + $0x11c] ss:$28 sps:$4 sm:$0xff]  }
 0x310   :  { %2704 = vmatprep.subr.bf16.mxu0 %v6593_v26  ;;  %v1047_v26 = vld [vmem:[#allocation11 + $0x730] sm:$0xff] }
 0x311   :  { %v6654_v22 = vcombine.low %v1043_v53, %v1047_v26  ;;  %v7469_v18 = vld [vmem:[#allocation14 + $0xe8] ss:$28 sps:$4 sm:$0xff]  }
 0x312   :  { %2619 = vmatpush1.bf16.msra.mxu1 %v6590_v31  ;;  %v6655_v31 = vcombine.high %v1043_v53, %v1047_v26  ;;  %v7483_v53 = vld [vmem:[#allocation14 + $0x15c] ss:$28 sps:$4 sm:$0xff]   ;;  %v7478_v26 = vld [vmem:[#allocation14 + $0x150] ss:$28 sps:$4 sm:$0xff]  }
 0x313   :  { %2705 = vmatpush1.bf16.msra.mxu0 %v6592_v15  ;;  %2620 = vmatprep.subr.bf16.mxu1 %v6599_v16  ;;  %v6657_v15 = vcombine.high %v1044_v27, %v1048_v28  ;;  %v1051_v16 = vld [vmem:[#allocation11 + $0x750] sm:$0xff]  ;;  %v7481_v27 = vld [vmem:[#allocation14 + $0x158] ss:$28 sps:$4 sm:$0xff]  }
 0x314   :  { %2706 = vmatprep.subr.bf16.mxu0 %v6601_v17  ;;  %v1055_v17 = vld [vmem:[#allocation11 + $0x770] sm:$0xff] }
 0x315   :  { %v6662_v44 = vcombine.low %v1051_v16, %v1055_v17  ;;  %v7486_v28 = vld [vmem:[#allocation14 + $0x18c] ss:$28 sps:$4 sm:$0xff]  }
 0x316   :  { %2621 = vmatpush1.bf16.msra.mxu1 %v6598_v35  ;;  %v6663_v35 = vcombine.high %v1051_v16, %v1055_v17  ;;  %v7495_v16 = vld [vmem:[#allocation14 + $0x1cc] ss:$28 sps:$4 sm:$0xff]   ;;  %v7490_v17 = vld [vmem:[#allocation14 + $0x1c0] ss:$28 sps:$4 sm:$0xff]  }
 0x317   :  { %2707 = vmatpush1.bf16.msra.mxu0 %v6600_v36  ;;  %2622 = vmatprep.subr.bf16.mxu1 %v6607_v38  ;;  %v6665_v36 = vcombine.high %v1052_v19, %v1056_v21  ;;  %v1059_v38 = vld [vmem:[#allocation11 + $0x790] sm:$0xff]  ;;  %v7498_v21 = vld [vmem:[#allocation14 + $0x1fc] ss:$28 sps:$4 sm:$0xff]  }
 0x318   :  { %2708 = vmatprep.subr.bf16.mxu0 %v6609_v39  ;;  %v1063_v39 = vld [vmem:[#allocation11 + $0x7b0] sm:$0xff] }
 0x319   :  { %v6670_v52 = vcombine.low %v1059_v38, %v1063_v39  ;;  %v7493_v19 = vld [vmem:[#allocation14 + $0x1c8] ss:$28 sps:$4 sm:$0xff]  }
 0x31a   :  { %2623 = vmatpush1.bf16.msra.mxu1 %v6606_v46  ;;  %v6671_v46 = vcombine.high %v1059_v38, %v1063_v39  ;;  %v7507_v38 = vld [vmem:[#allocation14 + $0x23c] ss:$28 sps:$4 sm:$0xff]   ;;  %v7502_v39 = vld [vmem:[#allocation14 + $0x230] ss:$28 sps:$4 sm:$0xff]  }
 0x31b   :  { %2709 = vmatpush1.bf16.msra.mxu0 %v6608_v47  ;;  %2624 = vmatprep.subr.bf16.mxu1 %v6615_v48  ;;  %v6673_v47 = vcombine.high %v1060_v41, %v1064_v43  ;;  %v1067_v48 = vld [vmem:[#allocation11 + $0x7d0] sm:$0xff]  ;;  %v7505_v41 = vld [vmem:[#allocation14 + $0x238] ss:$28 sps:$4 sm:$0xff]  }
 0x31c   :  { %2710 = vmatprep.subr.bf16.mxu0 %v6617_v49  ;;  %v1071_v49 = vld [vmem:[#allocation11 + $0x7f0] sm:$0xff] }
 0x31d   :  { %v7510_v43 = vld [vmem:[#allocation14 + $0x26c] ss:$28 sps:$4 sm:$0xff]  }
 0x31e   :  { %2625 = vmatpush1.bf16.msra.mxu1 %v6614_v57  ;;  %v6679_v57 = vcombine.high %v1067_v48, %v1071_v49 }
 0x31f   :  { %2711 = vmatpush1.bf16.msra.mxu0 %v6616_v58  ;;  %2626 = vmatprep.subr.bf16.mxu1 %v6623_v59  ;;  %v6681_v58 = vcombine.high %v1068_v50, %v1072_v51  ;;  %v6678_v59 = vcombine.low %v1067_v48, %v1071_v49  ;;  %v7519_v48 = vld [vmem:[#allocation14 + $0x2ac] ss:$28 sps:$4 sm:$0xff]   ;;  %v7514_v49 = vld [vmem:[#allocation14 + $0x2a0] ss:$28 sps:$4 sm:$0xff]  }
 0x320   :  { %2712 = vmatprep.subr.bf16.mxu0 %v6625_v60  ;;  %v6680_v60 = vcombine.low %v1068_v50, %v1072_v51  ;;  %v7517_v50 = vld [vmem:[#allocation14 + $0x2a8] ss:$28 sps:$4 sm:$0xff]   ;;  %v7522_v51 = vld [vmem:[#allocation14 + $0x2dc] ss:$28 sps:$4 sm:$0xff]  }
 0x322   :  { %2627 = vmatpush1.bf16.msra.mxu1 %v6622_v9  ;;  %v7450_v9 = vld [vmem:[#allocation14 + $0x3c] ss:$28 sps:$4 sm:$0xff]  }
 0x323   :  { %2713 = vmatpush1.bf16.msra.mxu0 %v6624_v1  ;;  %2628 = vmatprep.subr.bf16.mxu1 %v6631_v2  ;;  %v7453_v1 = vld [vmem:[#allocation14 + $0x44] ss:$28 sps:$4 sm:$0xff]   ;;  %v7448_v2 = vld [vmem:[#allocation14 + $0x38] ss:$28 sps:$4 sm:$0xff]  }
 0x324   :  { %2714 = vmatprep.subr.bf16.mxu0 %v6633_v3  ;;  %v7451_v3 = vld [vmem:[#allocation14 + $0x40] ss:$28 sps:$4 sm:$0xff]  }
 0x326   :  { %2629 = vmatpush1.bf16.msra.mxu1 %v6630_v10  ;;  %v7462_v10 = vld [vmem:[#allocation14 + $0xac] ss:$28 sps:$4 sm:$0xff]  }
 0x327   :  { %2715 = vmatpush1.bf16.msra.mxu0 %v6632_v11  ;;  %2630 = vmatprep.subr.bf16.mxu1 %v6639_v12  ;;  %v7465_v11 = vld [vmem:[#allocation14 + $0xb4] ss:$28 sps:$4 sm:$0xff]   ;;  %v7460_v12 = vld [vmem:[#allocation14 + $0xa8] ss:$28 sps:$4 sm:$0xff]  }
 0x328   :  { %2716 = vmatprep.subr.bf16.mxu0 %v6641_v8  ;;  %v7468_v8 = vld [vmem:[#allocation14 + $0xe4] ss:$28 sps:$4 sm:$0xff]  }
 0x32a   :  { %2631 = vmatpush1.bf16.msra.mxu1 %v6638_v23  ;;  %v7477_v23 = vld [vmem:[#allocation14 + $0x124] ss:$28 sps:$4 sm:$0xff]  }
 0x32b   :  { %2717 = vmatpush1.bf16.msra.mxu0 %v6640_v24  ;;  %2632 = vmatprep.subr.bf16.mxu1 %v6647_v37  ;;  %v7472_v24 = vld [vmem:[#allocation14 + $0x118] ss:$28 sps:$4 sm:$0xff]   ;;  %v7475_v37 = vld [vmem:[#allocation14 + $0x120] ss:$28 sps:$4 sm:$0xff]  }
 0x32c   :  { %2718 = vmatprep.subr.bf16.mxu0 %v6649_v25  ;;  %v7480_v25 = vld [vmem:[#allocation14 + $0x154] ss:$28 sps:$4 sm:$0xff]  }
 0x32e   :  { %2633 = vmatpush1.bf16.msra.mxu1 %v6646_v29  ;;  %v7489_v29 = vld [vmem:[#allocation14 + $0x194] ss:$28 sps:$4 sm:$0xff]  }
 0x32f   :  { %2719 = vmatpush1.bf16.msra.mxu0 %v6648_v30  ;;  %2634 = vmatprep.subr.bf16.mxu1 %v6655_v31  ;;  %v7484_v30 = vld [vmem:[#allocation14 + $0x188] ss:$28 sps:$4 sm:$0xff]   ;;  %v7487_v31 = vld [vmem:[#allocation14 + $0x190] ss:$28 sps:$4 sm:$0xff]  }
 0x330   :  { %2720 = vmatprep.subr.bf16.mxu0 %v6657_v15  ;;  %v7492_v15 = vld [vmem:[#allocation14 + $0x1c4] ss:$28 sps:$4 sm:$0xff]  }
 0x332   :  { %2635 = vmatpush1.bf16.msra.mxu1 %v6654_v22  ;;  %v7501_v22 = vld [vmem:[#allocation14 + $0x204] ss:$28 sps:$4 sm:$0xff]  }
 0x333   :  { %2721 = vmatpush1.bf16.msra.mxu0 %v6656_v33  ;;  %2636 = vmatprep.subr.bf16.mxu1 %v6663_v35  ;;  %v7496_v33 = vld [vmem:[#allocation14 + $0x1f8] ss:$28 sps:$4 sm:$0xff]   ;;  %v7499_v35 = vld [vmem:[#allocation14 + $0x200] ss:$28 sps:$4 sm:$0xff]  }
 0x334   :  { %2722 = vmatprep.subr.bf16.mxu0 %v6665_v36  ;;  %v7504_v36 = vld [vmem:[#allocation14 + $0x234] ss:$28 sps:$4 sm:$0xff]  }
 0x336   :  { %2637 = vmatpush1.bf16.msra.mxu1 %v6662_v44  ;;  %v7513_v44 = vld [vmem:[#allocation14 + $0x274] ss:$28 sps:$4 sm:$0xff]  }
 0x337   :  { %2723 = vmatpush1.bf16.msra.mxu0 %v6664_v45  ;;  %2638 = vmatprep.subr.bf16.mxu1 %v6671_v46  ;;  %v7508_v45 = vld [vmem:[#allocation14 + $0x268] ss:$28 sps:$4 sm:$0xff]   ;;  %v7511_v46 = vld [vmem:[#allocation14 + $0x270] ss:$28 sps:$4 sm:$0xff]  }
 0x338   :  { %2724 = vmatprep.subr.bf16.mxu0 %v6673_v47  ;;  %v7516_v47 = vld [vmem:[#allocation14 + $0x2a4] ss:$28 sps:$4 sm:$0xff]  }
 0x33a   :  { %2639 = vmatpush1.bf16.msra.mxu1 %v6670_v52  ;;  %v7525_v52 = vld [vmem:[#allocation14 + $0x2e4] ss:$28 sps:$4 sm:$0xff]  }
 0x33b   :  { %2725 = vmatpush1.bf16.msra.mxu0 %v6672_v55  ;;  %2640 = vmatprep.subr.bf16.mxu1 %v6679_v57  ;;  %v7520_v55 = vld [vmem:[#allocation14 + $0x2d8] ss:$28 sps:$4 sm:$0xff]   ;;  %v7523_v57 = vld [vmem:[#allocation14 + $0x2e0] ss:$28 sps:$4 sm:$0xff]  }
 0x33c   :  { %2726 = vmatprep.subr.bf16.mxu0 %v6681_v58  ;;  %v7528_v58 = vld [vmem:[#allocation14 + $0x314] ss:$28 sps:$4 sm:$0xff]  }
 0x33e   :  { %2641 = vmatpush1.bf16.msra.mxu1 %v6678_v59  ;;  %v7531_v59 = vld [vmem:[#allocation14 + $0x31c] ss:$28 sps:$4 sm:$0xff]  }
 0x33f   :  { %2727 = vmatpush1.bf16.msra.mxu0 %v6680_v60  ;;  %5616 = vmatprep.subr.bf16.mxu1 %v7444_v61  ;;  %v7526_v60 = vld [vmem:[#allocation14 + $0x310] ss:$28 sps:$4 sm:$0xff]   ;;  %v7529_v61 = vld [vmem:[#allocation14 + $0x318] ss:$28 sps:$4 sm:$0xff]  }
 0x340   :  { %5788 = vmatprep.subr.bf16.mxu0 %v7447_v62  ;;  %v7534_v62 = vld [vmem:[#allocation14 + $0x34c] ss:$28 sps:$4 sm:$0xff]  }
 0x341   :  { %2643 = vmatmul.mubr.bf16.vlgmr.msra.gmra.mrb[4].mxu1 %v8583_v32 }
 0x342   :  { %2729 = vmatmul.mubr.bf16.vlgmr.msra.gmra.mrb[16].mxu0 %v8583_v32  ;;  %5617 = vmatpush1.bf16.msra.mxu1 %v7442_v63  ;;  %v7463_v32 = vld [vmem:[#allocation14 + $0xb0] ss:$28 sps:$4 sm:$0xff]  }
 0x343   :  { %5789 = vmatpush1.bf16.msra.mxu0 %v7445_v0  ;;  %5618 = vmatprep.subr.bf16.mxu1 %v7450_v9  ;;  %v7537_v63 = vld [vmem:[#allocation14 + $0x354] ss:$28 sps:$4 sm:$0xff]   ;;  %v7532_v0 = vld [vmem:[#allocation14 + $0x348] ss:$28 sps:$4 sm:$0xff]  }
 0x344   :  { %5790 = vmatprep.subr.bf16.mxu0 %v7453_v1  ;;  %v7535_v9 = vld [vmem:[#allocation14 + $0x350] ss:$28 sps:$4 sm:$0xff]   ;;  %v7540_v1 = vld [vmem:[#allocation14 + $0x384] ss:$28 sps:$4 sm:$0xff]  }
 0x346   :  { %5619 = vmatpush1.bf16.msra.mxu1 %v7448_v2  ;;  %v7543_v2 = vld [vmem:[#allocation14 + $0x38c] ss:$28 sps:$4 sm:$0xff]  }
 0x347   :  { %5791 = vmatpush1.bf16.msra.mxu0 %v7451_v3  ;;  %5620 = vmatprep.subr.bf16.mxu1 %v7456_v4  ;;  %v8599_v3 = vld [vmem:[#allocation13] sm:$0xff] }
 0x348   :  { %5792 = vmatprep.subr.bf16.mxu0 %v7459_v5  ;;  %v1078_v4 = vrot.slane %v8599_v3, %v8526_v40  ;;  %v1086_v5 = vrot.slane %v8599_v3, %v8574_v54 }
 0x34a   :  { %5621 = vmatpush1.bf16.msra.mxu1 %v7454_v6  ;;  %v1082_v6 = vrot.slane %v8599_v3, %v8529_v42 }
 0x34b   :  { %5793 = vmatpush1.bf16.msra.mxu0 %v7457_v7  ;;  %5622 = vmatprep.subr.bf16.mxu1 %v7462_v10  ;;  %v1090_v7 = vrot.slane %v8599_v3, %v8577_v56 }
 0x34c   :  { %5794 = vmatprep.subr.bf16.mxu0 %v7465_v11 }
 0x34e   :  { %5623 = vmatpush1.bf16.msra.mxu1 %v7460_v12 }
 0x34f   :  { %5795 = vmatpush1.bf16.msra.mxu0 %v7463_v32  ;;  %5624 = vmatprep.subr.bf16.mxu1 %v7468_v8 }
 0x350   :  { %5796 = vmatprep.subr.bf16.mxu0 %v7471_v13 }
 0x352   :  { %5625 = vmatpush1.bf16.msra.mxu1 %v7466_v14 }
 0x353   :  { %5797 = vmatpush1.bf16.msra.mxu0 %v7469_v18  ;;  %5626 = vmatprep.subr.bf16.mxu1 %v7474_v20 }
 0x354   :  { %5798 = vmatprep.subr.bf16.mxu0 %v7477_v23 }
 0x356   :  { %5627 = vmatpush1.bf16.msra.mxu1 %v7472_v24 }
 0x357   :  { %5799 = vmatpush1.bf16.msra.mxu0 %v7475_v37  ;;  %5628 = vmatprep.subr.bf16.mxu1 %v7480_v25 }
 0x358   :  { %5800 = vmatprep.subr.bf16.mxu0 %v7483_v53 }
 0x35a   :  { %5629 = vmatpush1.bf16.msra.mxu1 %v7478_v26 }
 0x35b   :  { %5801 = vmatpush1.bf16.msra.mxu0 %v7481_v27  ;;  %5630 = vmatprep.subr.bf16.mxu1 %v7486_v28 }
 0x35c   :  { %5802 = vmatprep.subr.bf16.mxu0 %v7489_v29 }
 0x35e   :  { %5631 = vmatpush1.bf16.msra.mxu1 %v7484_v30 }
 0x35f   :  { %5803 = vmatpush1.bf16.msra.mxu0 %v7487_v31  ;;  %5632 = vmatprep.subr.bf16.mxu1 %v7492_v15 }
 0x360   :  { %5804 = vmatprep.subr.bf16.mxu0 %v7495_v16 }
 0x362   :  { %5633 = vmatpush1.bf16.msra.mxu1 %v7490_v17 }
 0x363   :  { %5805 = vmatpush1.bf16.msra.mxu0 %v7493_v19  ;;  %5634 = vmatprep.subr.bf16.mxu1 %v7498_v21 }
 0x364   :  { %5806 = vmatprep.subr.bf16.mxu0 %v7501_v22 }
 0x366   :  { %5635 = vmatpush1.bf16.msra.mxu1 %v7496_v33 }
 0x367   :  { %5807 = vmatpush1.bf16.msra.mxu0 %v7499_v35  ;;  %5636 = vmatprep.subr.bf16.mxu1 %v7504_v36  ;;  %v7538_v36 = vld [vmem:[#allocation14 + $0x380] ss:$28 sps:$4 sm:$0xff]  }
 0x368   :  { %5808 = vmatprep.subr.bf16.mxu0 %v7507_v38  ;;  %v7541_v38 = vld [vmem:[#allocation14 + $0x388] ss:$28 sps:$4 sm:$0xff]  }
 0x36a   :  { %5637 = vmatpush1.bf16.msra.mxu1 %v7502_v39  ;;  %v7546_v39 = vld [vmem:[#allocation14 + $0x3bc] ss:$28 sps:$4 sm:$0xff]  }
 0x36b   :  { %5809 = vmatpush1.bf16.msra.mxu0 %v7505_v41  ;;  %5638 = vmatprep.subr.bf16.mxu1 %v7510_v43  ;;  %v7549_v41 = vld [vmem:[#allocation14 + $0x3c4] ss:$28 sps:$4 sm:$0xff]   ;;  %v7544_v43 = vld [vmem:[#allocation14 + $0x3b8] ss:$28 sps:$4 sm:$0xff]  }
 0x36c   :  { %5810 = vmatprep.subr.bf16.mxu0 %v7513_v44  ;;  %v7547_v44 = vld [vmem:[#allocation14 + $0x3c0] ss:$28 sps:$4 sm:$0xff]  }
 0x36e   :  { %5639 = vmatpush1.bf16.msra.mxu1 %v7508_v45  ;;  %v7552_v45 = vld [vmem:[#allocation14 + $0x3f4] ss:$28 sps:$4 sm:$0xff]  }
 0x36f   :  { %5811 = vmatpush1.bf16.msra.mxu0 %v7511_v46  ;;  %5640 = vmatprep.subr.bf16.mxu1 %v7516_v47  ;;  %v7555_v46 = vld [vmem:[#allocation14 + $0x3fc] ss:$28 sps:$4 sm:$0xff]   ;;  %v7550_v47 = vld [vmem:[#allocation14 + $0x3f0] ss:$28 sps:$4 sm:$0xff]  }
 0x370   :  { %5812 = vmatprep.subr.bf16.mxu0 %v7519_v48  ;;  %v7553_v48 = vld [vmem:[#allocation14 + $0x3f8] ss:$28 sps:$4 sm:$0xff]  }
 0x372   :  { %5641 = vmatpush1.bf16.msra.mxu1 %v7514_v49  ;;  %v7558_v49 = vld [vmem:[#allocation14 + $0x42c] ss:$28 sps:$4 sm:$0xff]  }
 0x373   :  { %5813 = vmatpush1.bf16.msra.mxu0 %v7517_v50  ;;  %5642 = vmatprep.subr.bf16.mxu1 %v7522_v51  ;;  %v7561_v50 = vld [vmem:[#allocation14 + $0x434] ss:$28 sps:$4 sm:$0xff]   ;;  %v7556_v51 = vld [vmem:[#allocation14 + $0x428] ss:$28 sps:$4 sm:$0xff]  }
 0x374   :  { %5814 = vmatprep.subr.bf16.mxu0 %v7525_v52  ;;  %v7559_v52 = vld [vmem:[#allocation14 + $0x430] ss:$28 sps:$4 sm:$0xff]  }
 0x376   :  { %5643 = vmatpush1.bf16.msra.mxu1 %v7520_v55  ;;  %v7564_v55 = vld [vmem:[#allocation14 + $0x464] ss:$28 sps:$4 sm:$0xff]  }
 0x377   :  { %5815 = vmatpush1.bf16.msra.mxu0 %v7523_v57  ;;  %5644 = vmatprep.subr.bf16.mxu1 %v7528_v58  ;;  %v7567_v57 = vld [vmem:[#allocation14 + $0x46c] ss:$28 sps:$4 sm:$0xff]   ;;  %v7562_v58 = vld [vmem:[#allocation14 + $0x460] ss:$28 sps:$4 sm:$0xff]  }
 0x378   :  { %5816 = vmatprep.subr.bf16.mxu0 %v7531_v59  ;;  %v7565_v59 = vld [vmem:[#allocation14 + $0x468] ss:$28 sps:$4 sm:$0xff]  }
 0x37a   :  { %5645 = vmatpush1.bf16.msra.mxu1 %v7526_v60  ;;  %v7570_v60 = vld [vmem:[#allocation14 + $0x49c] ss:$28 sps:$4 sm:$0xff]  }
 0x37b   :  { %5817 = vmatpush1.bf16.msra.mxu0 %v7529_v61  ;;  %5646 = vmatprep.subr.bf16.mxu1 %v7534_v62  ;;  %v7573_v61 = vld [vmem:[#allocation14 + $0x4a4] ss:$28 sps:$4 sm:$0xff]   ;;  %v7568_v62 = vld [vmem:[#allocation14 + $0x498] ss:$28 sps:$4 sm:$0xff]  }
 0x37c   :  { %5818 = vmatprep.subr.bf16.mxu0 %v7537_v63  ;;  %v7571_v63 = vld [vmem:[#allocation14 + $0x4a0] ss:$28 sps:$4 sm:$0xff]  }
 0x37e   :  { %5647 = vmatpush1.bf16.msra.mxu1 %v7532_v0  ;;  %v7576_v0 = vld [vmem:[#allocation14 + $0x4d4] ss:$28 sps:$4 sm:$0xff]  }
 0x37f   :  { %5819 = vmatpush1.bf16.msra.mxu0 %v7535_v9  ;;  %5659 = vmatprep.subr.bf16.mxu1 %v7540_v1  ;;  %v7579_v9 = vld [vmem:[#allocation14 + $0x4dc] ss:$28 sps:$4 sm:$0xff]   ;;  %v7574_v1 = vld [vmem:[#allocation14 + $0x4d0] ss:$28 sps:$4 sm:$0xff]  }
 0x380   :  { %5831 = vmatprep.subr.bf16.mxu0 %v7543_v2  ;;  %v7577_v2 = vld [vmem:[#allocation14 + $0x4d8] ss:$28 sps:$4 sm:$0xff]  }
 0x394   :  { %v2472_v10 = vpop.f32.mrb[0].mxu1  ;;  %v2558_v11 = vpop.f32.mrb[12].mxu0 }
 0x395   :  { %v7218_v12 = vadd.f32 %v2472_v10, %v1078_v4  ;;  %v7222_v32 = vadd.f32 %v2558_v11, %v1086_v5  ;;  %v2474_v8 = vpop.f32.mrb[1].mxu1  ;;  %v2560_v13 = vpop.f32.mrb[13].mxu0  ;;  %v7588_v10 = vld [vmem:[#allocation14 + $0x544] ss:$28 sps:$4 sm:$0xff]   ;;  %v7591_v11 = vld [vmem:[#allocation14 + $0x54c] ss:$28 sps:$4 sm:$0xff]  }
 0x396   :  { %v7219_v14 = vadd.f32 %v2474_v8, %v1082_v6  ;;  %v7223_v18 = vadd.f32 %v2560_v13, %v1090_v7  ;;  %v2476_v20 = vpop.f32.mrb[2].mxu1  ;;  %v2562_v23 = vpop.f32.mrb[14].mxu0  ;;  %v7594_v8 = vld [vmem:[#allocation14 + $0x57c] ss:$28 sps:$4 sm:$0xff]   ;;  %v7597_v13 = vld [vmem:[#allocation14 + $0x584] ss:$28 sps:$4 sm:$0xff]  }
 0x397   :  { %v7220_v24 = vadd.f32 %v2476_v20, %v1078_v4  ;;  %v7224_v37 = vadd.f32 %v2562_v23, %v1086_v5  ;;  %v2478_v25 = vpop.f32.mrb[3].mxu1  ;;  %v2564_v53 = vpop.f32.mrb[15].mxu0  ;;  %v2739_v28 = vmax.f32 %v7218_v12, 0.0  ;;  %v2741_v29 = vmax.f32 %v7222_v32, 0.0  ;;  %v7582_v4 = vld [vmem:[#allocation14 + $0x50c] ss:$28 sps:$4 sm:$0xff]  }
 0x398   :  { %v7221_v26 = vadd.f32 %v2478_v25, %v1082_v6  ;;  %v7225_v27 = vadd.f32 %v2564_v53, %v1090_v7  ;;  %v2740_v15 = vmax.f32 %v7219_v14, 0.0  ;;  %v2742_v16 = vmax.f32 %v7223_v18, 0.0  ;;  %v7585_v5 = vld [vmem:[#allocation14 + $0x514] ss:$28 sps:$4 sm:$0xff]   ;;  %v7580_v6 = vld [vmem:[#allocation14 + $0x508] ss:$28 sps:$4 sm:$0xff]  }
 0x399   :  { %v2747_v30 = vmax.f32 %v7220_v24, 0.0  ;;  %v2749_v31 = vmax.f32 %v7224_v37, 0.0  ;;  %v7583_v7 = vld [vmem:[#allocation14 + $0x510] ss:$28 sps:$4 sm:$0xff]   ;;  %v7586_v12 = vld [vmem:[#allocation14 + $0x540] ss:$28 sps:$4 sm:$0xff]  }
 0x39a   :  { %v2748_v17 = vmax.f32 %v7221_v26, 0.0  ;;  %v2750_v19 = vmax.f32 %v7225_v27, 0.0  ;;  %v7589_v32 = vld [vmem:[#allocation14 + $0x548] ss:$28 sps:$4 sm:$0xff]   ;;  %v7592_v14 = vld [vmem:[#allocation14 + $0x578] ss:$28 sps:$4 sm:$0xff]  }
 0x39b   :  { %v8609_v21 = vpack.c.bf16 %v2747_v30, %v2739_v28  ;;  %v8611_v22 = vpack.c.bf16 %v2749_v31, %v2741_v29  ;;  %v7595_v18 = vld [vmem:[#allocation14 + $0x580] ss:$28 sps:$4 sm:$0xff]   ;;  %v7600_v20 = vld [vmem:[#allocation14 + $0x5b4] ss:$28 sps:$4 sm:$0xff]   ;;  %v7606_v25 = vld [vmem:[#allocation14 + $0x5ec] ss:$28 sps:$4 sm:$0xff]  }
 0x39c   :  { %v8613_v33 = vpack.c.bf16 %v2748_v17, %v2740_v15  ;;  %v8615_v35 = vpack.c.bf16 %v2750_v19, %v2742_v16  ;;  %v7603_v23 = vld [vmem:[#allocation14 + $0x5bc] ss:$28 sps:$4 sm:$0xff]   ;;  %v7598_v24 = vld [vmem:[#allocation14 + $0x5b0] ss:$28 sps:$4 sm:$0xff]   ;;  %v7604_v26 = vld [vmem:[#allocation14 + $0x5e8] ss:$28 sps:$4 sm:$0xff]  }
 0x39d   :  { %v7601_v37 = vld [vmem:[#allocation14 + $0x5b8] ss:$28 sps:$4 sm:$0xff]   ;;  %v7607_v27 = vld [vmem:[#allocation14 + $0x5f0] ss:$28 sps:$4 sm:$0xff]   ;;  %v7612_v28 = vld [vmem:[#allocation14 + $0x624] ss:$28 sps:$4 sm:$0xff]  }
 0x39e   :  { %5648 = vmatprep.mubr.bf16.mxu1 %v8613_v33  ;;  %5820 = vmatprep.mubr.bf16.mxu0 %v8613_v33  ;;  %v7609_v53 = vld [vmem:[#allocation14 + $0x5f4] ss:$28 sps:$4 sm:$0xff]   ;;  %v7615_v29 = vld [vmem:[#allocation14 + $0x62c] ss:$28 sps:$4 sm:$0xff]   ;;  %v7610_v30 = vld [vmem:[#allocation14 + $0x620] ss:$28 sps:$4 sm:$0xff]  }
 0x39f   :  { %5649 = vmatmul.mubr.bf16.vlgmr.msra.gmra.mrb[8].mxu1 %v8609_v21  ;;  %5821 = vmatmul.mubr.bf16.vlgmr.msra.gmra.mrb[20].mxu0 %v8609_v21  ;;  %v7613_v31 = vld [vmem:[#allocation14 + $0x628] ss:$28 sps:$4 sm:$0xff]   ;;  %v7618_v15 = vld [vmem:[#allocation14 + $0x65c] ss:$28 sps:$4 sm:$0xff]  }
 0x3a0   :  { %5660 = vmatpush1.bf16.msra.mxu1 %v7538_v36  ;;  %5832 = vmatpush1.bf16.msra.mxu0 %v7541_v38  ;;  %v7621_v16 = vld [vmem:[#allocation14 + $0x664] ss:$28 sps:$4 sm:$0xff]   ;;  %v7616_v17 = vld [vmem:[#allocation14 + $0x658] ss:$28 sps:$4 sm:$0xff]  }
 0x3a1   :  { %5691 = vmatprep.mubr.bf16.mxu1 %v8615_v35  ;;  %5863 = vmatprep.mubr.bf16.mxu0 %v8615_v35  ;;  %v7619_v19 = vld [vmem:[#allocation14 + $0x660] ss:$28 sps:$4 sm:$0xff]   ;;  %v7624_v36 = vld [vmem:[#allocation14 + $0x694] ss:$28 sps:$4 sm:$0xff]  }
 0x3a2   :  { %5661 = vmatprep.subr.bf16.mxu1 %v7546_v39  ;;  %5833 = vmatprep.subr.bf16.mxu0 %v7549_v41  ;;  %v7627_v38 = vld [vmem:[#allocation14 + $0x69c] ss:$28 sps:$4 sm:$0xff]   ;;  %v7622_v39 = vld [vmem:[#allocation14 + $0x690] ss:$28 sps:$4 sm:$0xff]  }
 0x3a3   :  { %v7625_v41 = vld [vmem:[#allocation14 + $0x698] ss:$28 sps:$4 sm:$0xff]  }
 0x3a4   :  { %5662 = vmatpush1.bf16.msra.mxu1 %v7544_v43  ;;  %5834 = vmatpush1.bf16.msra.mxu0 %v7547_v44  ;;  %v7630_v43 = vld [vmem:[#allocation14 + $0x6cc] ss:$28 sps:$4 sm:$0xff]   ;;  %v7633_v44 = vld [vmem:[#allocation14 + $0x6d4] ss:$28 sps:$4 sm:$0xff]  }
 0x3a5   :  { %5663 = vmatprep.subr.bf16.mxu1 %v7552_v45  ;;  %5835 = vmatprep.subr.bf16.mxu0 %v7555_v46  ;;  %v7628_v45 = vld [vmem:[#allocation14 + $0x6c8] ss:$28 sps:$4 sm:$0xff]   ;;  %v7631_v46 = vld [vmem:[#allocation14 + $0x6d0] ss:$28 sps:$4 sm:$0xff]  }
 0x3a8   :  { %5664 = vmatpush1.bf16.msra.mxu1 %v7550_v47  ;;  %5836 = vmatpush1.bf16.msra.mxu0 %v7553_v48  ;;  %v7636_v47 = vld [vmem:[#allocation14 + $0x704] ss:$28 sps:$4 sm:$0xff]   ;;  %v7639_v48 = vld [vmem:[#allocation14 + $0x70c] ss:$28 sps:$4 sm:$0xff]  }
 0x3a9   :  { %5665 = vmatprep.subr.bf16.mxu1 %v7558_v49  ;;  %5837 = vmatprep.subr.bf16.mxu0 %v7561_v50  ;;  %v7634_v49 = vld [vmem:[#allocation14 + $0x700] ss:$28 sps:$4 sm:$0xff]   ;;  %v7637_v50 = vld [vmem:[#allocation14 + $0x708] ss:$28 sps:$4 sm:$0xff]  }
 0x3ac   :  { %5666 = vmatpush1.bf16.msra.mxu1 %v7556_v51  ;;  %5838 = vmatpush1.bf16.msra.mxu0 %v7559_v52  ;;  %v7642_v51 = vld [vmem:[#allocation14 + $0x73c] ss:$28 sps:$4 sm:$0xff]   ;;  %v7645_v52 = vld [vmem:[#allocation14 + $0x744] ss:$28 sps:$4 sm:$0xff]  }
 0x3ad   :  { %5667 = vmatprep.subr.bf16.mxu1 %v7564_v55  ;;  %5839 = vmatprep.subr.bf16.mxu0 %v7567_v57  ;;  %v7640_v55 = vld [vmem:[#allocation14 + $0x738] ss:$28 sps:$4 sm:$0xff]   ;;  %v7643_v57 = vld [vmem:[#allocation14 + $0x740] ss:$28 sps:$4 sm:$0xff]  }
 0x3b0   :  { %5668 = vmatpush1.bf16.msra.mxu1 %v7562_v58  ;;  %5840 = vmatpush1.bf16.msra.mxu0 %v7565_v59  ;;  %v7648_v58 = vld [vmem:[#allocation14 + $0x774] ss:$28 sps:$4 sm:$0xff]   ;;  %v7651_v59 = vld [vmem:[#allocation14 + $0x77c] ss:$28 sps:$4 sm:$0xff]  }
 0x3b1   :  { %5669 = vmatprep.subr.bf16.mxu1 %v7570_v60  ;;  %5841 = vmatprep.subr.bf16.mxu0 %v7573_v61  ;;  %v7646_v60 = vld [vmem:[#allocation14 + $0x770] ss:$28 sps:$4 sm:$0xff]   ;;  %v7649_v61 = vld [vmem:[#allocation14 + $0x778] ss:$28 sps:$4 sm:$0xff]  }
 0x3b4   :  { %5670 = vmatpush1.bf16.msra.mxu1 %v7568_v62  ;;  %5842 = vmatpush1.bf16.msra.mxu0 %v7571_v63  ;;  %v7654_v62 = vld [vmem:[#allocation14 + $0x7ac] ss:$28 sps:$4 sm:$0xff]   ;;  %v7657_v63 = vld [vmem:[#allocation14 + $0x7b4] ss:$28 sps:$4 sm:$0xff]  }
 0x3b5   :  { %5671 = vmatprep.subr.bf16.mxu1 %v7576_v0  ;;  %5843 = vmatprep.subr.bf16.mxu0 %v7579_v9  ;;  %v7652_v0 = vld [vmem:[#allocation14 + $0x7a8] ss:$28 sps:$4 sm:$0xff]   ;;  %v7655_v9 = vld [vmem:[#allocation14 + $0x7b0] ss:$28 sps:$4 sm:$0xff]  }
 0x3b8   :  { %5672 = vmatpush1.bf16.msra.mxu1 %v7574_v1  ;;  %5844 = vmatpush1.bf16.msra.mxu0 %v7577_v2  ;;  %v7660_v1 = vld [vmem:[#allocation14 + $0x7e4] ss:$28 sps:$4 sm:$0xff]   ;;  %v7663_v2 = vld [vmem:[#allocation14 + $0x7ec] ss:$28 sps:$4 sm:$0xff]  }
 0x3b9   :  { %5673 = vmatprep.subr.bf16.mxu1 %v7582_v4  ;;  %5845 = vmatprep.subr.bf16.mxu0 %v7585_v5  ;;  %v7658_v4 = vld [vmem:[#allocation14 + $0x7e0] ss:$28 sps:$4 sm:$0xff]   ;;  %v7661_v5 = vld [vmem:[#allocation14 + $0x7e8] ss:$28 sps:$4 sm:$0xff]  }
 0x3bc   :  { %5674 = vmatpush1.bf16.msra.mxu1 %v7580_v6  ;;  %5846 = vmatpush1.bf16.msra.mxu0 %v7583_v7  ;;  %v7666_v6 = vld [vmem:[#allocation14 + $0x81c] ss:$28 sps:$4 sm:$0xff]   ;;  %v7669_v7 = vld [vmem:[#allocation14 + $0x824] ss:$28 sps:$4 sm:$0xff]  }
 0x3bd   :  { %5675 = vmatprep.subr.bf16.mxu1 %v7588_v10  ;;  %5847 = vmatprep.subr.bf16.mxu0 %v7591_v11  ;;  %v7664_v10 = vld [vmem:[#allocation14 + $0x818] ss:$28 sps:$4 sm:$0xff]   ;;  %v7667_v11 = vld [vmem:[#allocation14 + $0x820] ss:$28 sps:$4 sm:$0xff]  }
 0x3c0   :  { %5676 = vmatpush1.bf16.msra.mxu1 %v7586_v12  ;;  %5848 = vmatpush1.bf16.msra.mxu0 %v7589_v32  ;;  %v7672_v12 = vld [vmem:[#allocation14 + $0x854] ss:$28 sps:$4 sm:$0xff]   ;;  %v7675_v32 = vld [vmem:[#allocation14 + $0x85c] ss:$28 sps:$4 sm:$0xff]  }
 0x3c1   :  { %5677 = vmatprep.subr.bf16.mxu1 %v7594_v8  ;;  %5849 = vmatprep.subr.bf16.mxu0 %v7597_v13  ;;  %v7670_v8 = vld [vmem:[#allocation14 + $0x850] ss:$28 sps:$4 sm:$0xff]   ;;  %v7673_v13 = vld [vmem:[#allocation14 + $0x858] ss:$28 sps:$4 sm:$0xff]  }
 0x3c4   :  { %5678 = vmatpush1.bf16.msra.mxu1 %v7592_v14  ;;  %5850 = vmatpush1.bf16.msra.mxu0 %v7595_v18  ;;  %v7678_v14 = vld [vmem:[#allocation14 + $0x88c] ss:$28 sps:$4 sm:$0xff]   ;;  %v7681_v18 = vld [vmem:[#allocation14 + $0x894] ss:$28 sps:$4 sm:$0xff]  }
 0x3c5   :  { %5679 = vmatprep.subr.bf16.mxu1 %v7600_v20  ;;  %5851 = vmatprep.subr.bf16.mxu0 %v7603_v23  ;;  %v7676_v20 = vld [vmem:[#allocation14 + $0x888] ss:$28 sps:$4 sm:$0xff]   ;;  %v7679_v23 = vld [vmem:[#allocation14 + $0x890] ss:$28 sps:$4 sm:$0xff]  }
 0x3c8   :  { %5680 = vmatpush1.bf16.msra.mxu1 %v7598_v24  ;;  %5852 = vmatpush1.bf16.msra.mxu0 %v7601_v37  ;;  %v7684_v24 = vld [vmem:[#allocation14 + $0x8c4] ss:$28 sps:$4 sm:$0xff]   ;;  %v7687_v37 = vld [vmem:[#allocation14 + $0x8cc] ss:$28 sps:$4 sm:$0xff]  }
 0x3c9   :  { %5681 = vmatprep.subr.bf16.mxu1 %v7606_v25  ;;  %5853 = vmatprep.subr.bf16.mxu0 %v7609_v53  ;;  %v7682_v25 = vld [vmem:[#allocation14 + $0x8c0] ss:$28 sps:$4 sm:$0xff]   ;;  %v7685_v53 = vld [vmem:[#allocation14 + $0x8c8] ss:$28 sps:$4 sm:$0xff]  }
 0x3cc   :  { %5682 = vmatpush1.bf16.msra.mxu1 %v7604_v26  ;;  %5854 = vmatpush1.bf16.msra.mxu0 %v7607_v27  ;;  %v7690_v26 = vld [vmem:[#allocation14 + $0x8fc] ss:$28 sps:$4 sm:$0xff]   ;;  %v7693_v27 = vld [vmem:[#allocation14 + $0x904] ss:$28 sps:$4 sm:$0xff]  }
 0x3cd   :  { %5683 = vmatprep.subr.bf16.mxu1 %v7612_v28  ;;  %5855 = vmatprep.subr.bf16.mxu0 %v7615_v29  ;;  %v7688_v28 = vld [vmem:[#allocation14 + $0x8f8] ss:$28 sps:$4 sm:$0xff]   ;;  %v7691_v29 = vld [vmem:[#allocation14 + $0x900] ss:$28 sps:$4 sm:$0xff]  }
 0x3d0   :  { %5684 = vmatpush1.bf16.msra.mxu1 %v7610_v30  ;;  %5856 = vmatpush1.bf16.msra.mxu0 %v7613_v31  ;;  %v7696_v30 = vld [vmem:[#allocation14 + $0x934] ss:$28 sps:$4 sm:$0xff]   ;;  %v7699_v31 = vld [vmem:[#allocation14 + $0x93c] ss:$28 sps:$4 sm:$0xff]  }
 0x3d1   :  { %5685 = vmatprep.subr.bf16.mxu1 %v7618_v15  ;;  %5857 = vmatprep.subr.bf16.mxu0 %v7621_v16  ;;  %v7694_v15 = vld [vmem:[#allocation14 + $0x930] ss:$28 sps:$4 sm:$0xff]   ;;  %v7697_v16 = vld [vmem:[#allocation14 + $0x938] ss:$28 sps:$4 sm:$0xff]  }
 0x3d4   :  { %5686 = vmatpush1.bf16.msra.mxu1 %v7616_v17  ;;  %5858 = vmatpush1.bf16.msra.mxu0 %v7619_v19  ;;  %v7702_v17 = vld [vmem:[#allocation14 + $0x96c] ss:$28 sps:$4 sm:$0xff]   ;;  %v7705_v19 = vld [vmem:[#allocation14 + $0x974] ss:$28 sps:$4 sm:$0xff]  }
 0x3d5   :  { %5687 = vmatprep.subr.bf16.mxu1 %v7624_v36  ;;  %5859 = vmatprep.subr.bf16.mxu0 %v7627_v38  ;;  %v7700_v36 = vld [vmem:[#allocation14 + $0x968] ss:$28 sps:$4 sm:$0xff]   ;;  %v7703_v38 = vld [vmem:[#allocation14 + $0x970] ss:$28 sps:$4 sm:$0xff]  }
 0x3d8   :  { %5688 = vmatpush1.bf16.msra.mxu1 %v7622_v39  ;;  %5860 = vmatpush1.bf16.msra.mxu0 %v7625_v41  ;;  %v7708_v39 = vld [vmem:[#allocation14 + $0x9a4] ss:$28 sps:$4 sm:$0xff]   ;;  %v7711_v41 = vld [vmem:[#allocation14 + $0x9ac] ss:$28 sps:$4 sm:$0xff]  }
 0x3d9   :  { %5689 = vmatprep.subr.bf16.mxu1 %v7630_v43  ;;  %5861 = vmatprep.subr.bf16.mxu0 %v7633_v44  ;;  %v7706_v43 = vld [vmem:[#allocation14 + $0x9a0] ss:$28 sps:$4 sm:$0xff]   ;;  %v7709_v44 = vld [vmem:[#allocation14 + $0x9a8] ss:$28 sps:$4 sm:$0xff]  }
 0x3dc   :  { %5690 = vmatpush1.bf16.msra.mxu1 %v7628_v45  ;;  %5862 = vmatpush1.bf16.msra.mxu0 %v7631_v46  ;;  %v7714_v45 = vld [vmem:[#allocation14 + $0x9dc] ss:$28 sps:$4 sm:$0xff]   ;;  %v7717_v46 = vld [vmem:[#allocation14 + $0x9e4] ss:$28 sps:$4 sm:$0xff]  }
 0x3dd   :  { %5702 = vmatprep.subr.bf16.mxu1 %v7636_v47  ;;  %5874 = vmatprep.subr.bf16.mxu0 %v7639_v48  ;;  %v1093_v47 = vsub.s32 4, %v8523_v34  ;;  %v1101_v48 = vsub.s32 6, %v8523_v34 }
 0x3df   :  { %5692 = vmatmul.mubr.bf16.vlgmr.msra.gmra.mrb[8].mxu1 %v8611_v22  ;;  %5864 = vmatmul.mubr.bf16.vlgmr.msra.gmra.mrb[20].mxu0 %v8611_v22 }
 0x3e0   :  { %5703 = vmatpush1.bf16.msra.mxu1 %v7634_v49  ;;  %5875 = vmatpush1.bf16.msra.mxu0 %v7637_v50  ;;  %v1097_v49 = vsub.s32 5, %v8523_v34  ;;  %v1105_v50 = vsub.s32 7, %v8523_v34 }
 0x3e1   :  { %5704 = vmatprep.subr.bf16.mxu1 %v7642_v51  ;;  %5876 = vmatprep.subr.bf16.mxu0 %v7645_v52  ;;  %v7712_v51 = vld [vmem:[#allocation14 + $0x9d8] ss:$28 sps:$4 sm:$0xff]   ;;  %v7715_v52 = vld [vmem:[#allocation14 + $0x9e0] ss:$28 sps:$4 sm:$0xff]  }
 0x3e4   :  { %5705 = vmatpush1.bf16.msra.mxu1 %v7640_v55  ;;  %5877 = vmatpush1.bf16.msra.mxu0 %v7643_v57  ;;  %v1094_v55 = vrot.slane %v8599_v3, %v1093_v47  ;;  %v7720_v57 = vld [vmem:[#allocation14 + $0xa14] ss:$28 sps:$4 sm:$0xff]  }
 0x3e5   :  { %5706 = vmatprep.subr.bf16.mxu1 %v7648_v58  ;;  %5878 = vmatprep.subr.bf16.mxu0 %v7651_v59  ;;  %v7723_v58 = vld [vmem:[#allocation14 + $0xa1c] ss:$28 sps:$4 sm:$0xff]   ;;  %v1102_v59 = vrot.slane %v8599_v3, %v1101_v48 }
 0x3e8   :  { %5707 = vmatpush1.bf16.msra.mxu1 %v7646_v60  ;;  %5879 = vmatpush1.bf16.msra.mxu0 %v7649_v61  ;;  %v1098_v60 = vrot.slane %v8599_v3, %v1097_v49  ;;  %v1106_v61 = vrot.slane %v8599_v3, %v1105_v50  ;;  %v7747_v50 = vld [vmem:[#allocation14 + $0xafc] ss:$28 sps:$4 sm:$0xff]  }
 0x3e9   :  { %5708 = vmatprep.subr.bf16.mxu1 %v7654_v62  ;;  %5880 = vmatprep.subr.bf16.mxu0 %v7657_v63  ;;  %v7718_v63 = vld [vmem:[#allocation14 + $0xa10] ss:$28 sps:$4 sm:$0xff]  }
 0x3ec   :  { %5709 = vmatpush1.bf16.msra.mxu1 %v7652_v0  ;;  %5881 = vmatpush1.bf16.msra.mxu0 %v7655_v9  ;;  %v7721_v0 = vld [vmem:[#allocation14 + $0xa18] ss:$28 sps:$4 sm:$0xff]  }
 0x3ed   :  { %5710 = vmatprep.subr.bf16.mxu1 %v7660_v1  ;;  %5882 = vmatprep.subr.bf16.mxu0 %v7663_v2 }
 0x3f0   :  { %5711 = vmatpush1.bf16.msra.mxu1 %v7658_v4  ;;  %5883 = vmatpush1.bf16.msra.mxu0 %v7661_v5  ;;  %v7726_v4 = vld [vmem:[#allocation14 + $0xa4c] ss:$28 sps:$4 sm:$0xff]   ;;  %v7729_v5 = vld [vmem:[#allocation14 + $0xa54] ss:$28 sps:$4 sm:$0xff]  }
 0x3f1   :  { %5712 = vmatprep.subr.bf16.mxu1 %v7666_v6  ;;  %5884 = vmatprep.subr.bf16.mxu0 %v7669_v7 }
 0x3f4   :  { %5713 = vmatpush1.bf16.msra.mxu1 %v7664_v10  ;;  %5885 = vmatpush1.bf16.msra.mxu0 %v7667_v11 }
 0x3f5   :  { %5714 = vmatprep.subr.bf16.mxu1 %v7672_v12  ;;  %5886 = vmatprep.subr.bf16.mxu0 %v7675_v32 }
 0x3f8   :  { %5715 = vmatpush1.bf16.msra.mxu1 %v7670_v8  ;;  %5887 = vmatpush1.bf16.msra.mxu0 %v7673_v13 }
 0x3f9   :  { %5716 = vmatprep.subr.bf16.mxu1 %v7678_v14  ;;  %5888 = vmatprep.subr.bf16.mxu0 %v7681_v18 }
 0x3fc   :  { %5717 = vmatpush1.bf16.msra.mxu1 %v7676_v20  ;;  %5889 = vmatpush1.bf16.msra.mxu0 %v7679_v23  ;;  %v7724_v20 = vld [vmem:[#allocation14 + $0xa48] ss:$28 sps:$4 sm:$0xff]   ;;  %v7727_v23 = vld [vmem:[#allocation14 + $0xa50] ss:$28 sps:$4 sm:$0xff]  }
 0x3fd   :  { %5718 = vmatprep.subr.bf16.mxu1 %v7684_v24  ;;  %5890 = vmatprep.subr.bf16.mxu0 %v7687_v37 }
 0x400   :  { %5719 = vmatpush1.bf16.msra.mxu1 %v7682_v25  ;;  %5891 = vmatpush1.bf16.msra.mxu0 %v7685_v53  ;;  %v7732_v53 = vld [vmem:[#allocation14 + $0xa84] ss:$28 sps:$4 sm:$0xff]  }
 0x401   :  { %5720 = vmatprep.subr.bf16.mxu1 %v7690_v26  ;;  %5892 = vmatprep.subr.bf16.mxu0 %v7693_v27  ;;  %v7735_v26 = vld [vmem:[#allocation14 + $0xa8c] ss:$28 sps:$4 sm:$0xff]  }
 0x404   :  { %5721 = vmatpush1.bf16.msra.mxu1 %v7688_v28  ;;  %5893 = vmatpush1.bf16.msra.mxu0 %v7691_v29 }
 0x405   :  { %5722 = vmatprep.subr.bf16.mxu1 %v7696_v30  ;;  %5894 = vmatprep.subr.bf16.mxu0 %v7699_v31 }
 0x408   :  { %5723 = vmatpush1.bf16.msra.mxu1 %v7694_v15  ;;  %5895 = vmatpush1.bf16.msra.mxu0 %v7697_v16 }
 0x409   :  { %5724 = vmatprep.subr.bf16.mxu1 %v7702_v17  ;;  %5896 = vmatprep.subr.bf16.mxu0 %v7705_v19 }
 0x40c   :  { %5725 = vmatpush1.bf16.msra.mxu1 %v7700_v36  ;;  %5897 = vmatpush1.bf16.msra.mxu0 %v7703_v38  ;;  %v7730_v36 = vld [vmem:[#allocation14 + $0xa80] ss:$28 sps:$4 sm:$0xff]   ;;  %v7733_v38 = vld [vmem:[#allocation14 + $0xa88] ss:$28 sps:$4 sm:$0xff]  }
 0x40d   :  { %5726 = vmatprep.subr.bf16.mxu1 %v7708_v39  ;;  %5898 = vmatprep.subr.bf16.mxu0 %v7711_v41  ;;  %v7738_v41 = vld [vmem:[#allocation14 + $0xabc] ss:$28 sps:$4 sm:$0xff]  }
 0x410   :  { %5727 = vmatpush1.bf16.msra.mxu1 %v7706_v43  ;;  %5899 = vmatpush1.bf16.msra.mxu0 %v7709_v44  ;;  %v7741_v43 = vld [vmem:[#allocation14 + $0xac4] ss:$28 sps:$4 sm:$0xff]   ;;  %v7736_v44 = vld [vmem:[#allocation14 + $0xab8] ss:$28 sps:$4 sm:$0xff]  }
 0x411   :  { %5728 = vmatprep.subr.bf16.mxu1 %v7714_v45  ;;  %5900 = vmatprep.subr.bf16.mxu0 %v7717_v46  ;;  %v7739_v45 = vld [vmem:[#allocation14 + $0xac0] ss:$28 sps:$4 sm:$0xff]   ;;  %v7744_v46 = vld [vmem:[#allocation14 + $0xaf4] ss:$28 sps:$4 sm:$0xff]  }
 0x414   :  { %5729 = vmatpush1.bf16.msra.mxu1 %v7712_v51  ;;  %5901 = vmatpush1.bf16.msra.mxu0 %v7715_v52  ;;  %v2644_v62 = vpop.f32.mrb[4].mxu1  ;;  %v7742_v51 = vld [vmem:[#allocation14 + $0xaf0] ss:$28 sps:$4 sm:$0xff]   ;;  %v7745_v52 = vld [vmem:[#allocation14 + $0xaf8] ss:$28 sps:$4 sm:$0xff]  }
 0x415   :  { %v7226_v9 = vadd.f32 %v2644_v62, %v1094_v55  ;;  %v2730_v1 = vpop.f32.mrb[16].mxu0  ;;  %v2646_v2 = vpop.f32.mrb[5].mxu1  ;;  %5730 = vmatprep.subr.bf16.mxu1 %v7720_v57  ;;  %5902 = vmatprep.subr.bf16.mxu0 %v7723_v58  ;;  %v7753_v57 = vld [vmem:[#allocation14 + $0xb34] ss:$28 sps:$4 sm:$0xff]   ;;  %v7748_v58 = vld [vmem:[#allocation14 + $0xb28] ss:$28 sps:$4 sm:$0xff]  }
 0x416   :  { %v7230_v6 = vadd.f32 %v2730_v1, %v1102_v59  ;;  %v7227_v7 = vadd.f32 %v2646_v2, %v1098_v60  ;;  %v2732_v10 = vpop.f32.mrb[17].mxu0  ;;  %v2648_v11 = vpop.f32.mrb[6].mxu1  ;;  %v7754_v62 = vld [vmem:[#allocation14 + $0xb60] ss:$28 sps:$4 sm:$0xff]   ;;  %v7760_v1 = vld [vmem:[#allocation14 + $0xb98] ss:$28 sps:$4 sm:$0xff]  }
 0x417   :  { %v7231_v12 = vadd.f32 %v2732_v10, %v1106_v61  ;;  %v7228_v32 = vadd.f32 %v2648_v11, %v1094_v55  ;;  %v2734_v8 = vpop.f32.mrb[18].mxu0  ;;  %v2650_v3 = vpop.f32.mrb[7].mxu1  ;;  %v2743_v24 = vmax.f32 %v7226_v9, 0.0  ;;  %v7750_v55 = vld [vmem:[#allocation14 + $0xb2c] ss:$28 sps:$4 sm:$0xff]  }
 0x418   :  { %v7232_v13 = vadd.f32 %v2734_v8, %v1102_v59  ;;  %v7229_v14 = vadd.f32 %v2650_v3, %v1098_v60  ;;  %v2736_v18 = vpop.f32.mrb[19].mxu0  ;;  %5731 = vmatpush1.bf16.msra.mxu1 %v7718_v63  ;;  %5903 = vmatpush1.bf16.msra.mxu0 %v7721_v0  ;;  %v2745_v27 = vmax.f32 %v7230_v6, 0.0  ;;  %v2744_v28 = vmax.f32 %v7227_v7, 0.0  ;;  %v7751_v59 = vld [vmem:[#allocation14 + $0xb30] ss:$28 sps:$4 sm:$0xff]  }
 0x419   :  { %v2751_v37 = vmax.f32 %v7228_v32, 0.0  ;;  %v7233_v25 = vadd.f32 %v2736_v18, %v1106_v61  ;;  %5732 = vmatprep.subr.bf16.mxu1 %v7726_v4  ;;  %5904 = vmatprep.subr.bf16.mxu0 %v7729_v5  ;;  %v2746_v31 = vmax.f32 %v7231_v12, 0.0  ;;  %v7756_v60 = vld [vmem:[#allocation14 + $0xb64] ss:$28 sps:$4 sm:$0xff]   ;;  %v7759_v61 = vld [vmem:[#allocation14 + $0xb6c] ss:$28 sps:$4 sm:$0xff]  }
 0x41a   :  { %v2753_v29 = vmax.f32 %v7232_v13, 0.0  ;;  %v2752_v30 = vmax.f32 %v7229_v14, 0.0  ;;  %v7757_v63 = vld [vmem:[#allocation14 + $0xb68] ss:$28 sps:$4 sm:$0xff]   ;;  %v7762_v0 = vld [vmem:[#allocation14 + $0xb9c] ss:$28 sps:$4 sm:$0xff]  }
 0x41b   :  { %v8639_v15 = vpack.c.bf16 %v2751_v37, %v2743_v24  ;;  %v2754_v16 = vmax.f32 %v7233_v25, 0.0  ;;  %v7765_v9 = vld [vmem:[#allocation14 + $0xba4] ss:$28 sps:$4 sm:$0xff]   ;;  %v7768_v4 = vld [vmem:[#allocation14 + $0xbd4] ss:$28 sps:$4 sm:$0xff]  }
 0x41c   :  { %v8641_v17 = vpack.c.bf16 %v2753_v29, %v2745_v27  ;;  %v8643_v19 = vpack.c.bf16 %v2752_v30, %v2744_v28  ;;  %5733 = vmatpush1.bf16.msra.mxu1 %v7724_v20  ;;  %5905 = vmatpush1.bf16.msra.mxu0 %v7727_v23  ;;  %v7763_v2 = vld [vmem:[#allocation14 + $0xba0] ss:$28 sps:$4 sm:$0xff]   ;;  %v7766_v6 = vld [vmem:[#allocation14 + $0xbd0] ss:$28 sps:$4 sm:$0xff]   ;;  %v7769_v7 = vld [vmem:[#allocation14 + $0xbd8] ss:$28 sps:$4 sm:$0xff]  }
 0x41d   :  { %v8645_v39 = vpack.c.bf16 %v2754_v16, %v2746_v31  ;;  %5745 = vmatprep.subr.bf16.mxu1 %v7732_v53  ;;  %5917 = vmatprep.subr.bf16.mxu0 %v7735_v26  ;;  %v7771_v5 = vld [vmem:[#allocation14 + $0xbdc] ss:$28 sps:$4 sm:$0xff]   ;;  %v7774_v10 = vld [vmem:[#allocation14 + $0xc0c] ss:$28 sps:$4 sm:$0xff]   ;;  %v7777_v11 = vld [vmem:[#allocation14 + $0xc14] ss:$28 sps:$4 sm:$0xff]  }
 0x41e   :  { %5734 = vmatprep.mubr.bf16.mxu1 %v8643_v19  ;;  %5906 = vmatprep.mubr.bf16.mxu0 %v8643_v19  ;;  %v7772_v12 = vld [vmem:[#allocation14 + $0xc08] ss:$28 sps:$4 sm:$0xff]   ;;  %v7775_v32 = vld [vmem:[#allocation14 + $0xc10] ss:$28 sps:$4 sm:$0xff]   ;;  %v7778_v13 = vld [vmem:[#allocation14 + $0xc40] ss:$28 sps:$4 sm:$0xff]  }
 0x41f   :  { %5735 = vmatmul.mubr.bf16.vlgmr.msra.gmra.mrb[8].mxu1 %v8639_v15  ;;  %5907 = vmatmul.mubr.bf16.vlgmr.msra.gmra.mrb[20].mxu0 %v8639_v15  ;;  %v7780_v8 = vld [vmem:[#allocation14 + $0xc44] ss:$28 sps:$4 sm:$0xff]   ;;  %v7783_v3 = vld [vmem:[#allocation14 + $0xc4c] ss:$28 sps:$4 sm:$0xff]   ;;  %v7786_v18 = vld [vmem:[#allocation14 + $0xc7c] ss:$28 sps:$4 sm:$0xff]  }
 0x420   :  { %5746 = vmatpush1.bf16.msra.mxu1 %v7730_v36  ;;  %5918 = vmatpush1.bf16.msra.mxu0 %v7733_v38  ;;  %v7781_v14 = vld [vmem:[#allocation14 + $0xc48] ss:$28 sps:$4 sm:$0xff]   ;;  %v7784_v23 = vld [vmem:[#allocation14 + $0xc78] ss:$28 sps:$4 sm:$0xff]   ;;  %v7787_v24 = vld [vmem:[#allocation14 + $0xc80] ss:$28 sps:$4 sm:$0xff]  }
 0x421   :  { %5777 = vmatprep.mubr.bf16.mxu1 %v8645_v39  ;;  %5949 = vmatprep.mubr.bf16.mxu0 %v8645_v39  ;;  %v7789_v20 = vld [vmem:[#allocation14 + $0xc84] ss:$28 sps:$4 sm:$0xff]   ;;  %v7792_v37 = vld [vmem:[#allocation14 + $0xcb4] ss:$28 sps:$4 sm:$0xff]   ;;  %v7795_v25 = vld [vmem:[#allocation14 + $0xcbc] ss:$28 sps:$4 sm:$0xff]  }
 0x422   :  { %5747 = vmatprep.subr.bf16.mxu1 %v7738_v41  ;;  %5919 = vmatprep.subr.bf16.mxu0 %v7741_v43  ;;  %v7790_v53 = vld [vmem:[#allocation14 + $0xcb0] ss:$28 sps:$4 sm:$0xff]   ;;  %v7793_v26 = vld [vmem:[#allocation14 + $0xcb8] ss:$28 sps:$4 sm:$0xff]   ;;  %v7796_v29 = vld [vmem:[#allocation14 + $0xce8] ss:$28 sps:$4 sm:$0xff]  }
 0x423   :  { %v7798_v27 = vld [vmem:[#allocation14 + $0xcec] ss:$28 sps:$4 sm:$0xff]   ;;  %v7801_v28 = vld [vmem:[#allocation14 + $0xcf4] ss:$28 sps:$4 sm:$0xff]   ;;  %v7804_v31 = vld [vmem:[#allocation14 + $0xd24] ss:$28 sps:$4 sm:$0xff]  }
 0x424   :  { %5748 = vmatpush1.bf16.msra.mxu1 %v7736_v44  ;;  %5920 = vmatpush1.bf16.msra.mxu0 %v7739_v45  ;;  %v7799_v30 = vld [vmem:[#allocation14 + $0xcf0] ss:$28 sps:$4 sm:$0xff]   ;;  %v7802_v36 = vld [vmem:[#allocation14 + $0xd20] ss:$28 sps:$4 sm:$0xff]   ;;  %v7805_v38 = vld [vmem:[#allocation14 + $0xd28] ss:$28 sps:$4 sm:$0xff]  }
 0x425   :  { %5749 = vmatprep.subr.bf16.mxu1 %v7744_v46  ;;  %5921 = vmatprep.subr.bf16.mxu0 %v7747_v50  ;;  %v7807_v16 = vld [vmem:[#allocation14 + $0xd2c] ss:$28 sps:$4 sm:$0xff]   ;;  %v7810_v41 = vld [vmem:[#allocation14 + $0xd5c] ss:$28 sps:$4 sm:$0xff]   ;;  %v7813_v43 = vld [vmem:[#allocation14 + $0xd64] ss:$28 sps:$4 sm:$0xff]  }
 0x426   :  { %v7808_v44 = vld [vmem:[#allocation14 + $0xd58] ss:$28 sps:$4 sm:$0xff]   ;;  %v7811_v45 = vld [vmem:[#allocation14 + $0xd60] ss:$28 sps:$4 sm:$0xff]  }
 0x427   :  { %v7816_v46 = vld [vmem:[#allocation14 + $0xd94] ss:$28 sps:$4 sm:$0xff]   ;;  %v7819_v50 = vld [vmem:[#allocation14 + $0xd9c] ss:$28 sps:$4 sm:$0xff]  }
 0x428   :  { %5750 = vmatpush1.bf16.msra.mxu1 %v7742_v51  ;;  %5922 = vmatpush1.bf16.msra.mxu0 %v7745_v52  ;;  %v7814_v51 = vld [vmem:[#allocation14 + $0xd90] ss:$28 sps:$4 sm:$0xff]   ;;  %v7817_v52 = vld [vmem:[#allocation14 + $0xd98] ss:$28 sps:$4 sm:$0xff]  }
 0x429   :  { %5751 = vmatprep.subr.bf16.mxu1 %v7750_v55  ;;  %5923 = vmatprep.subr.bf16.mxu0 %v7753_v57  ;;  %v7822_v55 = vld [vmem:[#allocation14 + $0xdcc] ss:$28 sps:$4 sm:$0xff]   ;;  %v7825_v57 = vld [vmem:[#allocation14 + $0xdd4] ss:$28 sps:$4 sm:$0xff]  }
 0x42c   :  { %5752 = vmatpush1.bf16.msra.mxu1 %v7748_v58  ;;  %5924 = vmatpush1.bf16.msra.mxu0 %v7751_v59  ;;  %v7820_v58 = vld [vmem:[#allocation14 + $0xdc8] ss:$28 sps:$4 sm:$0xff]   ;;  %v7823_v59 = vld [vmem:[#allocation14 + $0xdd0] ss:$28 sps:$4 sm:$0xff]  }
 0x42d   :  { %5753 = vmatprep.subr.bf16.mxu1 %v7756_v60  ;;  %5925 = vmatprep.subr.bf16.mxu0 %v7759_v61  ;;  %v7828_v60 = vld [vmem:[#allocation14 + $0x14] ss:$28 sps:$4 sm:$0xff]  }
 0x42e   :  { %v7829_v61 = vld [vmem:[#allocation14 + $0x1d8] ss:$28 sps:$4 sm:$0xff]  }
 0x430   :  { %5754 = vmatpush1.bf16.msra.mxu1 %v7754_v62  ;;  %5926 = vmatpush1.bf16.msra.mxu0 %v7757_v63  ;;  %v7826_v62 = vld [vmem:[#allocation14 + $0x10] ss:$28 sps:$4 sm:$0xff]   ;;  %v7830_v63 = vld [vmem:[#allocation14 + $0x18] ss:$28 sps:$4 sm:$0xff]  }
 0x431   :  { %5755 = vmatprep.subr.bf16.mxu1 %v7762_v0  ;;  %5927 = vmatprep.subr.bf16.mxu0 %v7765_v9  ;;  %v7833_v0 = vld [vmem:[#allocation14 + $0x4c] ss:$28 sps:$4 sm:$0xff]  }
 0x432   :  { %v7834_v9 = vld [vmem:[#allocation14 + $0x210] ss:$28 sps:$4 sm:$0xff]  }
 0x434   :  { %5756 = vmatpush1.bf16.msra.mxu1 %v7760_v1  ;;  %5928 = vmatpush1.bf16.msra.mxu0 %v7763_v2  ;;  %v7831_v1 = vld [vmem:[#allocation14 + $0x48] ss:$28 sps:$4 sm:$0xff]   ;;  %v7835_v2 = vld [vmem:[#allocation14 + $0x50] ss:$28 sps:$4 sm:$0xff]  }
 0x435   :  { %5757 = vmatprep.subr.bf16.mxu1 %v7768_v4  ;;  %5929 = vmatprep.subr.bf16.mxu0 %v7771_v5  ;;  %v7838_v4 = vld [vmem:[#allocation14 + $0x84] ss:$28 sps:$4 sm:$0xff]  }
 0x436   :  { %v7839_v5 = vld [vmem:[#allocation14 + $0x248] ss:$28 sps:$4 sm:$0xff]  }
 0x438   :  { %5758 = vmatpush1.bf16.msra.mxu1 %v7766_v6  ;;  %5930 = vmatpush1.bf16.msra.mxu0 %v7769_v7  ;;  %v7836_v6 = vld [vmem:[#allocation14 + $0x80] ss:$28 sps:$4 sm:$0xff]   ;;  %v7840_v7 = vld [vmem:[#allocation14 + $0x88] ss:$28 sps:$4 sm:$0xff]  }
 0x439   :  { %5759 = vmatprep.subr.bf16.mxu1 %v7774_v10  ;;  %5931 = vmatprep.subr.bf16.mxu0 %v7777_v11  ;;  %v7843_v10 = vld [vmem:[#allocation14 + $0xbc] ss:$28 sps:$4 sm:$0xff]  }
 0x43a   :  { %v7844_v11 = vld [vmem:[#allocation14 + $0x280] ss:$28 sps:$4 sm:$0xff]  }
 0x43c   :  { %5760 = vmatpush1.bf16.msra.mxu1 %v7772_v12  ;;  %5932 = vmatpush1.bf16.msra.mxu0 %v7775_v32  ;;  %v7841_v12 = vld [vmem:[#allocation14 + $0xb8] ss:$28 sps:$4 sm:$0xff]   ;;  %v7845_v32 = vld [vmem:[#allocation14 + $0xc0] ss:$28 sps:$4 sm:$0xff]  }
 0x43d   :  { %5761 = vmatprep.subr.bf16.mxu1 %v7780_v8  ;;  %5933 = vmatprep.subr.bf16.mxu0 %v7783_v3  ;;  %v7848_v8 = vld [vmem:[#allocation14 + $0xf4] ss:$28 sps:$4 sm:$0xff]  }
 0x43e   :  { %v7846_v3 = vld [vmem:[#allocation14 + $0xf0] ss:$28 sps:$4 sm:$0xff]  }
 0x440   :  { %5762 = vmatpush1.bf16.msra.mxu1 %v7778_v13  ;;  %5934 = vmatpush1.bf16.msra.mxu0 %v7781_v14  ;;  %v7850_v13 = vld [vmem:[#allocation14 + $0xf8] ss:$28 sps:$4 sm:$0xff]   ;;  %v7853_v14 = vld [vmem:[#allocation14 + $0x12c] ss:$28 sps:$4 sm:$0xff]  }
 0x441   :  { %5763 = vmatprep.subr.bf16.mxu1 %v7786_v18  ;;  %5935 = vmatprep.subr.bf16.mxu0 %v7789_v20  ;;  %v7854_v18 = vld [vmem:[#allocation14 + $0x2f0] ss:$28 sps:$4 sm:$0xff]   ;;  %v7851_v20 = vld [vmem:[#allocation14 + $0x128] ss:$28 sps:$4 sm:$0xff]  }
 0x444   :  { %5764 = vmatpush1.bf16.msra.mxu1 %v7784_v23  ;;  %5936 = vmatpush1.bf16.msra.mxu0 %v7787_v24  ;;  %v7855_v23 = vld [vmem:[#allocation14 + $0x130] ss:$28 sps:$4 sm:$0xff]   ;;  %v7858_v24 = vld [vmem:[#allocation14 + $0x164] ss:$28 sps:$4 sm:$0xff]  }
 0x445   :  { %5765 = vmatprep.subr.bf16.mxu1 %v7792_v37  ;;  %5937 = vmatprep.subr.bf16.mxu0 %v7795_v25  ;;  %v7859_v37 = vld [vmem:[#allocation14 + $0x328] ss:$28 sps:$4 sm:$0xff]   ;;  %v7856_v25 = vld [vmem:[#allocation14 + $0x160] ss:$28 sps:$4 sm:$0xff]  }
 0x448   :  { %5766 = vmatpush1.bf16.msra.mxu1 %v7790_v53  ;;  %5938 = vmatpush1.bf16.msra.mxu0 %v7793_v26  ;;  %v7860_v53 = vld [vmem:[#allocation14 + $0x168] ss:$28 sps:$4 sm:$0xff]   ;;  %v7863_v26 = vld [vmem:[#allocation14 + $0x19c] ss:$28 sps:$4 sm:$0xff]  }
 0x449   :  { %5767 = vmatprep.subr.bf16.mxu1 %v7798_v27  ;;  %5939 = vmatprep.subr.bf16.mxu0 %v7801_v28  ;;  %v7864_v27 = vld [vmem:[#allocation14 + $0x360] ss:$28 sps:$4 sm:$0xff]   ;;  %v7861_v28 = vld [vmem:[#allocation14 + $0x198] ss:$28 sps:$4 sm:$0xff]  }
 0x44c   :  { %5768 = vmatpush1.bf16.msra.mxu1 %v7796_v29  ;;  %5940 = vmatpush1.bf16.msra.mxu0 %v7799_v30  ;;  %v7865_v29 = vld [vmem:[#allocation14 + $0x1a0] ss:$28 sps:$4 sm:$0xff]   ;;  %v7868_v30 = vld [vmem:[#allocation14 + $0x1d4] ss:$28 sps:$4 sm:$0xff]  }
 0x44d   :  { %5769 = vmatprep.subr.bf16.mxu1 %v7804_v31  ;;  %5941 = vmatprep.subr.bf16.mxu0 %v7807_v16  ;;  %v7869_v31 = vld [vmem:[#allocation14 + $0x558] ss:$28 sps:$4 sm:$0xff]   ;;  %v7866_v16 = vld [vmem:[#allocation14 + $0x1d0] ss:$28 sps:$4 sm:$0xff]  }
 0x450   :  { %5770 = vmatpush1.bf16.msra.mxu1 %v7802_v36  ;;  %5942 = vmatpush1.bf16.msra.mxu0 %v7805_v38  ;;  %v7870_v36 = vld [vmem:[#allocation14 + $0x398] ss:$28 sps:$4 sm:$0xff]   ;;  %v7873_v38 = vld [vmem:[#allocation14 + $0x20c] ss:$28 sps:$4 sm:$0xff]  }
 0x451   :  { %5771 = vmatprep.subr.bf16.mxu1 %v7810_v41  ;;  %5943 = vmatprep.subr.bf16.mxu0 %v7813_v43  ;;  %v7874_v41 = vld [vmem:[#allocation14 + $0x590] ss:$28 sps:$4 sm:$0xff]   ;;  %v7871_v43 = vld [vmem:[#allocation14 + $0x208] ss:$28 sps:$4 sm:$0xff]  }
 0x454   :  { %5772 = vmatpush1.bf16.msra.mxu1 %v7808_v44  ;;  %5944 = vmatpush1.bf16.msra.mxu0 %v7811_v45  ;;  %v7875_v44 = vld [vmem:[#allocation14 + $0x3d0] ss:$28 sps:$4 sm:$0xff]   ;;  %v7878_v45 = vld [vmem:[#allocation14 + $0x244] ss:$28 sps:$4 sm:$0xff]  }
 0x455   :  { %5773 = vmatprep.subr.bf16.mxu1 %v7816_v46  ;;  %5945 = vmatprep.subr.bf16.mxu0 %v7819_v50  ;;  %v7879_v46 = vld [vmem:[#allocation14 + $0x5c8] ss:$28 sps:$4 sm:$0xff]   ;;  %v7876_v50 = vld [vmem:[#allocation14 + $0x240] ss:$28 sps:$4 sm:$0xff]  }
 0x458   :  { %5774 = vmatpush1.bf16.msra.mxu1 %v7814_v51  ;;  %5946 = vmatpush1.bf16.msra.mxu0 %v7817_v52  ;;  %v7880_v51 = vld [vmem:[#allocation14 + $0x408] ss:$28 sps:$4 sm:$0xff]   ;;  %v7883_v52 = vld [vmem:[#allocation14 + $0x27c] ss:$28 sps:$4 sm:$0xff]  }
 0x459   :  { %5775 = vmatprep.subr.bf16.mxu1 %v7822_v55  ;;  %5947 = vmatprep.subr.bf16.mxu0 %v7825_v57  ;;  %v7884_v55 = vld [vmem:[#allocation14 + $0x600] ss:$28 sps:$4 sm:$0xff]   ;;  %v7881_v57 = vld [vmem:[#allocation14 + $0x278] ss:$28 sps:$4 sm:$0xff]  }
 0x45c   :  { %5776 = vmatpush1.bf16.msra.mxu1 %v7820_v58  ;;  %5948 = vmatpush1.bf16.msra.mxu0 %v7823_v59  ;;  %v7885_v58 = vld [vmem:[#allocation14 + $0x440] ss:$28 sps:$4 sm:$0xff]   ;;  %v7888_v59 = vld [vmem:[#allocation14 + $0x2b4] ss:$28 sps:$4 sm:$0xff]  }
 0x45d   :  { %5960 = vmatprep.subr.bf16.mxu1 %v7828_v60  ;;  %7130 = vmatprep.subr.bf16.mxu0 %v7829_v61  ;;  %v7889_v60 = vld [vmem:[#allocation14 + $0x638] ss:$28 sps:$4 sm:$0xff]   ;;  %v7886_v61 = vld [vmem:[#allocation14 + $0x2b0] ss:$28 sps:$4 sm:$0xff]  }
 0x45f   :  { %5778 = vmatmul.mubr.bf16.vlgmr.msra.gmra.mrb[8].mxu1 %v8641_v17  ;;  %5950 = vmatmul.mubr.bf16.vlgmr.msra.gmra.mrb[20].mxu0 %v8641_v17 }
 0x460   :  { %5961 = vmatpush1.bf16.msra.mxu1 %v7826_v62  ;;  %5992 = vmatprep.mubr.bf16.mxu1 %v8613_v33  ;;  %v7890_v62 = vld [vmem:[#allocation14 + $0x478] ss:$28 sps:$4 sm:$0xff]  }
 0x461   :  { %7131 = vmatpush3.bf16.msra.mxu0 %v7830_v63  ;;  %6164 = vmatprep.mubr.bf16.mxu0 %v8613_v33  ;;  %v7849_v33 = vld [vmem:[#allocation14 + $0x2b8] ss:$28 sps:$4 sm:$0xff]   ;;  %v7893_v63 = vld [vmem:[#allocation14 + $0x2ec] ss:$28 sps:$4 sm:$0xff]  }
 0x462   :  { %5962 = vmatprep.subr.bf16.mxu1 %v7833_v0  ;;  %7132 = vmatprep.subr.bf16.mxu0 %v7834_v9  ;;  %v7894_v0 = vld [vmem:[#allocation14 + $0x670] ss:$28 sps:$4 sm:$0xff]   ;;  %v7891_v9 = vld [vmem:[#allocation14 + $0x2e8] ss:$28 sps:$4 sm:$0xff]  }
 0x464   :  { %5963 = vmatpush1.bf16.msra.mxu1 %v7831_v1  ;;  %v7895_v1 = vld [vmem:[#allocation14 + $0x4b0] ss:$28 sps:$4 sm:$0xff]  }
 0x465   :  { %7133 = vmatpush3.bf16.msra.mxu0 %v7835_v2  ;;  %5964 = vmatprep.subr.bf16.mxu1 %v7838_v4  ;;  %v7898_v2 = vld [vmem:[#allocation14 + $0x324] ss:$28 sps:$4 sm:$0xff]  }
 0x466   :  { %7134 = vmatprep.subr.bf16.mxu0 %v7839_v5  ;;  %v7899_v4 = vld [vmem:[#allocation14 + $0x6a8] ss:$28 sps:$4 sm:$0xff]   ;;  %v7896_v5 = vld [vmem:[#allocation14 + $0x320] ss:$28 sps:$4 sm:$0xff]  }
 0x468   :  { %5965 = vmatpush1.bf16.msra.mxu1 %v7836_v6  ;;  %v7900_v6 = vld [vmem:[#allocation14 + $0x4e8] ss:$28 sps:$4 sm:$0xff]  }
 0x469   :  { %7135 = vmatpush3.bf16.msra.mxu0 %v7840_v7  ;;  %5966 = vmatprep.subr.bf16.mxu1 %v7843_v10  ;;  %v7903_v7 = vld [vmem:[#allocation14 + $0x35c] ss:$28 sps:$4 sm:$0xff]  }
 0x46a   :  { %7136 = vmatprep.subr.bf16.mxu0 %v7844_v11  ;;  %v7904_v10 = vld [vmem:[#allocation14 + $0x6e0] ss:$28 sps:$4 sm:$0xff]   ;;  %v7901_v11 = vld [vmem:[#allocation14 + $0x358] ss:$28 sps:$4 sm:$0xff]  }
 0x46c   :  { %5967 = vmatpush1.bf16.msra.mxu1 %v7841_v12  ;;  %v7905_v12 = vld [vmem:[#allocation14 + $0x520] ss:$28 sps:$4 sm:$0xff]  }
 0x46d   :  { %7137 = vmatpush3.bf16.msra.mxu0 %v7845_v32  ;;  %5968 = vmatprep.subr.bf16.mxu1 %v7848_v8  ;;  %v7908_v32 = vld [vmem:[#allocation14 + $0x394] ss:$28 sps:$4 sm:$0xff]  }
 0x46e   :  { %7138 = vmatprep.subr.bf16.mxu0 %v7849_v33  ;;  %v7909_v8 = vld [vmem:[#allocation14 + $0x8d8] ss:$28 sps:$4 sm:$0xff]   ;;  %v7906_v33 = vld [vmem:[#allocation14 + $0x390] ss:$28 sps:$4 sm:$0xff]  }
 0x470   :  { %5969 = vmatpush1.bf16.msra.mxu1 %v7846_v3  ;;  %v7910_v3 = vld [vmem:[#allocation14 + $0x718] ss:$28 sps:$4 sm:$0xff]  }
 0x471   :  { %7139 = vmatpush3.bf16.msra.mxu0 %v7850_v13  ;;  %5970 = vmatprep.subr.bf16.mxu1 %v7853_v14  ;;  %v7913_v13 = vld [vmem:[#allocation14 + $0x3cc] ss:$28 sps:$4 sm:$0xff]  }
 0x472   :  { %7140 = vmatprep.subr.bf16.mxu0 %v7854_v18  ;;  %v7914_v14 = vld [vmem:[#allocation14 + $0x910] ss:$28 sps:$4 sm:$0xff]   ;;  %v7911_v18 = vld [vmem:[#allocation14 + $0x3c8] ss:$28 sps:$4 sm:$0xff]  }
 0x474   :  { %5971 = vmatpush1.bf16.msra.mxu1 %v7851_v20  ;;  %v7915_v20 = vld [vmem:[#allocation14 + $0x750] ss:$28 sps:$4 sm:$0xff]  }
 0x475   :  { %7141 = vmatpush3.bf16.msra.mxu0 %v7855_v23  ;;  %5972 = vmatprep.subr.bf16.mxu1 %v7858_v24  ;;  %v7918_v23 = vld [vmem:[#allocation14 + $0x404] ss:$28 sps:$4 sm:$0xff]  }
 0x476   :  { %7142 = vmatprep.subr.bf16.mxu0 %v7859_v37  ;;  %v7919_v24 = vld [vmem:[#allocation14 + $0x948] ss:$28 sps:$4 sm:$0xff]   ;;  %v7916_v37 = vld [vmem:[#allocation14 + $0x400] ss:$28 sps:$4 sm:$0xff]  }
 0x478   :  { %5973 = vmatpush1.bf16.msra.mxu1 %v7856_v25  ;;  %v7923_v25 = vld [vmem:[#allocation14 + $0x43c] ss:$28 sps:$4 sm:$0xff]  }
 0x479   :  { %7143 = vmatpush3.bf16.msra.mxu0 %v7860_v53  ;;  %5974 = vmatprep.subr.bf16.mxu1 %v7863_v26  ;;  %v7924_v53 = vld [vmem:[#allocation14 + $0x980] ss:$28 sps:$4 sm:$0xff]   ;;  %v7921_v26 = vld [vmem:[#allocation14 + $0x438] ss:$28 sps:$4 sm:$0xff]  }
 0x47a   :  { %7144 = vmatprep.subr.bf16.mxu0 %v7864_v27  ;;  %v7928_v27 = vld [vmem:[#allocation14 + $0x474] ss:$28 sps:$4 sm:$0xff]  }
 0x47c   :  { %5975 = vmatpush1.bf16.msra.mxu1 %v7861_v28  ;;  %v7929_v28 = vld [vmem:[#allocation14 + $0x9b8] ss:$28 sps:$4 sm:$0xff]  }
 0x47d   :  { %7145 = vmatpush3.bf16.msra.mxu0 %v7865_v29  ;;  %5976 = vmatprep.subr.bf16.mxu1 %v7868_v30  ;;  %v7926_v29 = vld [vmem:[#allocation14 + $0x470] ss:$28 sps:$4 sm:$0xff]   ;;  %v7930_v30 = vld [vmem:[#allocation14 + $0x7f8] ss:$28 sps:$4 sm:$0xff]  }
 0x47e   :  { %7152 = vmatprep.subr.bf16.mxu0 %v7869_v31  ;;  %v7933_v31 = vld [vmem:[#allocation14 + $0x4ac] ss:$28 sps:$4 sm:$0xff]  }
 0x480   :  { %6165 = vmatmul.mubr.bf16.vlgmr.msra.gmra.mrb[24].mxu0 %v8609_v21  ;;  %5977 = vmatpush1.bf16.msra.mxu1 %v7866_v16  ;;  %v7934_v16 = vld [vmem:[#allocation14 + $0x9f0] ss:$28 sps:$4 sm:$0xff]  }
 0x481   :  { %7153 = vmatpush3.bf16.msra.mxu0 %v7870_v36  ;;  %6205 = vmatprep.mubr.bf16.mxu0 %v8615_v35  ;;  %v7931_v36 = vld [vmem:[#allocation14 + $0x4a8] ss:$28 sps:$4 sm:$0xff]  }
 0x482   :  { %5978 = vmatprep.subr.bf16.mxu1 %v7873_v38  ;;  %7154 = vmatprep.subr.bf16.mxu0 %v7874_v41  ;;  %v7935_v38 = vld [vmem:[#allocation14 + $0x830] ss:$28 sps:$4 sm:$0xff]   ;;  %v7938_v41 = vld [vmem:[#allocation14 + $0x4e4] ss:$28 sps:$4 sm:$0xff]  }
 0x484   :  { %5979 = vmatpush1.bf16.msra.mxu1 %v7871_v43  ;;  %v7939_v43 = vld [vmem:[#allocation14 + $0xa28] ss:$28 sps:$4 sm:$0xff]  }
 0x485   :  { %7155 = vmatpush3.bf16.msra.mxu0 %v7875_v44  ;;  %5980 = vmatprep.subr.bf16.mxu1 %v7878_v45  ;;  %v7936_v44 = vld [vmem:[#allocation14 + $0x4e0] ss:$28 sps:$4 sm:$0xff]   ;;  %v7940_v45 = vld [vmem:[#allocation14 + $0x868] ss:$28 sps:$4 sm:$0xff]  }
 0x486   :  { %7156 = vmatprep.subr.bf16.mxu0 %v7879_v46  ;;  %v7943_v46 = vld [vmem:[#allocation14 + $0x51c] ss:$28 sps:$4 sm:$0xff]  }
 0x488   :  { %5981 = vmatpush1.bf16.msra.mxu1 %v7876_v50  ;;  %v7944_v50 = vld [vmem:[#allocation14 + $0xa60] ss:$28 sps:$4 sm:$0xff]  }
 0x489   :  { %7157 = vmatpush3.bf16.msra.mxu0 %v7880_v51  ;;  %5982 = vmatprep.subr.bf16.mxu1 %v7883_v52  ;;  %v7941_v51 = vld [vmem:[#allocation14 + $0x518] ss:$28 sps:$4 sm:$0xff]   ;;  %v7945_v52 = vld [vmem:[#allocation14 + $0x8a0] ss:$28 sps:$4 sm:$0xff]  }
 0x48a   :  { %7158 = vmatprep.subr.bf16.mxu0 %v7884_v55  ;;  %v7948_v55 = vld [vmem:[#allocation14 + $0x554] ss:$28 sps:$4 sm:$0xff]  }
 0x48c   :  { %5983 = vmatpush1.bf16.msra.mxu1 %v7881_v57  ;;  %v7949_v57 = vld [vmem:[#allocation14 + $0xc58] ss:$28 sps:$4 sm:$0xff]  }
 0x48d   :  { %7159 = vmatpush3.bf16.msra.mxu0 %v7885_v58  ;;  %5984 = vmatprep.subr.bf16.mxu1 %v7888_v59  ;;  %v7946_v58 = vld [vmem:[#allocation14 + $0x550] ss:$28 sps:$4 sm:$0xff]   ;;  %v7950_v59 = vld [vmem:[#allocation14 + $0xa98] ss:$28 sps:$4 sm:$0xff]  }
 0x48e   :  { %7160 = vmatprep.subr.bf16.mxu0 %v7889_v60  ;;  %v7953_v60 = vld [vmem:[#allocation14 + $0x58c] ss:$28 sps:$4 sm:$0xff]  }
 0x490   :  { %5985 = vmatpush1.bf16.msra.mxu1 %v7886_v61  ;;  %v7954_v61 = vld [vmem:[#allocation14 + $0xc90] ss:$28 sps:$4 sm:$0xff]  }
 0x491   :  { %7161 = vmatpush3.bf16.msra.mxu0 %v7890_v62  ;;  %5986 = vmatprep.subr.bf16.mxu1 %v7893_v63  ;;  %v7951_v62 = vld [vmem:[#allocation14 + $0x588] ss:$28 sps:$4 sm:$0xff]   ;;  %v7955_v63 = vld [vmem:[#allocation14 + $0xad0] ss:$28 sps:$4 sm:$0xff]  }
 0x492   :  { %7162 = vmatprep.subr.bf16.mxu0 %v7894_v0  ;;  %v7958_v0 = vld [vmem:[#allocation14 + $0x5c4] ss:$28 sps:$4 sm:$0xff]  }
 0x494   :  { %5987 = vmatpush1.bf16.msra.mxu1 %v7891_v9  ;;  %v7959_v9 = vld [vmem:[#allocation14 + $0xcc8] ss:$28 sps:$4 sm:$0xff]  }
 0x495   :  { %7163 = vmatpush3.bf16.msra.mxu0 %v7895_v1  ;;  %5988 = vmatprep.subr.bf16.mxu1 %v7898_v2  ;;  %v7956_v1 = vld [vmem:[#allocation14 + $0x5c0] ss:$28 sps:$4 sm:$0xff]   ;;  %v7960_v2 = vld [vmem:[#allocation14 + $0xb08] ss:$28 sps:$4 sm:$0xff]  }
 0x496   :  { %7164 = vmatprep.subr.bf16.mxu0 %v7899_v4  ;;  %v7963_v4 = vld [vmem:[#allocation14 + $0x5fc] ss:$28 sps:$4 sm:$0xff]  }
 0x498   :  { %5989 = vmatpush1.bf16.msra.mxu1 %v7896_v5  ;;  %v7964_v5 = vld [vmem:[#allocation14 + $0xd00] ss:$28 sps:$4 sm:$0xff]  }
 0x499   :  { %7165 = vmatpush3.bf16.msra.mxu0 %v7900_v6  ;;  %5990 = vmatprep.subr.bf16.mxu1 %v7903_v7  ;;  %v7961_v6 = vld [vmem:[#allocation14 + $0x5f8] ss:$28 sps:$4 sm:$0xff]   ;;  %v7965_v7 = vld [vmem:[#allocation14 + $0xb40] ss:$28 sps:$4 sm:$0xff]  }
 0x49a   :  { %7166 = vmatprep.subr.bf16.mxu0 %v7904_v10  ;;  %v7968_v10 = vld [vmem:[#allocation14 + $0x634] ss:$28 sps:$4 sm:$0xff]  }
 0x49c   :  { %5991 = vmatpush1.bf16.msra.mxu1 %v7901_v11  ;;  %v7969_v11 = vld [vmem:[#allocation14 + $0xd38] ss:$28 sps:$4 sm:$0xff]  }
 0x49d   :  { %7167 = vmatpush3.bf16.msra.mxu0 %v7905_v12  ;;  %6003 = vmatprep.subr.bf16.mxu1 %v7908_v32  ;;  %v7966_v12 = vld [vmem:[#allocation14 + $0x630] ss:$28 sps:$4 sm:$0xff]   ;;  %v7970_v32 = vld [vmem:[#allocation14 + $0xb78] ss:$28 sps:$4 sm:$0xff]  }
 0x49e   :  { %7174 = vmatprep.subr.bf16.mxu0 %v7909_v8  ;;  %v7973_v8 = vld [vmem:[#allocation14 + $0x66c] ss:$28 sps:$4 sm:$0xff]  }
 0x49f   :  { %5993 = vmatmul.mubr.bf16.vlgmr.msra.gmra.mrb[12].mxu1 %v8609_v21  ;;  %v7920_v21 = vld [vmem:[#allocation14 + $0x788] ss:$28 sps:$4 sm:$0xff]  }
 0x4a0   :  { %6206 = vmatmul.mubr.bf16.vlgmr.msra.gmra.mrb[28].mxu0 %v8611_v22  ;;  %6004 = vmatpush1.bf16.msra.mxu1 %v7906_v33  ;;  %v7974_v33 = vld [vmem:[#allocation14 + $0xd70] ss:$28 sps:$4 sm:$0xff]  }
 0x4a1   :  { %6035 = vmatprep.mubr.bf16.mxu1 %v8615_v35  ;;  %7175 = vmatpush3.bf16.msra.mxu0 %v7910_v3  ;;  %v7925_v35 = vld [vmem:[#allocation14 + $0x7c0] ss:$28 sps:$4 sm:$0xff]   ;;  %v7971_v3 = vld [vmem:[#allocation14 + $0x668] ss:$28 sps:$4 sm:$0xff]  }
 0x4a2   :  { %6246 = vmatprep.mubr.bf16.mxu0 %v8643_v19  ;;  %6005 = vmatprep.subr.bf16.mxu1 %v7913_v13  ;;  %v7975_v13 = vld [vmem:[#allocation14 + $0xbb0] ss:$28 sps:$4 sm:$0xff]  }
 0x4a3   :  { %7176 = vmatprep.subr.bf16.mxu0 %v7914_v14  ;;  %v7978_v14 = vld [vmem:[#allocation14 + $0x6a4] ss:$28 sps:$4 sm:$0xff]  }
 0x4a4   :  { %6006 = vmatpush1.bf16.msra.mxu1 %v7911_v18  ;;  %v7979_v18 = vld [vmem:[#allocation14 + $0xda8] ss:$28 sps:$4 sm:$0xff]  }
 0x4a5   :  { %7177 = vmatpush3.bf16.msra.mxu0 %v7915_v20  ;;  %6007 = vmatprep.subr.bf16.mxu1 %v7918_v23  ;;  %v7976_v20 = vld [vmem:[#allocation14 + $0x6a0] ss:$28 sps:$4 sm:$0xff]   ;;  %v7980_v23 = vld [vmem:[#allocation14 + $0xbe8] ss:$28 sps:$4 sm:$0xff]  }
 0x4a6   :  { %7178 = vmatprep.subr.bf16.mxu0 %v7919_v24  ;;  %v7983_v24 = vld [vmem:[#allocation14 + $0x6dc] ss:$28 sps:$4 sm:$0xff]  }
 0x4a8   :  { %6008 = vmatpush1.bf16.msra.mxu1 %v7916_v37  ;;  %v7984_v37 = vld [vmem:[#allocation14 + $0xde0] ss:$28 sps:$4 sm:$0xff]  }
 0x4a9   :  { %7179 = vmatpush3.bf16.msra.mxu0 %v7920_v21  ;;  %6009 = vmatprep.subr.bf16.mxu1 %v7923_v25  ;;  %v7981_v21 = vld [vmem:[#allocation14 + $0x6d8] ss:$28 sps:$4 sm:$0xff]   ;;  %v7985_v25 = vld [vmem:[#allocation14 + $0xc20] ss:$28 sps:$4 sm:$0xff]  }
 0x4aa   :  { %7180 = vmatprep.subr.bf16.mxu0 %v7924_v53  ;;  %v7988_v53 = vld [vmem:[#allocation14 + $0x714] ss:$28 sps:$4 sm:$0xff]  }
 0x4ac   :  { %6010 = vmatpush1.bf16.msra.mxu1 %v7921_v26  ;;  %v7986_v26 = vld [vmem:[#allocation14 + $0x710] ss:$28 sps:$4 sm:$0xff]  }
 0x4ad   :  { %7181 = vmatpush3.bf16.msra.mxu0 %v7925_v35  ;;  %6011 = vmatprep.subr.bf16.mxu1 %v7928_v27  ;;  %v7991_v35 = vld [vmem:[#allocation14 + $0x74c] ss:$28 sps:$4 sm:$0xff]  }
 0x4ae   :  { %7182 = vmatprep.subr.bf16.mxu0 %v7929_v28  ;;  %v7989_v27 = vld [vmem:[#allocation14 + $0x748] ss:$28 sps:$4 sm:$0xff]  }
 0x4af   :  { %v7994_v28 = vld [vmem:[#allocation14 + $0x784] ss:$28 sps:$4 sm:$0xff]  }
 0x4b0   :  { %6012 = vmatpush1.bf16.msra.mxu1 %v7926_v29  ;;  %v7992_v29 = vld [vmem:[#allocation14 + $0x780] ss:$28 sps:$4 sm:$0xff]  }
 0x4b1   :  { %7183 = vmatpush3.bf16.msra.mxu0 %v7930_v30  ;;  %6013 = vmatprep.subr.bf16.mxu1 %v7933_v31  ;;  %v7997_v30 = vld [vmem:[#allocation14 + $0x7bc] ss:$28 sps:$4 sm:$0xff]  }
 0x4b2   :  { %7184 = vmatprep.subr.bf16.mxu0 %v7934_v16  ;;  %v7995_v31 = vld [vmem:[#allocation14 + $0x7b8] ss:$28 sps:$4 sm:$0xff]  }
 0x4b3   :  { %v8000_v16 = vld [vmem:[#allocation14 + $0x7f4] ss:$28 sps:$4 sm:$0xff]  }
 0x4b4   :  { %6014 = vmatpush1.bf16.msra.mxu1 %v7931_v36  ;;  %v7998_v36 = vld [vmem:[#allocation14 + $0x7f0] ss:$28 sps:$4 sm:$0xff]  }
 0x4b5   :  { %7185 = vmatpush3.bf16.msra.mxu0 %v7935_v38  ;;  %6015 = vmatprep.subr.bf16.mxu1 %v7938_v41  ;;  %v8001_v38 = vld [vmem:[#allocation14 + $0x828] ss:$28 sps:$4 sm:$0xff]  }
 0x4b6   :  { %7186 = vmatprep.subr.bf16.mxu0 %v7939_v43  ;;  %v8006_v41 = vld [vmem:[#allocation14 + $0x864] ss:$28 sps:$4 sm:$0xff]   ;;  %v8009_v43 = vld [vmem:[#allocation14 + $0x89c] ss:$28 sps:$4 sm:$0xff]  }
 0x4b8   :  { %6016 = vmatpush1.bf16.msra.mxu1 %v7936_v44  ;;  %v8007_v44 = vld [vmem:[#allocation14 + $0x898] ss:$28 sps:$4 sm:$0xff]  }
 0x4b9   :  { %7187 = vmatpush3.bf16.msra.mxu0 %v7940_v45  ;;  %6017 = vmatprep.subr.bf16.mxu1 %v7943_v46  ;;  %v8012_v45 = vld [vmem:[#allocation14 + $0x8d4] ss:$28 sps:$4 sm:$0xff]  }
 0x4ba   :  { %7188 = vmatprep.subr.bf16.mxu0 %v7944_v50  ;;  %v8010_v46 = vld [vmem:[#allocation14 + $0x8d0] ss:$28 sps:$4 sm:$0xff]  }
 0x4bb   :  { %v8015_v50 = vld [vmem:[#allocation14 + $0x90c] ss:$28 sps:$4 sm:$0xff]  }
 0x4bc   :  { %6018 = vmatpush1.bf16.msra.mxu1 %v7941_v51  ;;  %v8013_v51 = vld [vmem:[#allocation14 + $0x908] ss:$28 sps:$4 sm:$0xff]  }
 0x4bd   :  { %7189 = vmatpush3.bf16.msra.mxu0 %v7945_v52  ;;  %6019 = vmatprep.subr.bf16.mxu1 %v7948_v55  ;;  %v8018_v52 = vld [vmem:[#allocation14 + $0x944] ss:$28 sps:$4 sm:$0xff]  }
 0x4be   :  { %7196 = vmatprep.subr.bf16.mxu0 %v7949_v57  ;;  %v8016_v55 = vld [vmem:[#allocation14 + $0x940] ss:$28 sps:$4 sm:$0xff]  }
 0x4bf   :  { %v8021_v57 = vld [vmem:[#allocation14 + $0x97c] ss:$28 sps:$4 sm:$0xff]  }
 0x4c0   :  { %6247 = vmatmul.mubr.bf16.vlgmr.msra.gmra.mrb[32].mxu0 %v8639_v15  ;;  %6020 = vmatpush1.bf16.msra.mxu1 %v7946_v58  ;;  %v8019_v58 = vld [vmem:[#allocation14 + $0x978] ss:$28 sps:$4 sm:$0xff]  }
 0x4c1   :  { %7197 = vmatpush3.bf16.msra.mxu0 %v7950_v59  ;;  %6287 = vmatprep.mubr.bf16.mxu0 %v8645_v39  ;;  %v8024_v59 = vld [vmem:[#allocation14 + $0x9b4] ss:$28 sps:$4 sm:$0xff]  }
 0x4c2   :  { %6021 = vmatprep.subr.bf16.mxu1 %v7953_v60  ;;  %7198 = vmatprep.subr.bf16.mxu0 %v7954_v61  ;;  %v8022_v60 = vld [vmem:[#allocation14 + $0x9b0] ss:$28 sps:$4 sm:$0xff]  }
 0x4c3   :  { %v8027_v61 = vld [vmem:[#allocation14 + $0x9ec] ss:$28 sps:$4 sm:$0xff]  }
 0x4c4   :  { %6022 = vmatpush1.bf16.msra.mxu1 %v7951_v62  ;;  %v8025_v62 = vld [vmem:[#allocation14 + $0x9e8] ss:$28 sps:$4 sm:$0xff]  }
 0x4c5   :  { %7199 = vmatpush3.bf16.msra.mxu0 %v7955_v63  ;;  %6023 = vmatprep.subr.bf16.mxu1 %v7958_v0  ;;  %v8030_v63 = vld [vmem:[#allocation14 + $0xa24] ss:$28 sps:$4 sm:$0xff]  }
 0x4c6   :  { %7200 = vmatprep.subr.bf16.mxu0 %v7959_v9  ;;  %v8028_v0 = vld [vmem:[#allocation14 + $0xa20] ss:$28 sps:$4 sm:$0xff]  }
 0x4c7   :  { %v8033_v9 = vld [vmem:[#allocation14 + $0xa5c] ss:$28 sps:$4 sm:$0xff]  }
 0x4c8   :  { %6024 = vmatpush1.bf16.msra.mxu1 %v7956_v1  ;;  %v8031_v1 = vld [vmem:[#allocation14 + $0xa58] ss:$28 sps:$4 sm:$0xff]  }
 0x4c9   :  { %7201 = vmatpush3.bf16.msra.mxu0 %v7960_v2  ;;  %6025 = vmatprep.subr.bf16.mxu1 %v7963_v4  ;;  %v8036_v2 = vld [vmem:[#allocation14 + $0xa94] ss:$28 sps:$4 sm:$0xff]  }
 0x4ca   :  { %7202 = vmatprep.subr.bf16.mxu0 %v7964_v5  ;;  %v8034_v4 = vld [vmem:[#allocation14 + $0xa90] ss:$28 sps:$4 sm:$0xff]  }
 0x4cb   :  { %v8039_v5 = vld [vmem:[#allocation14 + $0xacc] ss:$28 sps:$4 sm:$0xff]  }
 0x4cc   :  { %6026 = vmatpush1.bf16.msra.mxu1 %v7961_v6  ;;  %v8037_v6 = vld [vmem:[#allocation14 + $0xac8] ss:$28 sps:$4 sm:$0xff]  }
 0x4cd   :  { %7203 = vmatpush3.bf16.msra.mxu0 %v7965_v7  ;;  %6027 = vmatprep.subr.bf16.mxu1 %v7968_v10  ;;  %v8042_v7 = vld [vmem:[#allocation14 + $0xb04] ss:$28 sps:$4 sm:$0xff]  }
 0x4ce   :  { %7204 = vmatprep.subr.bf16.mxu0 %v7969_v11  ;;  %v8040_v10 = vld [vmem:[#allocation14 + $0xb00] ss:$28 sps:$4 sm:$0xff]  }
 0x4cf   :  { %v8045_v11 = vld [vmem:[#allocation14 + $0xb3c] ss:$28 sps:$4 sm:$0xff]  }
 0x4d0   :  { %6028 = vmatpush1.bf16.msra.mxu1 %v7966_v12  ;;  %v8043_v12 = vld [vmem:[#allocation14 + $0xb38] ss:$28 sps:$4 sm:$0xff]  }
 0x4d1   :  { %7205 = vmatpush3.bf16.msra.mxu0 %v7970_v32  ;;  %6029 = vmatprep.subr.bf16.mxu1 %v7973_v8  ;;  %v8048_v32 = vld [vmem:[#allocation14 + $0xb74] ss:$28 sps:$4 sm:$0xff]  }
 0x4d2   :  { %7206 = vmatprep.subr.bf16.mxu0 %v7974_v33  ;;  %v8046_v8 = vld [vmem:[#allocation14 + $0xb70] ss:$28 sps:$4 sm:$0xff]   ;;  %v8670_v33 = vld [vmem:[#allocation16] sm:$0xff] }
 0x4d4   :  { %6030 = vmatpush1.bf16.msra.mxu1 %v7971_v3  ;;  %v3288_v3 = vrot.slane %v8670_v33, %v8574_v54 }
 0x4d5   :  { %7207 = vmatpush3.bf16.msra.mxu0 %v7975_v13  ;;  %6031 = vmatprep.subr.bf16.mxu1 %v7978_v14  ;;  %v3284_v13 = vrot.slane %v8670_v33, %v8529_v42  ;;  %v3292_v14 = vrot.slane %v8670_v33, %v8577_v56  ;;  %v8057_v56 = vld [vmem:[#allocation14 + $0xc1c] ss:$28 sps:$4 sm:$0xff]  }
 0x4d6   :  { %7208 = vmatprep.subr.bf16.mxu0 %v7979_v18  ;;  %v8049_v18 = vld [vmem:[#allocation14 + $0xba8] ss:$28 sps:$4 sm:$0xff]  }
 0x4d8   :  { %6032 = vmatpush1.bf16.msra.mxu1 %v7976_v20  ;;  %v8054_v20 = vld [vmem:[#allocation14 + $0xbe4] ss:$28 sps:$4 sm:$0xff]  }
 0x4d9   :  { %7209 = vmatpush3.bf16.msra.mxu0 %v7980_v23  ;;  %6033 = vmatprep.subr.bf16.mxu1 %v7983_v24 }
 0x4da   :  { %7210 = vmatprep.subr.bf16.mxu0 %v7984_v37 }
 0x4dc   :  { %6034 = vmatpush1.bf16.msra.mxu1 %v7981_v21 }
 0x4dd   :  { %7211 = vmatpush3.bf16.msra.mxu0 %v7985_v25  ;;  %6046 = vmatprep.subr.bf16.mxu1 %v7988_v53 }
 0x4df   :  { %6036 = vmatmul.mubr.bf16.vlgmr.msra.gmra.mrb[12].mxu1 %v8611_v22  ;;  %v8003_v22 = vld [vmem:[#allocation14 + $0x82c] ss:$28 sps:$4 sm:$0xff]  }
 0x4e0   :  { %6288 = vmatmul.mubr.bf16.vlgmr.msra.gmra.mrb[36].mxu0 %v8641_v17  ;;  %6047 = vmatpush1.bf16.msra.mxu1 %v7986_v26 }
 0x4e1   :  { %6078 = vmatprep.mubr.bf16.mxu1 %v8643_v19  ;;  %6048 = vmatprep.subr.bf16.mxu1 %v7991_v35  ;;  %v8004_v19 = vld [vmem:[#allocation14 + $0x860] ss:$28 sps:$4 sm:$0xff]  }
 0x4e4   :  { %6049 = vmatpush1.bf16.msra.mxu1 %v7989_v27  ;;  %v8052_v27 = vld [vmem:[#allocation14 + $0xbe0] ss:$28 sps:$4 sm:$0xff]  }
 0x4e5   :  { %6050 = vmatprep.subr.bf16.mxu1 %v7994_v28 }
 0x4e8   :  { %6051 = vmatpush1.bf16.msra.mxu1 %v7992_v29 }
 0x4e9   :  { %6052 = vmatprep.subr.bf16.mxu1 %v7997_v30 }
 0x4ec   :  { %6053 = vmatpush1.bf16.msra.mxu1 %v7995_v31 }
 0x4ed   :  { %6054 = vmatprep.subr.bf16.mxu1 %v8000_v16 }
 0x4f0   :  { %6055 = vmatpush1.bf16.msra.mxu1 %v7998_v36  ;;  %v8055_v36 = vld [vmem:[#allocation14 + $0xc18] ss:$28 sps:$4 sm:$0xff]  }
 0x4f1   :  { %6056 = vmatprep.subr.bf16.mxu1 %v8003_v22  ;;  %v8060_v22 = vld [vmem:[#allocation14 + $0xc54] ss:$28 sps:$4 sm:$0xff]  }
 0x4f4   :  { %6057 = vmatpush1.bf16.msra.mxu1 %v8001_v38  ;;  %v8058_v38 = vld [vmem:[#allocation14 + $0xc50] ss:$28 sps:$4 sm:$0xff]  }
 0x4f5   :  { %6058 = vmatprep.subr.bf16.mxu1 %v8006_v41  ;;  %v8063_v41 = vld [vmem:[#allocation14 + $0xc8c] ss:$28 sps:$4 sm:$0xff]  }
 0x4f8   :  { %6059 = vmatpush1.bf16.msra.mxu1 %v8004_v19 }
 0x4f9   :  { %6060 = vmatprep.subr.bf16.mxu1 %v8009_v43 }
 0x4fc   :  { %6061 = vmatpush1.bf16.msra.mxu1 %v8007_v44  ;;  %v8061_v44 = vld [vmem:[#allocation14 + $0xc88] ss:$28 sps:$4 sm:$0xff]  }
 0x4fd   :  { %6062 = vmatprep.subr.bf16.mxu1 %v8012_v45 }
 0x500   :  { %6063 = vmatpush1.bf16.msra.mxu1 %v8010_v46  ;;  %v8066_v46 = vld [vmem:[#allocation14 + $0xcc4] ss:$28 sps:$4 sm:$0xff]  }
 0x501   :  { %6064 = vmatprep.subr.bf16.mxu1 %v8015_v50 }
 0x504   :  { %6065 = vmatpush1.bf16.msra.mxu1 %v8013_v51 }
 0x505   :  { %6066 = vmatprep.subr.bf16.mxu1 %v8018_v52 }
 0x508   :  { %6067 = vmatpush1.bf16.msra.mxu1 %v8016_v55  ;;  %v8064_v55 = vld [vmem:[#allocation14 + $0xcc0] ss:$28 sps:$4 sm:$0xff]  }
 0x509   :  { %6068 = vmatprep.subr.bf16.mxu1 %v8021_v57 }
 0x50c   :  { %6069 = vmatpush1.bf16.msra.mxu1 %v8019_v58  ;;  %v8069_v58 = vld [vmem:[#allocation14 + $0xcfc] ss:$28 sps:$4 sm:$0xff]  }
 0x50d   :  { %6070 = vmatprep.subr.bf16.mxu1 %v8024_v59 }
 0x510   :  { %6071 = vmatpush1.bf16.msra.mxu1 %v8022_v60  ;;  %v8067_v60 = vld [vmem:[#allocation14 + $0xcf8] ss:$28 sps:$4 sm:$0xff]  }
 0x511   :  { %6072 = vmatprep.subr.bf16.mxu1 %v8027_v61  ;;  %v8072_v61 = vld [vmem:[#allocation14 + $0xd34] ss:$28 sps:$4 sm:$0xff]  }
 0x514   :  { %6073 = vmatpush1.bf16.msra.mxu1 %v8025_v62  ;;  %v8070_v62 = vld [vmem:[#allocation14 + $0xd30] ss:$28 sps:$4 sm:$0xff]  }
 0x515   :  { %6074 = vmatprep.subr.bf16.mxu1 %v8030_v63  ;;  %v8075_v63 = vld [vmem:[#allocation14 + $0xd6c] ss:$28 sps:$4 sm:$0xff]  }
 0x518   :  { %6075 = vmatpush1.bf16.msra.mxu1 %v8028_v0  ;;  %v8073_v0 = vld [vmem:[#allocation14 + $0xd68] ss:$28 sps:$4 sm:$0xff]  }
 0x519   :  { %6076 = vmatprep.subr.bf16.mxu1 %v8033_v9  ;;  %v8078_v9 = vld [vmem:[#allocation14 + $0xda4] ss:$28 sps:$4 sm:$0xff]  }
 0x51c   :  { %6077 = vmatpush1.bf16.msra.mxu1 %v8031_v1 }
 0x51d   :  { %6089 = vmatprep.subr.bf16.mxu1 %v8036_v2 }
 0x51f   :  { %6079 = vmatmul.mubr.bf16.vlgmr.msra.gmra.mrb[12].mxu1 %v8639_v15  ;;  %v8051_v15 = vld [vmem:[#allocation14 + $0xbac] ss:$28 sps:$4 sm:$0xff]  }
 0x520   :  { %6090 = vmatpush1.bf16.msra.mxu1 %v8034_v4  ;;  %6121 = vmatprep.mubr.bf16.mxu1 %v8645_v39  ;;  %v3280_v39 = vrot.slane %v8670_v33, %v8526_v40  ;;  %v8076_v4 = vld [vmem:[#allocation14 + $0xda0] ss:$28 sps:$4 sm:$0xff]  }
 0x521   :  { %6091 = vmatprep.subr.bf16.mxu1 %v8039_v5 }
 0x524   :  { %6092 = vmatpush1.bf16.msra.mxu1 %v8037_v6 }
 0x525   :  { %6093 = vmatprep.subr.bf16.mxu1 %v8042_v7  ;;  %v8081_v7 = vld [vmem:[#allocation14 + $0xddc] ss:$28 sps:$4 sm:$0xff]  }
 0x528   :  { %6094 = vmatpush1.bf16.msra.mxu1 %v8040_v10 }
 0x529   :  { %6095 = vmatprep.subr.bf16.mxu1 %v8045_v11 }
 0x52c   :  { %6096 = vmatpush1.bf16.msra.mxu1 %v8043_v12  ;;  %v8079_v12 = vld [vmem:[#allocation14 + $0xdd8] ss:$28 sps:$4 sm:$0xff]  }
 0x52d   :  { %6097 = vmatprep.subr.bf16.mxu1 %v8048_v32  ;;  %v3304_v32 = vrot.slane %v8670_v33, %v1101_v48 }
 0x530   :  { %6098 = vmatpush1.bf16.msra.mxu1 %v8046_v8 }
 0x531   :  { %6099 = vmatprep.subr.bf16.mxu1 %v8051_v15 }
 0x532   :  { %v5779_v23 = vpop.f32.mrb[8].mxu1  ;;  %v5951_v24 = vpop.f32.mrb[20].mxu0 }
 0x533   :  { %v7234_v37 = vadd.f32 %v5779_v23, %v3280_v39  ;;  %v7238_v21 = vadd.f32 %v5951_v24, %v3288_v3  ;;  %v5781_v25 = vpop.f32.mrb[9].mxu1  ;;  %v5953_v53 = vpop.f32.mrb[21].mxu0 }
 0x534   :  { %v7235_v40 = vadd.f32 %v5781_v25, %v3284_v13  ;;  %v7239_v26 = vadd.f32 %v5953_v53, %v3292_v14  ;;  %v5783_v35 = vpop.f32.mrb[10].mxu1  ;;  %v5955_v54 = vpop.f32.mrb[22].mxu0  ;;  %6100 = vmatpush1.bf16.msra.mxu1 %v8049_v18 }
 0x535   :  { %8082 = vtanh.f32 %v7234_v37  ;;  %v7236_v42 = vadd.f32 %v5783_v35, %v3280_v39  ;;  %v5785_v28 = vpop.f32.mrb[11].mxu1  ;;  %v5957_v29 = vpop.f32.mrb[23].mxu0  ;;  %6101 = vmatprep.subr.bf16.mxu1 %v8054_v20  ;;  %v7240_v30 = vadd.f32 %v5955_v54, %v3288_v3 }
 0x536   :  { %8084 = vtanh.f32 %v7238_v21  ;;  %v7237_v31 = vadd.f32 %v5785_v28, %v3284_v13  ;;  %v7241_v16 = vadd.f32 %v5957_v29, %v3292_v14 }
 0x537   :  { %8086 = vtanh.f32 %v7235_v40 }
 0x538   :  { %8088 = vtanh.f32 %v7239_v26  ;;  %6102 = vmatpush1.bf16.msra.mxu1 %v8052_v27 }
 0x539   :  { %8090 = vtanh.f32 %v7236_v42  ;;  %6103 = vmatprep.subr.bf16.mxu1 %v8057_v56 }
 0x53a   :  { %8092 = vtanh.f32 %v7240_v30 }
 0x53b   :  { %8094 = vtanh.f32 %v7237_v31 }
 0x53c   :  { %8096 = vtanh.f32 %v7241_v16  ;;  %6104 = vmatpush1.bf16.msra.mxu1 %v8055_v36  ;;  %v3296_v36 = vrot.slane %v8670_v33, %v1093_v47 }
 0x53d   :  { %6105 = vmatprep.subr.bf16.mxu1 %v8060_v22  ;;  %v3300_v22 = vrot.slane %v8670_v33, %v1097_v49 }
 0x53f   :  { %v8083_v19 = vpop.eup %8082 }
 0x540   :  { %v8085_v43 = vpop.eup %8084  ;;  %6310 = vst [vmem:[#allocation17] sm:$0xff] %v8083_v19  ;;  %6106 = vmatpush1.bf16.msra.mxu1 %v8058_v38 }
 0x541   :  { %v8087_v45 = vpop.eup %8086  ;;  %6312 = vst [vmem:[#allocation17 + $0x10] sm:$0xff] %v8085_v43  ;;  %6107 = vmatprep.subr.bf16.mxu1 %v8063_v41 }
 0x542   :  { %v8089_v50 = vpop.eup %8088  ;;  %6311 = vst [vmem:[#allocation17 + $0x8] sm:$0xff] %v8087_v45 }
 0x543   :  { %v8091_v51 = vpop.eup %8090  ;;  %6313 = vst [vmem:[#allocation17 + $0x18] sm:$0xff] %v8089_v50 }
 0x544   :  { %v8093_v52 = vpop.eup %8092  ;;  %6317 = vst [vmem:[#allocation17 + $0x38] sm:$0xff] %v8091_v51  ;;  %6108 = vmatpush1.bf16.msra.mxu1 %v8061_v44 }
 0x545   :  { %v8095_v57 = vpop.eup %8094  ;;  %6319 = vst [vmem:[#allocation17 + $0x48] sm:$0xff] %v8093_v52  ;;  %6109 = vmatprep.subr.bf16.mxu1 %v8066_v46 }
 0x546   :  { %v8097_v59 = vpop.eup %8096  ;;  %6318 = vst [vmem:[#allocation17 + $0x40] sm:$0xff] %v8095_v57 }
 0x547   :  { %6320 = vst [vmem:[#allocation17 + $0x50] sm:$0xff] %v8097_v59 }
 0x548   :  { %6110 = vmatpush1.bf16.msra.mxu1 %v8064_v55 }
 0x549   :  { %6111 = vmatprep.subr.bf16.mxu1 %v8069_v58 }
 0x54c   :  { %6112 = vmatpush1.bf16.msra.mxu1 %v8067_v60 }
 0x54d   :  { %6113 = vmatprep.subr.bf16.mxu1 %v8072_v61 }
 0x550   :  { %6114 = vmatpush1.bf16.msra.mxu1 %v8070_v62 }
 0x551   :  { %6115 = vmatprep.subr.bf16.mxu1 %v8075_v63 }
 0x553   :  { %v7146_v1 = vpop.f32.mrb[24].mxu0 }
 0x554   :  { %v7147_v2 = vpop.f32.mrb[25].mxu0  ;;  %6116 = vmatpush1.bf16.msra.mxu1 %v8073_v0 }
 0x555   :  { %v7148_v5 = vadd.f32 %v7147_v2, %v7146_v1  ;;  %v7149_v6 = vpop.f32.mrb[26].mxu0  ;;  %6117 = vmatprep.subr.bf16.mxu1 %v8078_v9 }
 0x556   :  { %v7150_v10 = vpop.f32.mrb[27].mxu0 }
 0x557   :  { %v7151_v11 = vadd.f32 %v7150_v10, %v7149_v6  ;;  %v6167_v39 = vadd.f32 %v7148_v5, %v3304_v32 }
 0x558   :  { %6118 = vmatpush1.bf16.msra.mxu1 %v8076_v4 }
 0x559   :  { %6119 = vmatprep.subr.bf16.mxu1 %v8081_v7  ;;  %v6170_v18 = vadd.f32 %v7151_v11, %v3304_v32 }
 0x55c   :  { %6120 = vmatpush1.bf16.msra.mxu1 %v8079_v12 }
 0x55f   :  { %6122 = vmatmul.mubr.bf16.vlgmr.msra.gmra.mrb[12].mxu1 %v8641_v17 }
 0x573   :  { %v7168_v8 = vpop.f32.mrb[28].mxu0 }
 0x574   :  { %v7169_v15 = vpop.f32.mrb[29].mxu0 }
 0x575   :  { %v7170_v3 = vadd.f32 %v7169_v15, %v7168_v8  ;;  %v7171_v13 = vpop.f32.mrb[30].mxu0 }
 0x576   :  { %v7172_v14 = vpop.f32.mrb[31].mxu0 }
 0x577   :  { %v6208_v20 = vadd.f32 %v7170_v3, %v6167_v39  ;;  %v7173_v23 = vadd.f32 %v7172_v14, %v7171_v13 }
 0x579   :  { %v6211_v24 = vadd.f32 %v7173_v23, %v6170_v18 }
 0x593   :  { %v7190_v37 = vpop.f32.mrb[32].mxu0 }
 0x594   :  { %v7191_v21 = vpop.f32.mrb[33].mxu0 }
 0x595   :  { %v7192_v25 = vadd.f32 %v7191_v21, %v7190_v37  ;;  %v7193_v53 = vpop.f32.mrb[34].mxu0 }
 0x596   :  { %v7194_v40 = vpop.f32.mrb[35].mxu0 }
 0x597   :  { %v6249_v17 = vadd.f32 %v7192_v25, %v6208_v20  ;;  %v7195_v26 = vadd.f32 %v7194_v40, %v7193_v53 }
 0x599   :  { %v6252_v35 = vadd.f32 %v7195_v26, %v6211_v24 }
 0x5b3   :  { %v7212_v54 = vpop.f32.mrb[36].mxu0 }
 0x5b4   :  { %v7213_v48 = vpop.f32.mrb[37].mxu0 }
 0x5b5   :  { %v7214_v27 = vadd.f32 %v7213_v48, %v7212_v54  ;;  %v7215_v42 = vpop.f32.mrb[38].mxu0 }
 0x5b6   :  { %v7216_v28 = vpop.f32.mrb[39].mxu0 }
 0x5b7   :  { %v6290_v29 = vadd.f32 %v7214_v27, %v6249_v17  ;;  %v7217_v56 = vadd.f32 %v7216_v28, %v7215_v42 }
 0x5b9   :  { %8098 = vtanh.f32 %v6290_v29  ;;  %v6293_v30 = vadd.f32 %v7217_v56, %v6252_v35 }
 0x5bb   :  { %8100 = vtanh.f32 %v6293_v30 }
 0x5c3   :  { %v8099_v31 = vpop.eup %8098 }
 0x5c4   :  { %6316 = vst [vmem:[#allocation17 + $0x30] sm:$0xff] %v8099_v31 }
 0x5c5   :  { %v8101_v16 = vpop.eup %8100 }
 0x5c6   :  { %6323 = vst [vmem:[#allocation17 + $0x68] sm:$0xff] %v8101_v16 }
 0x632   :  { %v6123_v38 = vpop.f32.mrb[12].mxu1 }
 0x633   :  { %v7242_v41 = vadd.f32 %v6123_v38, %v3296_v36  ;;  %v6125_v19 = vpop.f32.mrb[13].mxu1 }
 0x634   :  { %v7243_v43 = vadd.f32 %v6125_v19, %v3300_v22  ;;  %v6127_v44 = vpop.f32.mrb[14].mxu1 }
 0x635   :  { %8102 = vtanh.f32 %v7242_v41  ;;  %v7244_v45 = vadd.f32 %v6127_v44, %v3296_v36  ;;  %v6129_v46 = vpop.f32.mrb[15].mxu1 }
 0x636   :  { %8104 = vtanh.f32 %v7243_v43  ;;  %v7245_v50 = vadd.f32 %v6129_v46, %v3300_v22 }
 0x637   :  { %8106 = vtanh.f32 %v7244_v45 }
 0x638   :  { %8108 = vtanh.f32 %v7245_v50 }
 0x63f   :  { %v8103_v51 = vpop.eup %8102 }
 0x640   :  { %v8105_v47 = vpop.eup %8104  ;;  %6314 = vst [vmem:[#allocation17 + $0x20] sm:$0xff] %v8103_v51 }
 0x641   :  { %v8107_v34 = vpop.eup %8106  ;;  %6315 = vst [vmem:[#allocation17 + $0x28] sm:$0xff] %v8105_v47 }
 0x642   :  { %v8109_v49 = vpop.eup %8108  ;;  %6321 = vst [vmem:[#allocation17 + $0x58] sm:$0xff] %v8107_v34 }
 0x643   :  { %6322 = vst [vmem:[#allocation17 + $0x60] sm:$0xff] %v8109_v49 }
 0x644   :  { %8319 = shalt.err (!%p8316_p6)
}
 0x645   :  { %s8320_s28 = scalar_lea.hbm %s8711_s9, 1792 }
 0x646   :  { %p8321_p7 = scmp.ne.s32.totalorder %s8711_s9, %s8320_s28  ;;  %p8324_p8 = scmp.lt.u32.totalorder %s8320_s28, %s8711_s9 }
 0x648   :  { %p8326_p9 = pnand %p8324_p8, %p8321_p7 }
 0x64a   :  { %8329 = shalt.err (!%p8326_p9)
}
 0x64b   :  { %s8363_s1 = smov 896   ;;  %s8364_s13 = smov 56  }
 0x64c   :  { %6335 = dma.vmem_to_hbm [thread:$0]  %s6330_s26, 1792, %s8711_s9, [#allocation4], %s8363_s1, %s8363_s1, %s8364_s13  }
 0x64d   :  { %8340 = dma.done.wait [#allocation4], 1792  }
 0x64e   :  { %8341 = vsyncadd [#allocation4], 4294965504 }
 0x64f   :  { %6339 = vsyncpa [#allocation3], 1 }
 0x650   :  { %6340 = vsyncpa [#allocation6], 1 }
 0x651   :  { %6341 = vsyncpa [#allocation9], 1 }
 0x652   :  { %6342 = vsyncpa [#allocation12], 1 }
 0x653   :  { %6343 = vsyncpa [#allocation15], 1 }
 0x654   :  { %6344 = vsyncpa [#allocation4], 1 }

</bundles_post_ra>
